<compile_context>
chip_gen: v6e
topology: v6e:2x2x1
jax: 0.10.0
libtpu: 0.0.40
codegen_flags: <defaults>
</compile_context>

<pallas_src>
import functools

import jax
import jax.numpy as jnp
from jax.experimental import pallas as pl
from jax.experimental.pallas import tpu as pltpu


LANE = 128      # pad Cout to the TPU lane width for the MXU matmuls
_PADX = 8       # zero rows appended to each input band (slack for the last tap slices)


def _round_up(x, m):
    return (x + m - 1) // m * m


# ----------------------------------------------------------------------------
# Shared: 3x3 conv of one flat row band as 9 shifted MXU matmuls, accumulated
# in a LOCAL f32 value (written/consumed once by the caller).
# ----------------------------------------------------------------------------
def _conv_acc(xb_ref, w_ref, th, wp):
    """xb_ref: (1, (th+2)*wp + _PADX, Cin) bf16 -- flat padded input band (halo incl.)
       w_ref:  (9, Cin, Cpad)              bf16 -- per-tap weights (resident)
       returns (th*wp, Cpad) f32 conv accumulator (junk cols included)."""
    l = th * wp
    acc = None
    for tap in range(9):
        kh, kw = divmod(tap, 3)
        # Contiguous row slice of the flat band == the (kh, kw)-shifted patch matrix.
        lhs = xb_ref[0, pl.ds(kh * wp + kw, l), :]                   # (l, Cin) bf16
        contrib = jnp.dot(lhs, w_ref[tap], preferred_element_type=jnp.float32)
        acc = contrib if acc is None else acc + contrib
    # TODO(synk): for very small Cin it would pay further to fold the 9 taps into a
    # single K=9*Cin matmul (needs a lane-concatenated LHS staging buffer).
    return acc


# ----------------------------------------------------------------------------
# Pass 1: per-tile BatchNorm partial statistics only (no conv output to HBM).
# ----------------------------------------------------------------------------
def _conv_stats_kernel(xb_ref, w_ref, stats_ref, *, th, wp, w_img):
    acc = _conv_acc(xb_ref, w_ref, th, wp)                           # (l, Cpad) f32
    l = th * wp
    # Column-validity mask generated in-kernel (junk cols w in [w_img, wp)).
    # Exact per-row column index without integer div/mod: (j+0.5)/wp is never an
    # integer and the f32 rounding error cannot cross the 0.5/wp gap, so floor is exact.
    ji = jax.lax.broadcasted_iota(jnp.int32, (l, 1), 0).astype(jnp.float32)
    col = ji - wp * jnp.floor((ji + 0.5) * (1.0 / wp))
    maskf = (col < (w_img - 0.5)).astype(jnp.float32)                # (l, 1)
    masked = acc * maskf                                             # mask only the reduce operand
    stats_ref[0, 0:1, :] = jnp.sum(masked, axis=0, keepdims=True)
    stats_ref[0, 1:2, :] = jnp.sum(masked * acc, axis=0, keepdims=True)


# ----------------------------------------------------------------------------
# Pass 2a: recompute conv + BN affine + ReLU (no pooling).  Output = Cout lanes.
# ----------------------------------------------------------------------------
def _conv_bn_relu_kernel(xb_ref, w_ref, scale_ref, shift_ref, o_ref, *, th, wp, cout):
    acc = _conv_acc(xb_ref, w_ref, th, wp)
    y = jnp.maximum(acc * scale_ref[...] + shift_ref[...], 0.0)
    o_ref[0] = y[:, :cout]


# ----------------------------------------------------------------------------
# Pass 2b: recompute conv + BN affine + fused MaxPool2d(2,2) + ReLU.
# ----------------------------------------------------------------------------
def _conv_bn_relu_pool_kernel(xb_ref, w_ref, scale_ref, shift_ref, o_ref,
                              bn_scr, row_scr, *, th, wp, w2, cout):
    """o_ref:   (1, th//2, w2, Cout) f32
       bn_scr:  (th*wp, Cpad) f32 VMEM scratch (BN'd tile, strided-readable)
       row_scr: (wp, Cpad)    f32 VMEM scratch (one vertically-maxed row)"""
    acc = _conv_acc(xb_ref, w_ref, th, wp)
    # Affine must precede the max (gamma may be negative); ReLU commutes with max.
    bn_scr[...] = acc * scale_ref[...] + shift_ref[...]
    for q in range(th // 2):                 # pooled rows of this tile (static unroll)
        top = bn_scr[pl.ds(q * 2 * wp, wp), :]          # image row 2q   (contiguous)
        bot = bn_scr[pl.ds(q * 2 * wp + wp, wp), :]     # image row 2q+1 (contiguous)
        row_scr[...] = jnp.maximum(top, bot)            # vertical max   (wp, Cpad)
        h = jnp.maximum(row_scr[pl.ds(0, w2, stride=2), :],   # single strided column max
                        row_scr[pl.ds(1, w2, stride=2), :])   # (junk cols never touched)
        o_ref[0, q] = jnp.maximum(h, 0.0)[:, :cout]


# ----------------------------------------------------------------------------
# Wrapper
# ----------------------------------------------------------------------------
def _choose_tile_h(H, Wp, has_maxpool, budget_rows=2048):
    # budget_rows ~2048 keeps tiles a few MiB (safe on v7x); raise on v5e/v6e (128 MiB VMEM).
    tile_h = H
    for th in sorted((d for d in range(1, H + 1) if H % d == 0), reverse=True):
        if th * Wp > budget_rows:
            continue
        if has_maxpool and th % 2:
            continue
        tile_h = th
        break
    return tile_h


def _vmem_limit_bytes(Lband, L):
    est = (2 * Lband * LANE * 2          # double-buffered bf16 input band (lane-padded)
           + 2 * 9 * 8 * LANE * 2        # resident weights
           + 2 * L * LANE * 4            # f32 conv accumulator + BN scratch
           + 2 * L * LANE * 4)           # double-buffered output tile (lane-padded)
    # Headroom, floor, and a 48 MiB cap so we never request v7x's full 64 MiB.
    return min(48 * 1024 * 1024, max(int(est * 1.5) + (8 << 20), 16 << 20))


def conv_block_forward(x_nchw, conv_w, gamma, beta, *, has_maxpool, eps=1e-5, tile_h=None):
    """ConvBlock forward (kernel_size=3, stride=1, padding=1, bias=False)."""
    N, Cin, H, W = x_nchw.shape
    Cout, Cin_w, K, K2 = conv_w.shape
    assert Cin_w == Cin and K == K2 == 3, "implements the module defaults (k=3, s=1, p=1)"
    if has_maxpool:
        assert H % 2 == 0 and W % 2 == 0

    Wp = W + 2                       # padded width (2 junk columns carried per row)
    Cpad = _round_up(Cout, LANE)     # lane-dense channels for the MXU only

    if tile_h is None:
        tile_h = _choose_tile_h(H, Wp, has_maxpool)
    assert H % tile_h == 0
    if has_maxpool:
        assert tile_h % 2 == 0
    nT = H // tile_h
    NT = N * nT                      # grid size (>= 2 keeps both v7x TCs busy)
    L = tile_h * Wp                  # conv rows per tile (includes junk columns)

    # ---- layout glue: NCHW -> padded NHWC -> overlapping flat row bands (bf16) ----
    # Built once, streamed by BOTH passes.
    # TODO(synk): for large Cin, fetch the halo bands straight from the padded input via
    # manual DMA (memory_space=pl.ANY) instead of materializing the duplicated bands.
    x_nhwc = jnp.transpose(x_nchw, (0, 2, 3, 1)).astype(jnp.bfloat16)
    xp = jnp.pad(x_nhwc, ((0, 0), (1, 1), (1, 1), (0, 0)))            # (N, H+2, Wp, Cin)
    xp_flat = xp.reshape(N, (H + 2) * Wp, Cin)
    bands = [xp_flat[:, t * tile_h * Wp:(t * tile_h + tile_h + 2) * Wp, :]
             for t in range(nT)]
    xb = jnp.stack(bands, axis=1).reshape(NT, (tile_h + 2) * Wp, Cin)
    xb = jnp.pad(xb, ((0, 0), (0, _PADX), (0, 0)))                    # tap-slice slack
    Lband = (tile_h + 2) * Wp + _PADX

    # Weights: (Cout, Cin, 3, 3) -> (9, Cin, Cout) -> zero-pad channels -> bf16.
    w_taps = jnp.transpose(conv_w, (2, 3, 1, 0)).reshape(9, Cin, Cout)
    w_taps = jnp.pad(w_taps, ((0, 0), (0, 0), (0, Cpad - Cout))).astype(jnp.bfloat16)

    cparams = pltpu.CompilerParams(
        dimension_semantics=("parallel",),
        vmem_limit_bytes=_vmem_limit_bytes(Lband, L))

    # ---- pass 1: partial BN statistics only ----------------------------------------
    part = pl.pallas_call(
        functools.partial(_conv_stats_kernel, th=tile_h, wp=Wp, w_img=W),
        out_shape=jax.ShapeDtypeStruct((NT, 2, Cpad), jnp.float32),
        grid=(NT,),
        in_specs=[
            pl.BlockSpec((1, Lband, Cin), lambda i: (i, 0, 0)),
            pl.BlockSpec((9, Cin, Cpad), lambda i: (0, 0, 0)),
        ],
        out_specs=pl.BlockSpec((1, 2, Cpad), lambda i: (i, 0, 0)),
        compiler_params=cparams,
    )(xb, w_taps)

    # ---- tiny cross-tile stats combine + BN scale/shift (per-channel glue) ----------
    tot = jnp.sum(part, axis=0)                      # (2, Cpad)
    m_count = jnp.float32(N * H * W)
    mean = tot[0] / m_count
    # NOTE: E[x^2]-E[x]^2 in f32 is adequate for O(1) post-conv activations.
    var = jnp.maximum(tot[1] / m_count - mean * mean, 0.0)
    inv = jax.lax.rsqrt(var + eps)
    gamma_p = jnp.pad(gamma.astype(jnp.float32), (0, Cpad - Cout))
    beta_p = jnp.pad(beta.astype(jnp.float32), (0, Cpad - Cout))
    scale = (gamma_p * inv).reshape(1, Cpad)
    shift = (beta_p - mean * gamma_p * inv).reshape(1, Cpad)

    # ---- pass 2: recompute conv + BN affine + ReLU (+ fused maxpool) ----------------
    if has_maxpool:
        H2, W2 = H // 2, W // 2
        TQ = tile_h // 2
        out = pl.pallas_call(
            functools.partial(_conv_bn_relu_pool_kernel,
                              th=tile_h, wp=Wp, w2=W2, cout=Cout),
            out_shape=jax.ShapeDtypeStruct((NT, TQ, W2, Cout), jnp.float32),
            grid=(NT,),
            in_specs=[
                pl.BlockSpec((1, Lband, Cin), lambda i: (i, 0, 0)),
                pl.BlockSpec((9, Cin, Cpad), lambda i: (0, 0, 0)),
                pl.BlockSpec((1, Cpad), lambda i: (0, 0)),
                pl.BlockSpec((1, Cpad), lambda i: (0, 0)),
            ],
            out_specs=pl.BlockSpec((1, TQ, W2, Cout), lambda i: (i, 0, 0, 0)),
            scratch_shapes=[pltpu.VMEM((L, Cpad), jnp.float32),
                            pltpu.VMEM((Wp, Cpad), jnp.float32)],
            compiler_params=cparams,
        )(xb, w_taps, scale, shift)
        out_nhwc = out.reshape(N, H2, W2, Cout)
    else:
        out = pl.pallas_call(
            functools.partial(_conv_bn_relu_kernel, th=tile_h, wp=Wp, cout=Cout),
            out_shape=jax.ShapeDtypeStruct((NT, L, Cout), jnp.float32),
            grid=(NT,),
            in_specs=[
                pl.BlockSpec((1, Lband, Cin), lambda i: (i, 0, 0)),
                pl.BlockSpec((9, Cin, Cpad), lambda i: (0, 0, 0)),
                pl.BlockSpec((1, Cpad), lambda i: (0, 0)),
                pl.BlockSpec((1, Cpad), lambda i: (0, 0)),
            ],
            out_specs=pl.BlockSpec((1, L, Cout), lambda i: (i, 0, 0)),
            compiler_params=cparams,
        )(xb, w_taps, scale, shift)
        out_nhwc = out.reshape(N, H, Wp, Cout)[:, :, :W, :]

    # Back to the PyTorch NCHW convention (elide this transpose when chaining blocks in NHWC).
    # TODO(synk): BatchNorm2d running_mean/running_var momentum updates are stateful
    # buffers not returned by forward(); they are not modeled here.
    return jnp.transpose(out_nhwc, (0, 3, 1, 2))


# ----------------------------------------------------------------------------
# Pure-JAX reference (conv operands cast to bf16 to mirror the kernel's MXU
# precision; accumulation and BatchNorm math stay in f32).
# ----------------------------------------------------------------------------
def conv_block_reference(x_nchw, conv_w, gamma, beta, *, has_maxpool, eps=1e-5):
    y = jax.lax.conv_general_dilated(
        x_nchw.astype(jnp.bfloat16), conv_w.astype(jnp.bfloat16),
        window_strides=(1, 1), padding=((1, 1), (1, 1)),
        dimension_numbers=("NCHW", "OIHW", "NCHW"),
        preferred_element_type=jnp.float32)
    mean = jnp.mean(y, axis=(0, 2, 3), keepdims=True)
    var = jnp.mean((y - mean) ** 2, axis=(0, 2, 3), keepdims=True)
    y = (y - mean) * jax.lax.rsqrt(var + eps)
    y = y * gamma.reshape(1, -1, 1, 1) + beta.reshape(1, -1, 1, 1)
    y = jnp.maximum(y, 0.0)
    if has_maxpool:
        y = jax.lax.reduce_window(
            y, -jnp.inf, jax.lax.max,
            window_dimensions=(1, 1, 2, 2), window_strides=(1, 1, 2, 2), padding="VALID")
    return y


if __name__ == "__main__":
    key = jax.random.PRNGKey(0)
    k_x, k_w, k_g, k_b = jax.random.split(key, 4)

    # Small shapes consistent with the module: in_channels=4, out_channels=8.
    N, Cin, H, W = 2, 4, 16, 16
    Cout, K = 8, 3

    x = jax.random.normal(k_x, (N, Cin, H, W), dtype=jnp.float32)
    conv_w = 0.1 * jax.random.normal(k_w, (Cout, Cin, K, K), dtype=jnp.float32)
    gamma = 1.0 + 0.1 * jax.random.normal(k_g, (Cout,), dtype=jnp.float32)
    beta = 0.1 * jax.random.normal(k_b, (Cout,), dtype=jnp.float32)

    ok = True
    for has_maxpool in (False, True):
        for th in (8, None):   # th=8 exercises multi-tile BN stats accumulation
            fwd = jax.jit(functools.partial(conv_block_forward,
                                            has_maxpool=has_maxpool, tile_h=th))
            out = jax.block_until_ready(fwd(x, conv_w, gamma, beta))
            ref = conv_block_reference(x, conv_w, gamma, beta, has_maxpool=has_maxpool)
            if out.shape != ref.shape or not jnp.allclose(out, ref, atol=1e-3, rtol=1e-3):
                ok = False

    print("KERNEL_OK" if ok else "KERNEL_MISMATCH")
</pallas_src>

<mosaic_0001>
module attributes {stable_mosaic.version = 11 : i64} {
  func.func @_conv_stats_kernel(%arg0: i32, %arg1: memref<1x188x4xbf16, #tpu.memory_space<vmem>>, %arg2: memref<9x4x128xbf16, #tpu.memory_space<vmem>>, %arg3: memref<1x2x128xf32, #tpu.memory_space<vmem>>) attributes {dimension_semantics = [#tpu.dimension_semantics<parallel>], iteration_bounds = array<i64: 4>, scalar_prefetch = 0 : i64, scratch_operands = 0 : i64, tpu.core_type = #tpu.core_type<tc>, window_params = [{transform_indices = @transform_0, window_bounds = array<i64: 1, 188, 4>}, {pipeline_mode = #tpu.pipeline_mode<synchronous>, transform_indices = @transform_1, window_bounds = array<i64: 9, 4, 128>}, {transform_indices = @transform_2, window_bounds = array<i64: 1, 2, 128>}]} {
    %c0 = arith.constant 0 : index
    %c0_0 = arith.constant 0 : index
    %c0_1 = arith.constant 0 : index
    %0 = vector.load %arg1[%c0, %c0_0, %c0_1] : memref<1x188x4xbf16, #tpu.memory_space<vmem>>, vector<1x144x4xbf16>
    %1 = vector.shape_cast %0 : vector<1x144x4xbf16> to vector<144x4xbf16>
    %c0_2 = arith.constant 0 : index
    %c0_3 = arith.constant 0 : index
    %c0_4 = arith.constant 0 : index
    %2 = vector.load %arg2[%c0_2, %c0_3, %c0_4] : memref<9x4x128xbf16, #tpu.memory_space<vmem>>, vector<1x4x128xbf16>
    %3 = vector.shape_cast %2 : vector<1x4x128xbf16> to vector<4x128xbf16>
    %cst = arith.constant dense<0.000000e+00> : vector<144x128xf32>
    %4 = tpu.matmul %1, %3, %cst {dimension_numbers = #tpu.dot_dimension_numbers<[1], [0], [0], [1], [0, 0, 1, 1], [], []>} : vector<144x4xbf16>, vector<4x128xbf16>, vector<144x128xf32> -> vector<144x128xf32>
    %c0_5 = arith.constant 0 : index
    %c1 = arith.constant 1 : index
    %c0_6 = arith.constant 0 : index
    %5 = vector.load %arg1[%c0_5, %c1, %c0_6] : memref<1x188x4xbf16, #tpu.memory_space<vmem>>, vector<1x144x4xbf16>
    %6 = vector.shape_cast %5 : vector<1x144x4xbf16> to vector<144x4xbf16>
    %c1_7 = arith.constant 1 : index
    %c0_8 = arith.constant 0 : index
    %c0_9 = arith.constant 0 : index
    %7 = vector.load %arg2[%c1_7, %c0_8, %c0_9] : memref<9x4x128xbf16, #tpu.memory_space<vmem>>, vector<1x4x128xbf16>
    %8 = vector.shape_cast %7 : vector<1x4x128xbf16> to vector<4x128xbf16>
    %cst_10 = arith.constant dense<0.000000e+00> : vector<144x128xf32>
    %9 = tpu.matmul %6, %8, %cst_10 {dimension_numbers = #tpu.dot_dimension_numbers<[1], [0], [0], [1], [0, 0, 1, 1], [], []>} : vector<144x4xbf16>, vector<4x128xbf16>, vector<144x128xf32> -> vector<144x128xf32>
    %10 = arith.addf %4, %9 : vector<144x128xf32>
    %c0_11 = arith.constant 0 : index
    %c2 = arith.constant 2 : index
    %c0_12 = arith.constant 0 : index
    %11 = vector.load %arg1[%c0_11, %c2, %c0_12] : memref<1x188x4xbf16, #tpu.memory_space<vmem>>, vector<1x144x4xbf16>
    %12 = vector.shape_cast %11 : vector<1x144x4xbf16> to vector<144x4xbf16>
    %c2_13 = arith.constant 2 : index
    %c0_14 = arith.constant 0 : index
    %c0_15 = arith.constant 0 : index
    %13 = vector.load %arg2[%c2_13, %c0_14, %c0_15] : memref<9x4x128xbf16, #tpu.memory_space<vmem>>, vector<1x4x128xbf16>
    %14 = vector.shape_cast %13 : vector<1x4x128xbf16> to vector<4x128xbf16>
    %cst_16 = arith.constant dense<0.000000e+00> : vector<144x128xf32>
    %15 = tpu.matmul %12, %14, %cst_16 {dimension_numbers = #tpu.dot_dimension_numbers<[1], [0], [0], [1], [0, 0, 1, 1], [], []>} : vector<144x4xbf16>, vector<4x128xbf16>, vector<144x128xf32> -> vector<144x128xf32>
    %16 = arith.addf %10, %15 : vector<144x128xf32>
    %c0_17 = arith.constant 0 : index
    %c18 = arith.constant 18 : index
    %c0_18 = arith.constant 0 : index
    %17 = vector.load %arg1[%c0_17, %c18, %c0_18] : memref<1x188x4xbf16, #tpu.memory_space<vmem>>, vector<1x144x4xbf16>
    %18 = vector.shape_cast %17 : vector<1x144x4xbf16> to vector<144x4xbf16>
    %c3 = arith.constant 3 : index
    %c0_19 = arith.constant 0 : index
    %c0_20 = arith.constant 0 : index
    %19 = vector.load %arg2[%c3, %c0_19, %c0_20] : memref<9x4x128xbf16, #tpu.memory_space<vmem>>, vector<1x4x128xbf16>
    %20 = vector.shape_cast %19 : vector<1x4x128xbf16> to vector<4x128xbf16>
    %cst_21 = arith.constant dense<0.000000e+00> : vector<144x128xf32>
    %21 = tpu.matmul %18, %20, %cst_21 {dimension_numbers = #tpu.dot_dimension_numbers<[1], [0], [0], [1], [0, 0, 1, 1], [], []>} : vector<144x4xbf16>, vector<4x128xbf16>, vector<144x128xf32> -> vector<144x128xf32>
    %22 = arith.addf %16, %21 : vector<144x128xf32>
    %c0_22 = arith.constant 0 : index
    %c19 = arith.constant 19 : index
    %c0_23 = arith.constant 0 : index
    %23 = vector.load %arg1[%c0_22, %c19, %c0_23] : memref<1x188x4xbf16, #tpu.memory_space<vmem>>, vector<1x144x4xbf16>
    %24 = vector.shape_cast %23 : vector<1x144x4xbf16> to vector<144x4xbf16>
    %c4 = arith.constant 4 : index
    %c0_24 = arith.constant 0 : index
    %c0_25 = arith.constant 0 : index
    %25 = vector.load %arg2[%c4, %c0_24, %c0_25] : memref<9x4x128xbf16, #tpu.memory_space<vmem>>, vector<1x4x128xbf16>
    %26 = vector.shape_cast %25 : vector<1x4x128xbf16> to vector<4x128xbf16>
    %cst_26 = arith.constant dense<0.000000e+00> : vector<144x128xf32>
    %27 = tpu.matmul %24, %26, %cst_26 {dimension_numbers = #tpu.dot_dimension_numbers<[1], [0], [0], [1], [0, 0, 1, 1], [], []>} : vector<144x4xbf16>, vector<4x128xbf16>, vector<144x128xf32> -> vector<144x128xf32>
    %28 = arith.addf %22, %27 : vector<144x128xf32>
    %c0_27 = arith.constant 0 : index
    %c20 = arith.constant 20 : index
    %c0_28 = arith.constant 0 : index
    %29 = vector.load %arg1[%c0_27, %c20, %c0_28] : memref<1x188x4xbf16, #tpu.memory_space<vmem>>, vector<1x144x4xbf16>
    %30 = vector.shape_cast %29 : vector<1x144x4xbf16> to vector<144x4xbf16>
    %c5 = arith.constant 5 : index
    %c0_29 = arith.constant 0 : index
    %c0_30 = arith.constant 0 : index
    %31 = vector.load %arg2[%c5, %c0_29, %c0_30] : memref<9x4x128xbf16, #tpu.memory_space<vmem>>, vector<1x4x128xbf16>
    %32 = vector.shape_cast %31 : vector<1x4x128xbf16> to vector<4x128xbf16>
    %cst_31 = arith.constant dense<0.000000e+00> : vector<144x128xf32>
    %33 = tpu.matmul %30, %32, %cst_31 {dimension_numbers = #tpu.dot_dimension_numbers<[1], [0], [0], [1], [0, 0, 1, 1], [], []>} : vector<144x4xbf16>, vector<4x128xbf16>, vector<144x128xf32> -> vector<144x128xf32>
    %34 = arith.addf %28, %33 : vector<144x128xf32>
    %c0_32 = arith.constant 0 : index
    %c36 = arith.constant 36 : index
    %c0_33 = arith.constant 0 : index
    %35 = vector.load %arg1[%c0_32, %c36, %c0_33] : memref<1x188x4xbf16, #tpu.memory_space<vmem>>, vector<1x144x4xbf16>
    %36 = vector.shape_cast %35 : vector<1x144x4xbf16> to vector<144x4xbf16>
    %c6 = arith.constant 6 : index
    %c0_34 = arith.constant 0 : index
    %c0_35 = arith.constant 0 : index
    %37 = vector.load %arg2[%c6, %c0_34, %c0_35] : memref<9x4x128xbf16, #tpu.memory_space<vmem>>, vector<1x4x128xbf16>
    %38 = vector.shape_cast %37 : vector<1x4x128xbf16> to vector<4x128xbf16>
    %cst_36 = arith.constant dense<0.000000e+00> : vector<144x128xf32>
    %39 = tpu.matmul %36, %38, %cst_36 {dimension_numbers = #tpu.dot_dimension_numbers<[1], [0], [0], [1], [0, 0, 1, 1], [], []>} : vector<144x4xbf16>, vector<4x128xbf16>, vector<144x128xf32> -> vector<144x128xf32>
    %40 = arith.addf %34, %39 : vector<144x128xf32>
    %c0_37 = arith.constant 0 : index
    %c37 = arith.constant 37 : index
    %c0_38 = arith.constant 0 : index
    %41 = vector.load %arg1[%c0_37, %c37, %c0_38] : memref<1x188x4xbf16, #tpu.memory_space<vmem>>, vector<1x144x4xbf16>
    %42 = vector.shape_cast %41 : vector<1x144x4xbf16> to vector<144x4xbf16>
    %c7 = arith.constant 7 : index
    %c0_39 = arith.constant 0 : index
    %c0_40 = arith.constant 0 : index
    %43 = vector.load %arg2[%c7, %c0_39, %c0_40] : memref<9x4x128xbf16, #tpu.memory_space<vmem>>, vector<1x4x128xbf16>
    %44 = vector.shape_cast %43 : vector<1x4x128xbf16> to vector<4x128xbf16>
    %cst_41 = arith.constant dense<0.000000e+00> : vector<144x128xf32>
    %45 = tpu.matmul %42, %44, %cst_41 {dimension_numbers = #tpu.dot_dimension_numbers<[1], [0], [0], [1], [0, 0, 1, 1], [], []>} : vector<144x4xbf16>, vector<4x128xbf16>, vector<144x128xf32> -> vector<144x128xf32>
    %46 = arith.addf %40, %45 : vector<144x128xf32>
    %c0_42 = arith.constant 0 : index
    %c38 = arith.constant 38 : index
    %c0_43 = arith.constant 0 : index
    %47 = vector.load %arg1[%c0_42, %c38, %c0_43] : memref<1x188x4xbf16, #tpu.memory_space<vmem>>, vector<1x144x4xbf16>
    %48 = vector.shape_cast %47 : vector<1x144x4xbf16> to vector<144x4xbf16>
    %c8 = arith.constant 8 : index
    %c0_44 = arith.constant 0 : index
    %c0_45 = arith.constant 0 : index
    %49 = vector.load %arg2[%c8, %c0_44, %c0_45] : memref<9x4x128xbf16, #tpu.memory_space<vmem>>, vector<1x4x128xbf16>
    %50 = vector.shape_cast %49 : vector<1x4x128xbf16> to vector<4x128xbf16>
    %cst_46 = arith.constant dense<0.000000e+00> : vector<144x128xf32>
    %51 = tpu.matmul %48, %50, %cst_46 {dimension_numbers = #tpu.dot_dimension_numbers<[1], [0], [0], [1], [0, 0, 1, 1], [], []>} : vector<144x4xbf16>, vector<4x128xbf16>, vector<144x128xf32> -> vector<144x128xf32>
    %52 = arith.addf %46, %51 : vector<144x128xf32>
    %53 = tpu.iota {dimensions = array<i32: 0>} : vector<144x1xi32>
    %54 = arith.sitofp %53 : vector<144x1xi32> to vector<144x1xf32>
    %cst_47 = arith.constant 5.000000e-01 : f32
    %55 = vector.broadcast %cst_47 : f32 to vector<144x1xf32>
    %56 = arith.addf %54, %55 : vector<144x1xf32>
    %cst_48 = arith.constant 0.055555556 : f32
    %57 = vector.broadcast %cst_48 : f32 to vector<144x1xf32>
    %58 = arith.mulf %56, %57 : vector<144x1xf32>
    %59 = math.floor %58 : vector<144x1xf32>
    %cst_49 = arith.constant 1.800000e+01 : f32
    %60 = vector.broadcast %cst_49 : f32 to vector<144x1xf32>
    %61 = arith.mulf %60, %59 : vector<144x1xf32>
    %62 = arith.subf %54, %61 : vector<144x1xf32>
    %cst_50 = arith.constant 1.550000e+01 : f32
    %63 = vector.broadcast %cst_50 : f32 to vector<144x1xf32>
    %64 = arith.cmpf olt, %62, %63 : vector<144x1xf32>
    %65 = arith.extui %64 : vector<144x1xi1> to vector<144x1xi32>
    %66 = arith.sitofp %65 : vector<144x1xi32> to vector<144x1xf32>
    %67 = vector.broadcast %66 : vector<144x1xf32> to vector<144x128xf32>
    %68 = arith.mulf %52, %67 : vector<144x128xf32>
    %cst_51 = arith.constant dense<0.000000e+00> : vector<128xf32>
    %69 = vector.multi_reduction <add>, %68, %cst_51 [0] : vector<144x128xf32> to vector<128xf32>
    %70 = vector.shape_cast %69 : vector<128xf32> to vector<1x128xf32>
    %c0_52 = arith.constant 0 : index
    %c0_53 = arith.constant 0 : index
    %c0_54 = arith.constant 0 : index
    %71 = vector.load %arg3[%c0_52, %c0_53, %c0_54] : memref<1x2x128xf32, #tpu.memory_space<vmem>>, vector<1x1x128xf32>
    %72 = vector.shape_cast %71 : vector<1x1x128xf32> to vector<1x128xf32>
    %73 = vector.shape_cast %70 : vector<1x128xf32> to vector<1x1x128xf32>
    tpu.vector_store %arg3[%c0_52, %c0_53, %c0_54], %73 {strides = array<i32>} : memref<1x2x128xf32, #tpu.memory_space<vmem>>, vector<1x1x128xf32>,
    %74 = arith.mulf %68, %52 : vector<144x128xf32>
    %cst_55 = arith.constant dense<0.000000e+00> : vector<128xf32>
    %75 = vector.multi_reduction <add>, %74, %cst_55 [0] : vector<144x128xf32> to vector<128xf32>
    %76 = vector.shape_cast %75 : vector<128xf32> to vector<1x128xf32>
    %c0_56 = arith.constant 0 : index
    %c1_57 = arith.constant 1 : index
    %c0_58 = arith.constant 0 : index
    %77 = vector.load %arg3[%c0_56, %c1_57, %c0_58] : memref<1x2x128xf32, #tpu.memory_space<vmem>>, vector<1x1x128xf32>
    %78 = vector.shape_cast %77 : vector<1x1x128xf32> to vector<1x128xf32>
    %79 = vector.shape_cast %76 : vector<1x128xf32> to vector<1x1x128xf32>
    tpu.vector_store %arg3[%c0_56, %c1_57, %c0_58], %79 {strides = array<i32>} : memref<1x2x128xf32, #tpu.memory_space<vmem>>, vector<1x1x128xf32>,
    return
  }
  func.func @transform_0(%arg0: i32) -> (i32, i32, i32) {
    %c0_i32 = arith.constant 0 : i32
    %c0_i32_0 = arith.constant 0 : i32
    %c0_i32_1 = arith.constant 0 : i32
    return %arg0, %c0_i32, %c0_i32_0 : i32, i32, i32
  }
  func.func @transform_1(%arg0: i32) -> (i32, i32, i32) {
    %c0_i32 = arith.constant 0 : i32
    %c0_i32_0 = arith.constant 0 : i32
    %c0_i32_1 = arith.constant 0 : i32
    %c0_i32_2 = arith.constant 0 : i32
    return %c0_i32, %c0_i32_0, %c0_i32_1 : i32, i32, i32
  }
  func.func @transform_2(%arg0: i32) -> (i32, i32, i32) {
    %c0_i32 = arith.constant 0 : i32
    %c0_i32_0 = arith.constant 0 : i32
    %c0_i32_1 = arith.constant 0 : i32
    return %arg0, %c0_i32, %c0_i32_0 : i32, i32, i32
  }
}

module attributes {stable_mosaic.version = 11 : i64} {
  func.func @_conv_bn_relu_kernel(%arg0: i32, %arg1: memref<1x188x4xbf16, #tpu.memory_space<vmem>>, %arg2: memref<9x4x128xbf16, #tpu.memory_space<vmem>>, %arg3: memref<1x128xf32, #tpu.memory_space<vmem>>, %arg4: memref<1x128xf32, #tpu.memory_space<vmem>>, %arg5: memref<1x144x8xf32, #tpu.memory_space<vmem>>) attributes {dimension_semantics = [#tpu.dimension_semantics<parallel>], iteration_bounds = array<i64: 4>, scalar_prefetch = 0 : i64, scratch_operands = 0 : i64, tpu.core_type = #tpu.core_type<tc>, window_params = [{transform_indices = @transform_0, window_bounds = array<i64: 1, 188, 4>}, {pipeline_mode = #tpu.pipeline_mode<synchronous>, transform_indices = @transform_1, window_bounds = array<i64: 9, 4, 128>}, {pipeline_mode = #tpu.pipeline_mode<synchronous>, transform_indices = @transform_2, window_bounds = array<i64: 1, 128>}, {pipeline_mode = #tpu.pipeline_mode<synchronous>, transform_indices = @transform_3, window_bounds = array<i64: 1, 128>}, {transform_indices = @transform_4, window_bounds = array<i64: 1, 144, 8>}]} {
    %c0 = arith.constant 0 : index
    %c0_0 = arith.constant 0 : index
    %c0_1 = arith.constant 0 : index
    %0 = vector.load %arg1[%c0, %c0_0, %c0_1] : memref<1x188x4xbf16, #tpu.memory_space<vmem>>, vector<1x144x4xbf16>
    %1 = vector.shape_cast %0 : vector<1x144x4xbf16> to vector<144x4xbf16>
    %c0_2 = arith.constant 0 : index
    %c0_3 = arith.constant 0 : index
    %c0_4 = arith.constant 0 : index
    %2 = vector.load %arg2[%c0_2, %c0_3, %c0_4] : memref<9x4x128xbf16, #tpu.memory_space<vmem>>, vector<1x4x128xbf16>
    %3 = vector.shape_cast %2 : vector<1x4x128xbf16> to vector<4x128xbf16>
    %cst = arith.constant dense<0.000000e+00> : vector<144x128xf32>
    %4 = tpu.matmul %1, %3, %cst {dimension_numbers = #tpu.dot_dimension_numbers<[1], [0], [0], [1], [0, 0, 1, 1], [], []>} : vector<144x4xbf16>, vector<4x128xbf16>, vector<144x128xf32> -> vector<144x128xf32>
    %c0_5 = arith.constant 0 : index
    %c1 = arith.constant 1 : index
    %c0_6 = arith.constant 0 : index
    %5 = vector.load %arg1[%c0_5, %c1, %c0_6] : memref<1x188x4xbf16, #tpu.memory_space<vmem>>, vector<1x144x4xbf16>
    %6 = vector.shape_cast %5 : vector<1x144x4xbf16> to vector<144x4xbf16>
    %c1_7 = arith.constant 1 : index
    %c0_8 = arith.constant 0 : index
    %c0_9 = arith.constant 0 : index
    %7 = vector.load %arg2[%c1_7, %c0_8, %c0_9] : memref<9x4x128xbf16, #tpu.memory_space<vmem>>, vector<1x4x128xbf16>
    %8 = vector.shape_cast %7 : vector<1x4x128xbf16> to vector<4x128xbf16>
    %cst_10 = arith.constant dense<0.000000e+00> : vector<144x128xf32>
    %9 = tpu.matmul %6, %8, %cst_10 {dimension_numbers = #tpu.dot_dimension_numbers<[1], [0], [0], [1], [0, 0, 1, 1], [], []>} : vector<144x4xbf16>, vector<4x128xbf16>, vector<144x128xf32> -> vector<144x128xf32>
    %10 = arith.addf %4, %9 : vector<144x128xf32>
    %c0_11 = arith.constant 0 : index
    %c2 = arith.constant 2 : index
    %c0_12 = arith.constant 0 : index
    %11 = vector.load %arg1[%c0_11, %c2, %c0_12] : memref<1x188x4xbf16, #tpu.memory_space<vmem>>, vector<1x144x4xbf16>
    %12 = vector.shape_cast %11 : vector<1x144x4xbf16> to vector<144x4xbf16>
    %c2_13 = arith.constant 2 : index
    %c0_14 = arith.constant 0 : index
    %c0_15 = arith.constant 0 : index
    %13 = vector.load %arg2[%c2_13, %c0_14, %c0_15] : memref<9x4x128xbf16, #tpu.memory_space<vmem>>, vector<1x4x128xbf16>
    %14 = vector.shape_cast %13 : vector<1x4x128xbf16> to vector<4x128xbf16>
    %cst_16 = arith.constant dense<0.000000e+00> : vector<144x128xf32>
    %15 = tpu.matmul %12, %14, %cst_16 {dimension_numbers = #tpu.dot_dimension_numbers<[1], [0], [0], [1], [0, 0, 1, 1], [], []>} : vector<144x4xbf16>, vector<4x128xbf16>, vector<144x128xf32> -> vector<144x128xf32>
    %16 = arith.addf %10, %15 : vector<144x128xf32>
    %c0_17 = arith.constant 0 : index
    %c18 = arith.constant 18 : index
    %c0_18 = arith.constant 0 : index
    %17 = vector.load %arg1[%c0_17, %c18, %c0_18] : memref<1x188x4xbf16, #tpu.memory_space<vmem>>, vector<1x144x4xbf16>
    %18 = vector.shape_cast %17 : vector<1x144x4xbf16> to vector<144x4xbf16>
    %c3 = arith.constant 3 : index
    %c0_19 = arith.constant 0 : index
    %c0_20 = arith.constant 0 : index
    %19 = vector.load %arg2[%c3, %c0_19, %c0_20] : memref<9x4x128xbf16, #tpu.memory_space<vmem>>, vector<1x4x128xbf16>
    %20 = vector.shape_cast %19 : vector<1x4x128xbf16> to vector<4x128xbf16>
    %cst_21 = arith.constant dense<0.000000e+00> : vector<144x128xf32>
    %21 = tpu.matmul %18, %20, %cst_21 {dimension_numbers = #tpu.dot_dimension_numbers<[1], [0], [0], [1], [0, 0, 1, 1], [], []>} : vector<144x4xbf16>, vector<4x128xbf16>, vector<144x128xf32> -> vector<144x128xf32>
    %22 = arith.addf %16, %21 : vector<144x128xf32>
    %c0_22 = arith.constant 0 : index
    %c19 = arith.constant 19 : index
    %c0_23 = arith.constant 0 : index
    %23 = vector.load %arg1[%c0_22, %c19, %c0_23] : memref<1x188x4xbf16, #tpu.memory_space<vmem>>, vector<1x144x4xbf16>
    %24 = vector.shape_cast %23 : vector<1x144x4xbf16> to vector<144x4xbf16>
    %c4 = arith.constant 4 : index
    %c0_24 = arith.constant 0 : index
    %c0_25 = arith.constant 0 : index
    %25 = vector.load %arg2[%c4, %c0_24, %c0_25] : memref<9x4x128xbf16, #tpu.memory_space<vmem>>, vector<1x4x128xbf16>
    %26 = vector.shape_cast %25 : vector<1x4x128xbf16> to vector<4x128xbf16>
    %cst_26 = arith.constant dense<0.000000e+00> : vector<144x128xf32>
    %27 = tpu.matmul %24, %26, %cst_26 {dimension_numbers = #tpu.dot_dimension_numbers<[1], [0], [0], [1], [0, 0, 1, 1], [], []>} : vector<144x4xbf16>, vector<4x128xbf16>, vector<144x128xf32> -> vector<144x128xf32>
    %28 = arith.addf %22, %27 : vector<144x128xf32>
    %c0_27 = arith.constant 0 : index
    %c20 = arith.constant 20 : index
    %c0_28 = arith.constant 0 : index
    %29 = vector.load %arg1[%c0_27, %c20, %c0_28] : memref<1x188x4xbf16, #tpu.memory_space<vmem>>, vector<1x144x4xbf16>
    %30 = vector.shape_cast %29 : vector<1x144x4xbf16> to vector<144x4xbf16>
    %c5 = arith.constant 5 : index
    %c0_29 = arith.constant 0 : index
    %c0_30 = arith.constant 0 : index
    %31 = vector.load %arg2[%c5, %c0_29, %c0_30] : memref<9x4x128xbf16, #tpu.memory_space<vmem>>, vector<1x4x128xbf16>
    %32 = vector.shape_cast %31 : vector<1x4x128xbf16> to vector<4x128xbf16>
    %cst_31 = arith.constant dense<0.000000e+00> : vector<144x128xf32>
    %33 = tpu.matmul %30, %32, %cst_31 {dimension_numbers = #tpu.dot_dimension_numbers<[1], [0], [0], [1], [0, 0, 1, 1], [], []>} : vector<144x4xbf16>, vector<4x128xbf16>, vector<144x128xf32> -> vector<144x128xf32>
    %34 = arith.addf %28, %33 : vector<144x128xf32>
    %c0_32 = arith.constant 0 : index
    %c36 = arith.constant 36 : index
    %c0_33 = arith.constant 0 : index
    %35 = vector.load %arg1[%c0_32, %c36, %c0_33] : memref<1x188x4xbf16, #tpu.memory_space<vmem>>, vector<1x144x4xbf16>
    %36 = vector.shape_cast %35 : vector<1x144x4xbf16> to vector<144x4xbf16>
    %c6 = arith.constant 6 : index
    %c0_34 = arith.constant 0 : index
    %c0_35 = arith.constant 0 : index
    %37 = vector.load %arg2[%c6, %c0_34, %c0_35] : memref<9x4x128xbf16, #tpu.memory_space<vmem>>, vector<1x4x128xbf16>
    %38 = vector.shape_cast %37 : vector<1x4x128xbf16> to vector<4x128xbf16>
    %cst_36 = arith.constant dense<0.000000e+00> : vector<144x128xf32>
    %39 = tpu.matmul %36, %38, %cst_36 {dimension_numbers = #tpu.dot_dimension_numbers<[1], [0], [0], [1], [0, 0, 1, 1], [], []>} : vector<144x4xbf16>, vector<4x128xbf16>, vector<144x128xf32> -> vector<144x128xf32>
    %40 = arith.addf %34, %39 : vector<144x128xf32>
    %c0_37 = arith.constant 0 : index
    %c37 = arith.constant 37 : index
    %c0_38 = arith.constant 0 : index
    %41 = vector.load %arg1[%c0_37, %c37, %c0_38] : memref<1x188x4xbf16, #tpu.memory_space<vmem>>, vector<1x144x4xbf16>
    %42 = vector.shape_cast %41 : vector<1x144x4xbf16> to vector<144x4xbf16>
    %c7 = arith.constant 7 : index
    %c0_39 = arith.constant 0 : index
    %c0_40 = arith.constant 0 : index
    %43 = vector.load %arg2[%c7, %c0_39, %c0_40] : memref<9x4x128xbf16, #tpu.memory_space<vmem>>, vector<1x4x128xbf16>
    %44 = vector.shape_cast %43 : vector<1x4x128xbf16> to vector<4x128xbf16>
    %cst_41 = arith.constant dense<0.000000e+00> : vector<144x128xf32>
    %45 = tpu.matmul %42, %44, %cst_41 {dimension_numbers = #tpu.dot_dimension_numbers<[1], [0], [0], [1], [0, 0, 1, 1], [], []>} : vector<144x4xbf16>, vector<4x128xbf16>, vector<144x128xf32> -> vector<144x128xf32>
    %46 = arith.addf %40, %45 : vector<144x128xf32>
    %c0_42 = arith.constant 0 : index
    %c38 = arith.constant 38 : index
    %c0_43 = arith.constant 0 : index
    %47 = vector.load %arg1[%c0_42, %c38, %c0_43] : memref<1x188x4xbf16, #tpu.memory_space<vmem>>, vector<1x144x4xbf16>
    %48 = vector.shape_cast %47 : vector<1x144x4xbf16> to vector<144x4xbf16>
    %c8 = arith.constant 8 : index
    %c0_44 = arith.constant 0 : index
    %c0_45 = arith.constant 0 : index
    %49 = vector.load %arg2[%c8, %c0_44, %c0_45] : memref<9x4x128xbf16, #tpu.memory_space<vmem>>, vector<1x4x128xbf16>
    %50 = vector.shape_cast %49 : vector<1x4x128xbf16> to vector<4x128xbf16>
    %cst_46 = arith.constant dense<0.000000e+00> : vector<144x128xf32>
    %51 = tpu.matmul %48, %50, %cst_46 {dimension_numbers = #tpu.dot_dimension_numbers<[1], [0], [0], [1], [0, 0, 1, 1], [], []>} : vector<144x4xbf16>, vector<4x128xbf16>, vector<144x128xf32> -> vector<144x128xf32>
    %52 = arith.addf %46, %51 : vector<144x128xf32>
    %c0_47 = arith.constant 0 : index
    %c0_48 = arith.constant 0 : index
    %53 = vector.load %arg3[%c0_47, %c0_48] : memref<1x128xf32, #tpu.memory_space<vmem>>, vector<1x128xf32>
    %54 = vector.broadcast %53 : vector<1x128xf32> to vector<144x128xf32>
    %55 = arith.mulf %52, %54 : vector<144x128xf32>
    %c0_49 = arith.constant 0 : index
    %c0_50 = arith.constant 0 : index
    %56 = vector.load %arg4[%c0_49, %c0_50] : memref<1x128xf32, #tpu.memory_space<vmem>>, vector<1x128xf32>
    %57 = vector.broadcast %56 : vector<1x128xf32> to vector<144x128xf32>
    %58 = arith.addf %55, %57 : vector<144x128xf32>
    %cst_51 = arith.constant 0.000000e+00 : f32
    %59 = vector.broadcast %cst_51 : f32 to vector<144x128xf32>
    %60 = arith.maximumf %58, %59 : vector<144x128xf32>
    %61 = vector.extract_strided_slice %60 {offsets = [0, 0], sizes = [144, 8], strides = [1, 1]} : vector<144x128xf32> to vector<144x8xf32>
    %c0_52 = arith.constant 0 : index
    %c0_53 = arith.constant 0 : index
    %c0_54 = arith.constant 0 : index
    %62 = vector.load %arg5[%c0_52, %c0_53, %c0_54] : memref<1x144x8xf32, #tpu.memory_space<vmem>>, vector<1x144x8xf32>
    %63 = vector.shape_cast %62 : vector<1x144x8xf32> to vector<144x8xf32>
    %64 = vector.shape_cast %61 : vector<144x8xf32> to vector<1x144x8xf32>
    tpu.vector_store %arg5[%c0_52, %c0_53, %c0_54], %64 {strides = array<i32>} : memref<1x144x8xf32, #tpu.memory_space<vmem>>, vector<1x144x8xf32>,
    return
  }
  func.func @transform_0(%arg0: i32) -> (i32, i32, i32) {
    %c0_i32 = arith.constant 0 : i32
    %c0_i32_0 = arith.constant 0 : i32
    %c0_i32_1 = arith.constant 0 : i32
    return %arg0, %c0_i32, %c0_i32_0 : i32, i32, i32
  }
  func.func @transform_1(%arg0: i32) -> (i32, i32, i32) {
    %c0_i32 = arith.constant 0 : i32
    %c0_i32_0 = arith.constant 0 : i32
    %c0_i32_1 = arith.constant 0 : i32
    %c0_i32_2 = arith.constant 0 : i32
    return %c0_i32, %c0_i32_0, %c0_i32_1 : i32, i32, i32
  }
  func.func @transform_2(%arg0: i32) -> (i32, i32) {
    %c0_i32 = arith.constant 0 : i32
    %c0_i32_0 = arith.constant 0 : i32
    %c0_i32_1 = arith.constant 0 : i32
    return %c0_i32, %c0_i32_0 : i32, i32
  }
  func.func @transform_3(%arg0: i32) -> (i32, i32) {
    %c0_i32 = arith.constant 0 : i32
    %c0_i32_0 = arith.constant 0 : i32
    %c0_i32_1 = arith.constant 0 : i32
    return %c0_i32, %c0_i32_0 : i32, i32
  }
  func.func @transform_4(%arg0: i32) -> (i32, i32, i32) {
    %c0_i32 = arith.constant 0 : i32
    %c0_i32_0 = arith.constant 0 : i32
    %c0_i32_1 = arith.constant 0 : i32
    return %arg0, %c0_i32, %c0_i32_0 : i32, i32, i32
  }
}

</mosaic_0001>

<bundles_post_ra>
// kernel: conv_block_forward.3
= control target key start
LH: loop header
LB: loop body
LE: loop exit
PB: predicated region body
PF: predicated region fallthrough
CT: control target
= control target key end

     0   :  { %s2919_s15 = smov 0   ;;  %s3838_s0 = inlined_call_operand.vmem [shape: bf16[4,188,4], index: 0, kind: input, shape index: {}]   ;;  %s3839_s1 = inlined_call_operand.vmem [shape: bf16[9,4,128], index: 1, kind: input, shape index: {}]   ;;  %s3840_s2 = inlined_call_operand.vmem [shape: f32[1,128], index: 2, kind: input, shape index: {}]   ;;  %s3841_s3 = inlined_call_operand.vmem [shape: f32[1,128], index: 3, kind: input, shape index: {}]   ;;  %s3842_s4 = inlined_call_operand.vmem [shape: f32[4,144,8], index: 4, kind: output, shape index: {}]  }
   0x1 LB: > { %s2268_s16 = sadd.s32 4294967295, %s2890_s15   ;;  %p2272_p0 = scmp.ge.s32.totalorder %s2890_s15, 1  ;;  %s2890_s15 = sphi %s2919_s15, %s14_s15  }
   0x2   : > { %p162_p1 = scmp.lt.s32.totalorder %s2890_s15, 5 }
   0x4   : > { %p163_p2 = pnand %p2272_p0, %p162_p1 }
   0x5   : > { %p188_p3 = scmp.lt.s32.totalorder (!%p163_p2), %s2268_s16, 3 }
   0x6   : > { %166 = sbr.rel (%p163_p2) target bundleno = 551 (0x227), region = 36 }
   0xb   : > { %v2275_v0 = vld [vmem:[%s3839_s1 + $0x2] sm:$0x3]  ;;  %vm374_vm0 = vcmask 1041408   ;;  %v2892_v1 = vmov 0.0   ;;  %s3844_s16 = smov (!%p188_p3, %s2268_s16), 3  ;;  %vm2893_vm1 = vmmov 0  }
   0xc   : > { %2493 = vmatprep.subr.bf16.mxu0 %v2892_v1  ;;  %2835 = vmatprep.subr.bf16.mxu1 %v2892_v1  ;;  %v376_v2 = vsel %vm374_vm0, %v2275_v0, 0  ;;  %s2837_s19 = smul.u32 96, %s3844_s16  ;;  %vm269_vm2 = vsmask.f32 7424  ;;  %v2304_v12 = vld [vmem:[%s3839_s1 + $0x4] sm:$0x3] }
   0xd   : > { %2494 = vmatpush3.bf16.msra.mxu0 %v376_v2  ;;  %2836 = vmatpush3.bf16.msra.mxu1 %v376_v2  ;;  %vm346_vm3 = vcmask 31744   ;;  %v217_v20 = vld [vmem:[%s3839_s1] sm:$0x3]  ;;  %v663_v26 = vsel %vm374_vm0, %v2304_v12, 0  ;;  %vm615_vm4 = vcmask 1046528   ;;  %vm1284_vm5 = vcmask 1045504  }
   0xe   : > { %2495 = vmatprep.mubr.msk.bf16.mxu0 %vm2893_vm1, %v2892_v1  ;;  %2515 = vmatprep.mubr.msk.bf16.mxu1 %vm2893_vm1, %v2892_v1  ;;  %s2945_s22 = scalar_lea.vmem %s3838_s0, %s2837_s19  ;;  %v502_v31 = vsel %vm374_vm0, %v217_v20, 0  ;;  %v2315_v12 = vld [vmem:[%s3839_s1 + $0x6] sm:$0x3]  ;;  %vm1035_vm6 = vsmask.f32 6400  ;;  %vm1953_vm8 = vcmask 1044480  }
   0xf   : > { %2569 = vmatprep.subr.bf16.mxu0 %v2892_v1  ;;  %2531 = vmatprep.subr.bf16.mxu1 %v2892_v1  ;;  %v199_v3 = vld [vmem:[%s2945_s22] sm:$0xf]  ;;  %v2949_v4 = vld [vmem:[%s2945_s22 + $0x4] sm:$0xf]  ;;  %v2955_v6 = vld [vmem:[%s2945_s22 + $0x8] sm:$0xff]   ;;  %s2838_s17 = smul.u32 144, %s3844_s16 }
  0x10   : > { %v2952_v5 = vcombine.low %v199_v3, %v2949_v4  ;;  %v278_v9 = vshll.u32 %v2955_v6, 16  ;;  %v2961_v10 = vld [vmem:[%s2945_s22 + $0x28] sm:$0xff]   ;;  %v2964_v11 = vld [vmem:[%s2945_s22 + $0x30] sm:$0xff]   ;;  %v2973_v14 = vld [vmem:[%s2945_s22 + $0x38] sm:$0xff]   ;;  %v282_v21 = vshrl.u32 %v2955_v6, 16  ;;  %vm2194_vm9 = vcmask 64512  }
  0x11   : > { %v2970_v13 = vld [vmem:[%s2945_s22 + $0x10] sm:$0xff]   ;;  %v310_v17 = vshll.u32 %v2961_v10, 16  ;;  %v314_v18 = vshrl.u32 %v2961_v10, 16  ;;  %v318_v19 = vshll.u32 %v2964_v11, 16  ;;  %v322_v29 = vshrl.u32 %v2964_v11, 16  ;;  %v2993_v32 = vld [vmem:[%s2945_s22 + $0x18] sm:$0xff]  }
  0x12   : > { %v271_v7 = vshrl.u32 %v2952_v5, 16  ;;  %v273_v8 = vshll.u32 %v2952_v5, 16  ;;  %v280_v16 = vrot.slane %v278_v9, 1  ;;  %v286_v24 = vshll.u32 %v2970_v13, 16  ;;  %v3003_v38 = vld [vmem:[%s2945_s22 + $0x40] sm:$0xff]  }
  0x13   : > { %v2982_v23 = vrot.slane %v310_v17, 1  ;;  %v320_v25 = vrot.slane %v318_v19, 1  ;;  %v326_v30 = vshll.u32 %v2973_v14, 16  ;;  %v294_v39 = vshll.u32 %v2993_v32, 16  ;;  %v3015_v47 = vld [vmem:[%s2945_s22 + $0x20] sm:$0xff]  }
  0x14   : > { %v275_v15 = vrot.slane %v273_v8, 1  ;;  %v284_v34 = vor.u32 %v282_v21, %v280_v16  ;;  %v288_v35 = vrot.slane %v286_v24, 1  ;;  %v290_v41 = vshrl.u32 %v2970_v13, 16  ;;  %v2858_v42 = vld [vmem:[%s2945_s22 + $0x48] ss:$0 sps:$4 sm:$0x11]  }
  0x15   : > { %v316_v28 = vor.u32 %v314_v18, %v2982_v23  ;;  %v324_v36 = vor.u32 %v322_v29, %v320_v25  ;;  %v328_v37 = vrot.slane %v326_v30, 1  ;;  %v330_v44 = vshrl.u32 %v2973_v14, 16  ;;  %v609_v8 = vld [vmem:[%s2945_s22] sm:$0xe]  ;;  %v789_v21 = vld [vmem:[%s2945_s22 + $0xc] sm:$0xf] }
  0x16   : > { %v276_v22 = vor.u32 %v275_v15, %v271_v7  ;;  %v289_v40 = vsel %vm269_vm2, %v284_v34, %v288_v35  ;;  %v334_v45 = vshll.u32 %v3003_v38, 16  ;;  %v296_v46 = vrot.slane %v294_v39, 1  ;;  %v3083_v24 = vld [vmem:[%s2945_s22 + $0x10] sm:$0xff]  }
  0x17   : > { %v321_v33 = vsel %vm269_vm2, %v316_v28, %v320_v25  ;;  %v329_v43 = vsel %vm269_vm2, %v324_v36, %v328_v37  ;;  %v292_v48 = vor.u32 %v290_v41, %v288_v35  ;;  %v631_v49 = vrot.slane %v3003_v38, 1  ;;  %v3091_v28 = vld [vmem:[%s2945_s22 + $0x18] sm:$0xff]   ;;  %v3115_v35 = vld [vmem:[%s2945_s22 + $0x20] sm:$0xff]  }
  0x18   : > { %v281_v27 = vsel %vm269_vm2, %v276_v22, %v280_v16  ;;  %2516 = vmatmul.mubr.msk.bf16.vlgmr.msra.gmra.mxu1 %vm346_vm3, %v321_v33  ;;  %v633_v50 = vrot.slane %v2858_v42, 1  ;;  %v332_v51 = vor.u32 %v330_v44, %v328_v37  ;;  %v336_v52 = vrot.slane %v334_v45, 1  ;;  %v1278_v22 = vld [vmem:[%s2945_s22 + $0x8] sm:$0xc]  ;;  %v3147_v45 = vld [vmem:[%s2945_s22 + $0x30] sm:$0xff]  }
  0x19   : > { %2496 = vmatmul.mubr.msk.bf16.vlgmr.msra.gmra.mxu0 %vm346_vm3, %v281_v27  ;;  %2532 = vmatpush3.bf16.msra.mxu1 %v502_v31  ;;  %v297_v54 = vsel %vm269_vm2, %v292_v48, %v296_v46  ;;  %v298_v55 = vshrl.u32 %v2993_v32, 16  ;;  %v302_v56 = vshll.u32 %v3015_v47, 16  ;;  %v338_v58 = vshrl.u32 %v3003_v38, 16 }
  0x1a   : > { %2570 = vmatpush3.bf16.msra.mxu0 %v663_v26  ;;  %2499 = vmatprep.mubr.msk.bf16.mxu0 %vm2893_vm1, %v2892_v1  ;;  %v3026_v53 = vsel %vm615_vm4, %v631_v49, %v633_v50  ;;  %v337_v57 = vsel %vm269_vm2, %v332_v51, %v336_v52  ;;  %v342_v59 = vshll.u32 %v2858_v42, 16  ;;  %v306_v2 = vshrl.u32 %v3015_v47, 16  ;;  %v788_v50 = vld [vmem:[%s2945_s22 + $0x8] sm:$0xe] }
  0x1b   : > { %2645 = vmatprep.subr.bf16.mxu0 %v2892_v1  ;;  %2519 = vmatprep.mubr.msk.bf16.mxu1 %vm2893_vm1, %v2892_v1  ;;  %v300_v60 = vor.u32 %v298_v55, %v296_v46  ;;  %v304_v61 = vrot.slane %v302_v56, 1  ;;  %v340_v62 = vor.u32 %v338_v58, %v336_v52  ;;  %v2305_v15 = vcombine.low %v609_v8, %v2949_v4  ;;  %v2335_v4 = vld [vmem:[%s3839_s1 + $0x8] sm:$0x3] }
  0x1c   : > { %2607 = vmatprep.subr.bf16.mxu1 %v2892_v1  ;;  %v344_v63 = vrot.slane %v342_v59, 1  ;;  %v904_v16 = vsel %vm374_vm0, %v2315_v12, 0  ;;  %v617_v18 = vrot.slane %v2955_v6, 1  ;;  %v1153_v20 = vsel %vm374_vm0, %v2335_v4, 0 }
  0x1d   : > { %v305_v0 = vsel %vm269_vm2, %v300_v60, %v304_v61  ;;  %v308_v7 = vor.u32 %v306_v2, %v304_v61  ;;  %v616_v17 = vrot.slane %v2305_v15, 1  ;;  %v2347_v25 = vcombine.low %v1278_v22, %v789_v21 }
  0x1e   : > { %v345_v3 = vsel %vm269_vm2, %v340_v62, %v344_v63  ;;  %v1286_v27 = vrot.slane %v3083_v24, 2  ;;  %v1288_v30 = vrot.slane %v3091_v28, 2  ;;  %v623_v34 = vrot.slane %v3015_v47, 1 }
  0x1f   : > { %v313_v9 = vsel %vm269_vm2, %v308_v7, %v2982_v23  ;;  %v618_v19 = vsel %vm615_vm4, %v616_v17, %v617_v18  ;;  %v1285_v26 = vrot.slane %v2347_v25, 2  ;;  %v1290_v36 = vrot.slane %v3115_v35, 2  ;;  %v2357_v7 = vld [vmem:[%s3839_s1 + $0xc] sm:$0x3] }
  0x20   : > { %2520 = vmatmul.mubr.msk.bf16.gmra.mxu1 %vm346_vm3, %v329_v43  ;;  %v3103_v33 = vsel %vm1284_vm5, %v1286_v27, %v1288_v30  ;;  %v625_v37 = vrot.slane %v2961_v10, 1  ;;  %v627_v42 = vrot.slane %v2964_v11, 1  ;;  %v1294_v46 = vrot.slane %v3147_v45, 2 }
  0x21   : > { %2500 = vmatmul.mubr.msk.bf16.gmra.mxu0 %vm346_vm3, %v289_v40  ;;  %2523 = vmatprep.mubr.msk.bf16.mxu1 %vm2893_vm1, %v2892_v1  ;;  %v3094_v29 = vsel %vm1284_vm5, %v1285_v26, %v1286_v27  ;;  %v3123_v39 = vsel %vm1284_vm5, %v1288_v30, %v1290_v36  ;;  %v3131_v40 = vld [vmem:[%s2945_s22 + $0x28] sm:$0xff]   ;;  %v2316_v51 = vcombine.low %v788_v50, %v789_v21  ;;  %v1045_v55 = vshrl.u32 %v3083_v24, 16 }
  0x22   : > { %2503 = vmatprep.mubr.msk.bf16.mxu0 %vm2893_vm1, %v2892_v1  ;;  %v1292_v41 = vrot.slane %v3131_v40, 2  ;;  %v628_v44 = vsel %vm615_vm4, %v625_v37, %v627_v42  ;;  %v1054_v2 = vshrl.u32 %v3091_v28, 16  ;;  %v1573_v15 = vsel %vm374_vm0, %v2357_v7, 0  ;;  %v3283_v7 = vld [vmem:[%s2945_s22 + $0x50] ss:$0 sps:$4 sm:$0x33]  }
  0x23   : > { %v1037_v52 = vshrl.u32 %v2316_v51, 16  ;;  %v857_v56 = vrot.slane %v2316_v51, 1  ;;  %v1047_v60 = vrot.slane %v1045_v55, 1  ;;  %v1066_v4 = vshll.u32 %v3115_v35, 16 }
  0x24   : > { %v3139_v43 = vsel %vm1284_vm5, %v1290_v36, %v1292_v41  ;;  %v1075_v25 = vshll.u32 %v3131_v40, 16  ;;  %v864_v26 = vrot.slane %v3131_v40, 1  ;;  %vm1704_vm7 = vsmask.f32 5376 }
  0x25   : > { %v1039_v58 = vrot.slane %v1037_v52, 1  ;;  %v1068_v21 = vrot.slane %v1066_v4, 2 }
  0x28   : > { %2524 = vmatmul.mubr.msk.bf16.gmra.mxu1 %vm346_vm3, %v337_v57  ;;  %v2346_v57 = vld [vmem:[%s3839_s1 + $0xa] sm:$0x3] }
  0x29   : > { %2504 = vmatmul.mubr.msk.bf16.gmra.mxu0 %vm346_vm3, %v297_v54  ;;  %2527 = vmatprep.mubr.msk.bf16.mxu1 %vm2893_vm1, %v2892_v1  ;;  %v1040_v54 = vshll.u32 %v2316_v51, 16 }
  0x2a   : > { %2507 = vmatprep.mubr.msk.bf16.mxu0 %vm2893_vm1, %v2892_v1 }
  0x2b   : > { %v1042_v59 = vrot.slane %v1040_v54, 2  ;;  %v3256_v54 = vld [vmem:[%s2945_s22 + $0x40] sm:$0xff]  }
  0x2d   : > { %v1043_v63 = vor.u32 %v1042_v59, %v1039_v58 }
  0x30   : > { %2528 = vmatmul.mubr.msk.bf16.gmra.mxu1 %vm346_vm3, %v345_v3  ;;  %v1057_v3 = vshll.u32 %v3091_v28, 16 }
  0x31   : > { %2508 = vmatmul.mubr.msk.bf16.gmra.mxu0 %vm346_vm3, %v305_v0  ;;  %2533 = vmatprep.mubr.msk.bf16.mxu1 %vm2893_vm1, %v2892_v1 }
  0x32   : > { %2511 = vmatprep.mubr.msk.bf16.mxu0 %vm2893_vm1, %v2892_v1  ;;  %v1059_v12 = vrot.slane %v1057_v3, 2 }
  0x38   : > { %2534 = vmatmul.mubr.msk.bf16.vlgmr.msra.gmra.mxu1 %vm346_vm3, %v2952_v5  ;;  %v619_v5 = vrot.slane %v2970_v13, 1 }
  0x39   : > { %2512 = vmatmul.mubr.msk.bf16.gmra.mxu0 %vm346_vm3, %v313_v9  ;;  %2608 = vmatpush3.bf16.msra.mxu1 %v904_v16  ;;  %v1056_v9 = vrot.slane %v1054_v2, 1 }
  0x3a   : > { %2571 = vmatprep.mubr.msk.bf16.mxu0 %vm2893_vm1, %v2892_v1  ;;  %2537 = vmatprep.mubr.msk.bf16.mxu1 %vm2893_vm1, %v2892_v1  ;;  %v620_v23 = vsel %vm615_vm4, %v617_v18, %v619_v5  ;;  %v1063_v18 = vshrl.u32 %v3115_v35, 16 }
  0x3b   : > { %2683 = vmatprep.subr.bf16.mxu1 %v2892_v1  ;;  %v1060_v17 = vor.u32 %v1059_v12, %v1056_v9  ;;  %v2869_v9 = vld [vmem:[%s2945_s22 + $0x50] ss:$0 sps:$4 sm:$0x11]  }
  0x40   : > { %2538 = vmatmul.mubr.msk.bf16.gmra.mxu1 %vm346_vm3, %v2955_v6  ;;  %v621_v6 = vrot.slane %v2993_v32, 1 }
  0x41   : > { %2572 = vmatmul.mubr.msk.bf16.vlgmr.msra.gmra.mxu0 %vm346_vm3, %v618_v19  ;;  %2541 = vmatprep.mubr.msk.bf16.mxu1 %vm2893_vm1, %v2892_v1  ;;  %v862_v19 = vrot.slane %v3115_v35, 1  ;;  %v866_v35 = vrot.slane %v3147_v45, 1 }
  0x42   : > { %2646 = vmatpush3.bf16.msra.mxu0 %v1153_v20  ;;  %2575 = vmatprep.mubr.msk.bf16.mxu0 %vm2893_vm1, %v2892_v1  ;;  %v622_v31 = vsel %vm615_vm4, %v619_v5, %v621_v6  ;;  %v1065_v5 = vrot.slane %v1063_v18, 1 }
  0x43   : > { %2721 = vmatprep.subr.bf16.mxu0 %v2892_v1  ;;  %v865_v30 = vsel %vm615_vm4, %v862_v19, %v864_v26 }
  0x48   : > { %2542 = vmatmul.mubr.msk.bf16.gmra.mxu1 %vm346_vm3, %v2970_v13  ;;  %v624_v13 = vsel %vm615_vm4, %v621_v6, %v623_v34 }
  0x49   : > { %2576 = vmatmul.mubr.msk.bf16.gmra.mxu0 %vm346_vm3, %v620_v23  ;;  %2545 = vmatprep.mubr.msk.bf16.mxu1 %vm2893_vm1, %v2892_v1  ;;  %v1069_v23 = vor.u32 %v1068_v21, %v1065_v5  ;;  %v1457_v21 = vld [vmem:[%s2945_s22 + $0x10] sm:$0xc] }
  0x4a   : > { %2579 = vmatprep.mubr.msk.bf16.mxu0 %vm2893_vm1, %v2892_v1 }
  0x4b   : > { %v1070_v27 = vsel %vm1035_vm6, %v1060_v17, %v1069_v23 }
  0x50   : > { %2546 = vmatmul.mubr.msk.bf16.gmra.mxu1 %vm346_vm3, %v2993_v32  ;;  %v626_v32 = vsel %vm615_vm4, %v623_v34, %v625_v37  ;;  %v1081_v34 = vshrl.u32 %v3147_v45, 16 }
  0x51   : > { %2580 = vmatmul.mubr.msk.bf16.gmra.mxu0 %vm346_vm3, %v622_v31  ;;  %2549 = vmatprep.mubr.msk.bf16.mxu1 %vm2893_vm1, %v2892_v1 }
  0x52   : > { %2583 = vmatprep.mubr.msk.bf16.mxu0 %vm2893_vm1, %v2892_v1  ;;  %v1083_v37 = vrot.slane %v1081_v34, 1  ;;  %v3332_v34 = vld [vmem:[%s2945_s22 + $0x20] sm:$0xff]  }
  0x58   : > { %2550 = vmatmul.mubr.msk.bf16.gmra.mxu1 %vm346_vm3, %v3015_v47  ;;  %v629_v47 = vrot.slane %v2973_v14, 1 }
  0x59   : > { %2584 = vmatmul.mubr.msk.bf16.gmra.mxu0 %vm346_vm3, %v624_v13  ;;  %2553 = vmatprep.mubr.msk.bf16.mxu1 %vm2893_vm1, %v2892_v1  ;;  %v1084_v13 = vshll.u32 %v3147_v45, 16  ;;  %v1298_v45 = vrot.slane %v3256_v54, 2 }
  0x5a   : > { %2587 = vmatprep.mubr.msk.bf16.mxu0 %vm2893_vm1, %v2892_v1  ;;  %v630_v48 = vsel %vm615_vm4, %v627_v42, %v629_v47 }
  0x60   : > { %2554 = vmatmul.mubr.msk.bf16.gmra.mxu1 %vm346_vm3, %v2961_v10  ;;  %v3157_v10 = vsel %vm1284_vm5, %v1292_v41, %v1294_v46  ;;  %v3242_v41 = vld [vmem:[%s2945_s22 + $0x38] sm:$0xff]  }
  0x61   : > { %2588 = vmatmul.mubr.msk.bf16.gmra.mxu0 %vm346_vm3, %v626_v32  ;;  %2557 = vmatprep.mubr.msk.bf16.mxu1 %vm2893_vm1, %v2892_v1  ;;  %v1086_v32 = vrot.slane %v1084_v13, 2 }
  0x62   : > { %2591 = vmatprep.mubr.msk.bf16.mxu0 %vm2893_vm1, %v2892_v1 }
  0x63   : > { %v1087_v42 = vor.u32 %v1086_v32, %v1083_v37 }
  0x68   : > { %2558 = vmatmul.mubr.msk.bf16.gmra.mxu1 %vm346_vm3, %v2964_v11  ;;  %v632_v11 = vsel %vm615_vm4, %v629_v47, %v631_v49  ;;  %v858_v49 = vrot.slane %v3083_v24, 1  ;;  %v1093_v47 = vshll.u32 %v3242_v41, 16 }
  0x69   : > { %2592 = vmatmul.mubr.msk.bf16.gmra.mxu0 %vm346_vm3, %v628_v44  ;;  %2561 = vmatprep.mubr.msk.bf16.mxu1 %vm2893_vm1, %v2892_v1  ;;  %v1090_v44 = vshrl.u32 %v3242_v41, 16 }
  0x6a   : > { %2595 = vmatprep.mubr.msk.bf16.mxu0 %vm2893_vm1, %v2892_v1  ;;  %v859_v62 = vsel %vm615_vm4, %v857_v56, %v858_v49  ;;  %v1095_v51 = vrot.slane %v1093_v47, 2  ;;  %v1102_v56 = vshll.u32 %v3256_v54, 16 }
  0x6c   : > { %v1104_v59 = vrot.slane %v1102_v56, 2 }
  0x70   : > { %2562 = vmatmul.mubr.msk.bf16.gmra.mxu1 %vm346_vm3, %v2973_v14  ;;  %v1048_v14 = vshll.u32 %v3083_v24, 16  ;;  %v1072_v24 = vshrl.u32 %v3131_v40, 16  ;;  %v867_v40 = vsel %vm615_vm4, %v864_v26, %v866_v35  ;;  %v3315_v26 = vld [vmem:[%s2945_s22 + $0x18] sm:$0xff]  }
  0x71   : > { %2596 = vmatmul.mubr.msk.bf16.gmra.mxu0 %vm346_vm3, %v630_v48  ;;  %2565 = vmatprep.mubr.msk.bf16.mxu1 %vm2893_vm1, %v2892_v1  ;;  %v868_v48 = vrot.slane %v3242_v41, 1 }
  0x72   : > { %2599 = vmatprep.mubr.msk.bf16.mxu0 %vm2893_vm1, %v2892_v1  ;;  %v1050_v61 = vrot.slane %v1048_v14, 2  ;;  %v1074_v6 = vrot.slane %v1072_v24, 1  ;;  %v1099_v14 = vshrl.u32 %v3256_v54, 16  ;;  %v2377_v24 = vld [vmem:[%s3839_s1 + $0xe] sm:$0x3] }
  0x73   : > { %v869_v52 = vsel %vm615_vm4, %v866_v35, %v868_v48 }
  0x74   : > { %v1051_v0 = vor.u32 %v1050_v61, %v1047_v60  ;;  %v1101_v58 = vrot.slane %v1099_v14, 1  ;;  %v3270_v61 = vld [vmem:[%s2945_s22 + $0x48] sm:$0xff]  }
  0x76   : > { %v1052_v8 = vsel %vm1035_vm6, %v1043_v63, %v1051_v0  ;;  %v1061_v20 = vsel %vm1035_vm6, %v1051_v0, %v1060_v17  ;;  %v1111_v63 = vshll.u32 %v3270_v61, 16  ;;  %v872_v0 = vrot.slane %v3270_v61, 1 }
  0x77   : > { %v874_v17 = vrot.slane %v2869_v9, 1  ;;  %v3404_v9 = vld [vmem:[%s2945_s22 + $0x40] sm:$0xff]  }
  0x78   : > { %2566 = vmatmul.mubr.msk.bf16.gmra.mxu1 %vm346_vm3, %v3003_v38  ;;  %v1332_v38 = vsel %vm374_vm0, %v2346_v57, 0 }
  0x79   : > { %2600 = vmatmul.mubr.msk.bf16.gmra.mxu0 %vm346_vm3, %v632_v11  ;;  %2609 = vmatprep.mubr.msk.bf16.mxu1 %vm2893_vm1, %v2892_v1  ;;  %v1092_v11 = vrot.slane %v1090_v44, 1 }
  0x7a   : > { %2603 = vmatprep.mubr.msk.bf16.mxu0 %vm2893_vm1, %v2892_v1 }
  0x7b   : > { %v1096_v55 = vor.u32 %v1095_v51, %v1092_v11 }
  0x7d   : > { %v1097_v57 = vsel %vm1035_vm6, %v1087_v42, %v1096_v55 }
  0x80   : > { %2610 = vmatmul.mubr.msk.bf16.vlgmr.msra.gmra.mxu1 %vm346_vm3, %v859_v62  ;;  %v1105_v62 = vor.u32 %v1104_v59, %v1101_v58  ;;  %v3383_v58 = vld [vmem:[%s2945_s22 + $0x38] sm:$0xff]  }
  0x81   : > { %2604 = vmatmul.mubr.msk.bf16.gmra.mxu0 %vm346_vm3, %v3026_v53  ;;  %2684 = vmatpush3.bf16.msra.mxu1 %v1332_v38  ;;  %v860_v53 = vrot.slane %v3091_v28, 1  ;;  %v1077_v28 = vrot.slane %v1075_v25, 2  ;;  %v1108_v38 = vshrl.u32 %v3270_v61, 16 }
  0x82   : > { %2647 = vmatprep.mubr.msk.bf16.mxu0 %vm2893_vm1, %v2892_v1  ;;  %2613 = vmatprep.mubr.msk.bf16.mxu1 %vm2893_vm1, %v2892_v1  ;;  %v1106_v2 = vsel %vm1035_vm6, %v1096_v55, %v1105_v62 }
  0x83   : > { %2759 = vmatprep.subr.bf16.mxu1 %v2892_v1  ;;  %v861_v16 = vsel %vm615_vm4, %v858_v49, %v860_v53  ;;  %v863_v22 = vsel %vm615_vm4, %v860_v53, %v862_v19  ;;  %v1078_v31 = vor.u32 %v1077_v28, %v1074_v6  ;;  %v870_v49 = vrot.slane %v3256_v54, 1 }
  0x84   : > { %v1110_v3 = vrot.slane %v1108_v38, 1  ;;  %v1113_v53 = vrot.slane %v1111_v63, 2  ;;  %v1527_v28 = vrot.slane %v3315_v26, 2 }
  0x85   : > { %v1079_v36 = vsel %vm1035_vm6, %v1069_v23, %v1078_v31  ;;  %v1088_v50 = vsel %vm1035_vm6, %v1078_v31, %v1087_v42  ;;  %v871_v60 = vsel %vm615_vm4, %v868_v48, %v870_v49  ;;  %v3363_v48 = vld [vmem:[%s2945_s22 + $0x30] sm:$0xff]  }
  0x86   : > { %v1114_v12 = vor.u32 %v1113_v53, %v1110_v3 }
  0x88   : > { %2614 = vmatmul.mubr.msk.bf16.gmra.mxu1 %vm346_vm3, %v861_v16  ;;  %v1120_v16 = vshll.u32 %v3283_v7, 16  ;;  %v1115_v18 = vsel %vm1035_vm6, %v1105_v62, %v1114_v12 }
  0x89   : > { %2648 = vmatmul.mubr.msk.bf16.vlgmr.msra.gmra.mxu0 %vm346_vm3, %v1052_v8  ;;  %2617 = vmatprep.mubr.msk.bf16.mxu1 %vm2893_vm1, %v2892_v1  ;;  %v873_v8 = vsel %vm615_vm4, %v870_v49, %v872_v0 }
  0x8a   : > { %2722 = vmatpush3.bf16.msra.mxu0 %v1573_v15  ;;  %2651 = vmatprep.mubr.msk.bf16.mxu0 %vm2893_vm1, %v2892_v1  ;;  %v1117_v15 = vshrl.u32 %v3283_v7, 16  ;;  %v1122_v19 = vrot.slane %v1120_v16, 2 }
  0x8b   : > { %2797 = vmatprep.subr.bf16.mxu0 %v2892_v1 }
  0x8c   : > { %v1119_v4 = vrot.slane %v1117_v15, 1 }
  0x8e   : > { %v1123_v5 = vor.u32 %v1122_v19, %v1119_v4 }
  0x90   : > { %2618 = vmatmul.mubr.msk.bf16.gmra.mxu1 %vm346_vm3, %v863_v22  ;;  %v3303_v22 = vld [vmem:[%s2945_s22 + $0x14] sm:$0xf]  ;;  %v1124_v23 = vsel %vm1035_vm6, %v1114_v12, %v1123_v5  ;;  %v3427_v5 = vld [vmem:[%s2945_s22 + $0x48] sm:$0xff]  }
  0x91   : > { %2652 = vmatmul.mubr.msk.bf16.gmra.mxu0 %vm346_vm3, %v1061_v20  ;;  %2621 = vmatprep.mubr.msk.bf16.mxu1 %vm2893_vm1, %v2892_v1  ;;  %v875_v20 = vsel %vm615_vm4, %v872_v0, %v874_v17  ;;  %v3312_v25 = vcombine.low %v1457_v21, %v3303_v22  ;;  %v1539_v54 = vrot.slane %v3427_v5, 2 }
  0x92   : > { %2655 = vmatprep.mubr.msk.bf16.mxu0 %vm2893_vm1, %v2892_v1 }
  0x93   : > { %v1526_v6 = vrot.slane %v3312_v25, 2 }
  0x95   : > { %v1528_v31 = vsel %vm1284_vm5, %v1526_v6, %v1527_v28 }
  0x98   : > { %2622 = vmatmul.mubr.msk.bf16.gmra.mxu1 %vm346_vm3, %v865_v30  ;;  %v2388_v30 = vld [vmem:[%s3839_s1 + $0x10] sm:$0x3] }
  0x99   : > { %2656 = vmatmul.mubr.msk.bf16.gmra.mxu0 %vm346_vm3, %v1070_v27  ;;  %2625 = vmatprep.mubr.msk.bf16.mxu1 %vm2893_vm1, %v2892_v1  ;;  %v1822_v27 = vsel %vm374_vm0, %v2377_v24, 0  ;;  %v2001_v13 = vsel %vm374_vm0, %v2388_v30, 0 }
  0x9a   : > { %2659 = vmatprep.mubr.msk.bf16.mxu0 %vm2893_vm1, %v2892_v1 }
  0xa0   : > { %2626 = vmatmul.mubr.msk.bf16.gmra.mxu1 %vm346_vm3, %v867_v40 }
  0xa1   : > { %2660 = vmatmul.mubr.msk.bf16.gmra.mxu0 %vm346_vm3, %v1079_v36  ;;  %2629 = vmatprep.mubr.msk.bf16.mxu1 %vm2893_vm1, %v2892_v1  ;;  %v3345_v36 = vld [vmem:[%s2945_s22 + $0x28] sm:$0xff]  }
  0xa2   : > { %2663 = vmatprep.mubr.msk.bf16.mxu0 %vm2893_vm1, %v2892_v1  ;;  %v1531_v32 = vrot.slane %v3345_v36, 2 }
  0xa8   : > { %2630 = vmatmul.mubr.msk.bf16.gmra.mxu1 %vm346_vm3, %v869_v52 }
  0xa9   : > { %2664 = vmatmul.mubr.msk.bf16.gmra.mxu0 %vm346_vm3, %v1088_v50  ;;  %2633 = vmatprep.mubr.msk.bf16.mxu1 %vm2893_vm1, %v2892_v1 }
  0xaa   : > { %2667 = vmatprep.mubr.msk.bf16.mxu0 %vm2893_vm1, %v2892_v1 }
  0xb0   : > { %2634 = vmatmul.mubr.msk.bf16.gmra.mxu1 %vm346_vm3, %v871_v60 }
  0xb1   : > { %2668 = vmatmul.mubr.msk.bf16.gmra.mxu0 %vm346_vm3, %v1097_v57  ;;  %2637 = vmatprep.mubr.msk.bf16.mxu1 %vm2893_vm1, %v2892_v1 }
  0xb2   : > { %2671 = vmatprep.mubr.msk.bf16.mxu0 %vm2893_vm1, %v2892_v1 }
  0xb8   : > { %2638 = vmatmul.mubr.msk.bf16.gmra.mxu1 %vm346_vm3, %v873_v8 }
  0xb9   : > { %2672 = vmatmul.mubr.msk.bf16.gmra.mxu0 %vm346_vm3, %v1106_v2  ;;  %2641 = vmatprep.mubr.msk.bf16.mxu1 %vm2893_vm1, %v2892_v1  ;;  %v1296_v2 = vrot.slane %v3242_v41, 2  ;;  %v1537_v41 = vrot.slane %v3404_v9, 2 }
  0xba   : > { %2675 = vmatprep.mubr.msk.bf16.mxu0 %vm2893_vm1, %v2892_v1 }
  0xbb   : > { %v1299_v24 = vsel %vm1284_vm5, %v1296_v2, %v1298_v45 }
  0xc0   : > { %2642 = vmatmul.mubr.msk.bf16.gmra.mxu1 %vm346_vm3, %v875_v20 }
  0xc1   : > { %2676 = vmatmul.mubr.msk.bf16.gmra.mxu0 %vm346_vm3, %v1115_v18  ;;  %2685 = vmatprep.mubr.msk.bf16.mxu1 %vm2893_vm1, %v2892_v1 }
  0xc2   : > { %2679 = vmatprep.mubr.msk.bf16.mxu0 %vm2893_vm1, %v2892_v1 }
  0xc8   : > { %2686 = vmatmul.mubr.msk.bf16.vlgmr.msra.gmra.mxu1 %vm346_vm3, %v3094_v29  ;;  %v1529_v29 = vrot.slane %v3332_v34, 2 }
  0xc9   : > { %2680 = vmatmul.mubr.msk.bf16.gmra.mxu0 %vm346_vm3, %v1124_v23  ;;  %2760 = vmatpush3.bf16.msra.mxu1 %v1822_v27 }
  0xca   : > { %2723 = vmatprep.mubr.msk.bf16.mxu0 %vm2893_vm1, %v2892_v1  ;;  %2689 = vmatprep.mubr.msk.bf16.mxu1 %vm2893_vm1, %v2892_v1  ;;  %v1530_v35 = vsel %vm1284_vm5, %v1527_v28, %v1529_v29  ;;  %v1532_v47 = vsel %vm1284_vm5, %v1529_v29, %v1531_v32 }
  0xd0   : > { %2690 = vmatmul.mubr.msk.bf16.gmra.mxu1 %vm346_vm3, %v3103_v33 }
  0xd1   : > { %2724 = vmatmul.mubr.msk.bf16.vlgmr.msra.gmra.mxu0 %vm346_vm3, %v1528_v31  ;;  %2693 = vmatprep.mubr.msk.bf16.mxu1 %vm2893_vm1, %v2892_v1 }
  0xd2   : > { %2798 = vmatpush3.bf16.msra.mxu0 %v2001_v13  ;;  %2727 = vmatprep.mubr.msk.bf16.mxu0 %vm2893_vm1, %v2892_v1  ;;  %v1300_v13 = vrot.slane %v3270_v61, 2 }
  0xd8   : > { %v3353_v40 = vpop.f32.mrf.mxu1  ;;  %2694 = vmatmul.mubr.msk.bf16.gmra.mxu1 %vm346_vm3, %v3123_v39  ;;  %v1533_v39 = vrot.slane %v3363_v48, 2 }
  0xd9   : > { %v3347_v37 = vpop.f32.mrf.mxu0  ;;  %2728 = vmatmul.mubr.msk.bf16.gmra.mxu0 %vm346_vm3, %v1530_v35  ;;  %2697 = vmatprep.mubr.msk.bf16.mxu1 %vm2893_vm1, %v2892_v1 }
  0xda   : > { %2731 = vmatprep.mubr.msk.bf16.mxu0 %vm2893_vm1, %v2892_v1  ;;  %v2517_v42 = vpop.f32.mrf.mxu1  ;;  %v1534_v57 = vsel %vm1284_vm5, %v1531_v32, %v1533_v39  ;;  %v1540_v32 = vsel %vm1284_vm5, %v1537_v41, %v1539_v54 }
  0xdb   : > { %v2497_v33 = vpop.f32.mrf.mxu0 }
  0xdc   : > { %v3365_v50 = vpop.f32.mrf.mxu1  ;;  %v3447_v33 = vld [vmem:[%s2945_s22 + $0x50] sm:$0xff]  }
  0xdd   : > { %v3359_v44 = vpop.f32.mrf.mxu0  ;;  %v1541_v61 = vrot.slane %v3447_v33, 2 }
  0xde   : > { %v2518_v51 = vpop.f32.mrf.mxu1 }
  0xdf   : > { %v2498_v11 = vpop.f32.mrf.mxu0  ;;  %v1301_v51 = vsel %vm1284_vm5, %v1298_v45, %v1300_v13 }
  0xe0   : > { %v3373_v55 = vpop.f32.mrf.mxu1  ;;  %2698 = vmatmul.mubr.msk.bf16.gmra.mxu1 %vm346_vm3, %v3139_v43  ;;  %v1535_v43 = vrot.slane %v3383_v58, 2 }
  0xe1   : > { %v3367_v52 = vpop.f32.mrf.mxu0  ;;  %2732 = vmatmul.mubr.msk.bf16.gmra.mxu0 %vm346_vm3, %v1532_v47  ;;  %2701 = vmatprep.mubr.msk.bf16.mxu1 %vm2893_vm1, %v2892_v1 }
  0xe2   : > { %2735 = vmatprep.mubr.msk.bf16.mxu0 %vm2893_vm1, %v2892_v1  ;;  %v2521_v56 = vpop.f32.mrf.mxu1  ;;  %v1536_v8 = vsel %vm1284_vm5, %v1533_v39, %v1535_v43  ;;  %v1538_v20 = vsel %vm1284_vm5, %v1535_v43, %v1537_v41  ;;  %v1302_v43 = vrot.slane %v3283_v7, 2 }
  0xe3   : > { %v2501_v14 = vpop.f32.mrf.mxu0 }
  0xe4   : > { %v3385_v59 = vpop.f32.mrf.mxu1  ;;  %v1303_v7 = vsel %vm1284_vm5, %v1300_v13, %v1302_v43 }
  0xe5   : > { %v3379_v49 = vpop.f32.mrf.mxu0 }
  0xe6   : > { %v2522_v62 = vpop.f32.mrf.mxu1 }
  0xe7   : > { %v2502_v60 = vpop.f32.mrf.mxu0 }
  0xe8   : > { %v3393_v63 = vpop.f32.mrf.mxu1  ;;  %2702 = vmatmul.mubr.msk.bf16.gmra.mxu1 %vm346_vm3, %v3157_v10  ;;  %v1297_v10 = vsel %vm1284_vm5, %v1294_v46, %v1296_v2  ;;  %v1709_v60 = vshll.u32 %v3312_v25, 16  ;;  %v1717_v2 = vshll.u32 %v3315_v26, 16 }
  0xe9   : > { %v3387_v38 = vpop.f32.mrf.mxu0  ;;  %2736 = vmatmul.mubr.msk.bf16.gmra.mxu0 %vm346_vm3, %v1534_v57  ;;  %2705 = vmatprep.mubr.msk.bf16.mxu1 %vm2893_vm1, %v2892_v1 }
  0xea   : > { %2739 = vmatprep.mubr.msk.bf16.mxu0 %vm2893_vm1, %v2892_v1  ;;  %v2525_v3 = vpop.f32.mrf.mxu1 }
  0xeb   : > { %v2505_v0 = vpop.f32.mrf.mxu0 }
  0xec   : > { %v3406_v12 = vpop.f32.mrf.mxu1  ;;  %v1714_v0 = vshrl.u32 %v3315_v26, 16 }
  0xed   : > { %v3400_v53 = vpop.f32.mrf.mxu0 }
  0xee   : > { %v2526_v16 = vpop.f32.mrf.mxu1 }
  0xef   : > { %v2506_v15 = vpop.f32.mrf.mxu0  ;;  %v2881_v16 = vld [vmem:[%s2945_s22 + $0x58] ss:$0 sps:$4 sm:$0x33]  }
  0xf0   : > { %v3417_v18 = vpop.f32.mrf.mxu1  ;;  %2706 = vmatmul.mubr.msk.bf16.gmra.mxu1 %vm346_vm3, %v1297_v10  ;;  %v1542_v10 = vsel %vm1284_vm5, %v1539_v54, %v1541_v61  ;;  %v1543_v54 = vrot.slane %v2881_v16, 2  ;;  %v1732_v16 = vshrl.u32 %v3345_v36, 16 }
  0xf1   : > { %v3411_v17 = vpop.f32.mrf.mxu0  ;;  %2740 = vmatmul.mubr.msk.bf16.gmra.mxu0 %vm346_vm3, %v1536_v8  ;;  %2709 = vmatprep.mubr.msk.bf16.mxu1 %vm2893_vm1, %v2892_v1 }
  0xf2   : > { %2743 = vmatprep.mubr.msk.bf16.mxu0 %vm2893_vm1, %v2892_v1  ;;  %v2529_v46 = vpop.f32.mrf.mxu1 }
  0xf3   : > { %v2509_v4 = vpop.f32.mrf.mxu0  ;;  %v1716_v46 = vrot.slane %v1714_v0, 2 }
  0xf4   : > { %v3429_v21 = vpop.f32.mrf.mxu1 }
  0xf5   : > { %v3423_v19 = vpop.f32.mrf.mxu0 }
  0xf6   : > { %v2530_v27 = vpop.f32.mrf.mxu1 }
  0xf7   : > { %v2510_v23 = vpop.f32.mrf.mxu0 }
  0xf8   : > { %v538_v28 = vpop.f32.mrf.mxu1  ;;  %2710 = vmatmul.mubr.msk.bf16.gmra.mxu1 %vm346_vm3, %v1299_v24 }
  0xf9   : > { %v3432_v6 = vpop.f32.mrf.mxu0  ;;  %2744 = vmatmul.mubr.msk.bf16.gmra.mxu0 %vm346_vm3, %v1538_v20  ;;  %v539_v31 = vadd.f32 %v538_v28, %v3347_v37  ;;  %2713 = vmatprep.mubr.msk.bf16.mxu1 %vm2893_vm1, %v2892_v1  ;;  %v1719_v20 = vrot.slane %v1717_v2, 3 }
  0xfa   : > { %2747 = vmatprep.mubr.msk.bf16.mxu0 %vm2893_vm1, %v2892_v1  ;;  %v2535_v29 = vpop.f32.mrf.mxu1 }
  0xfb   : > { %v2513_v30 = vpop.f32.mrf.mxu0  ;;  %v1720_v29 = vor.u32 %v1719_v20, %v1716_v46  ;;  %v1734_v20 = vrot.slane %v1732_v16, 2 }
  0xfc   : > { %v541_v42 = vpop.f32.mrf.mxu1 }
  0xfd   : > { %v3443_v35 = vpop.f32.mrf.mxu0  ;;  %v542_v11 = vadd.f32 %v541_v42, %v3359_v44  ;;  %v1706_v44 = vshrl.u32 %v3312_v25, 16  ;;  %v1726_v42 = vshll.u32 %v3332_v34, 16 }
  0xfe   : > { %v2536_v39 = vpop.f32.mrf.mxu1 }
  0xff   : > { %v2514_v47 = vpop.f32.mrf.mxu0  ;;  %v1708_v4 = vrot.slane %v1706_v44, 2  ;;  %v1544_v39 = vsel %vm1284_vm5, %v1541_v61, %v1543_v54 }
 0x100   : > { %v546_v56 = vpop.f32.mrf.mxu1  ;;  %2714 = vmatmul.mubr.msk.bf16.gmra.mxu1 %vm346_vm3, %v1301_v51 }
 0x101   : > { %v699_v37 = vpop.f32.mrf.mxu0  ;;  %2748 = vmatmul.mubr.msk.bf16.gmra.mxu0 %vm346_vm3, %v1540_v32  ;;  %v547_v62 = vadd.f32 %v546_v56, %v3367_v52  ;;  %2717 = vmatprep.mubr.msk.bf16.mxu1 %vm2893_vm1, %v2892_v1  ;;  %v1711_v52 = vrot.slane %v1709_v60, 3  ;;  %v1723_v32 = vshrl.u32 %v3332_v34, 16 }
 0x102   : > { %v3452_v14 = vadd.f32 %v699_v37, %v539_v31  ;;  %2751 = vmatprep.mubr.msk.bf16.mxu0 %vm2893_vm1, %v2892_v1  ;;  %v2539_v3 = vpop.f32.mrf.mxu1 }
 0x103   : > { %v2573_v57 = vpop.f32.mrf.mxu0  ;;  %v1712_v31 = vor.u32 %v1711_v52, %v1708_v4  ;;  %v1725_v60 = vrot.slane %v1723_v32, 2  ;;  %v1744_v32 = vshll.u32 %v3363_v48, 16 }
 0x104   : > { %v549_v41 = vpop.f32.mrf.mxu1 }
 0x105   : > { %v702_v8 = vpop.f32.mrf.mxu0  ;;  %v550_v45 = vadd.f32 %v549_v41, %v3379_v49  ;;  %v1947_v49 = vld [vmem:[%s2945_s22 + $0x10] sm:$0x8]  ;;  %v1721_v44 = vsel %vm1704_vm7, %v1712_v31, %v1720_v29  ;;  %v1735_v41 = vshll.u32 %v3345_v36, 16 }
 0x106   : > { %v3466_v15 = vadd.f32 %v702_v8, %v542_v11  ;;  %v2540_v23 = vpop.f32.mrf.mxu1  ;;  %v2389_v37 = vcombine.low %v1947_v49, %v3303_v22  ;;  %v1955_v22 = vrot.slane %v3315_v26, 3 }
 0x107   : > { %v2574_v25 = vpop.f32.mrf.mxu0  ;;  %v1737_v23 = vrot.slane %v1735_v41, 3 }
 0x108   : > { %v554_v28 = vpop.f32.mrf.mxu1  ;;  %2718 = vmatmul.mubr.msk.bf16.gmra.mxu1 %vm346_vm3, %v1303_v7  ;;  %v1954_v61 = vrot.slane %v2389_v37, 3 }
 0x109   : > { %v707_v24 = vpop.f32.mrf.mxu0  ;;  %2752 = vmatmul.mubr.msk.bf16.gmra.mxu0 %vm346_vm3, %v1542_v10  ;;  %v555_v13 = vadd.f32 %v554_v28, %v3387_v38  ;;  %2761 = vmatprep.mubr.msk.bf16.mxu1 %vm2893_vm1, %v2892_v1 }
 0x10a   : > { %v3473_v27 = vadd.f32 %v707_v24, %v547_v62  ;;  %2755 = vmatprep.mubr.msk.bf16.mxu0 %vm2893_vm1, %v2892_v1  ;;  %v2543_v47 = vpop.f32.mrf.mxu1  ;;  %v1728_v62 = vrot.slane %v1726_v42, 3  ;;  %v1956_v26 = vsel %vm1953_vm8, %v1954_v61, %v1955_v22 }
 0x10b   : > { %v2577_v30 = vpop.f32.mrf.mxu0 }
 0x10c   : > { %v557_v56 = vpop.f32.mrf.mxu1  ;;  %v1729_v10 = vor.u32 %v1728_v62, %v1725_v60  ;;  %v1957_v30 = vrot.slane %v3332_v34, 3 }
 0x10d   : > { %v710_v11 = vpop.f32.mrf.mxu0  ;;  %v558_v38 = vadd.f32 %v557_v56, %v3400_v53 }
 0x10e   : > { %v3484_v51 = vadd.f32 %v710_v11, %v550_v45  ;;  %v2544_v43 = vpop.f32.mrf.mxu1  ;;  %v1958_v34 = vsel %vm1953_vm8, %v1955_v22, %v1957_v30  ;;  %v1750_v22 = vshrl.u32 %v3383_v58, 16 }
 0x10f   : > { %v2578_v57 = vpop.f32.mrf.mxu0  ;;  %v1959_v43 = vrot.slane %v3345_v36, 3 }
 0x110   : > { %v562_v3 = vpop.f32.mrf.mxu1  ;;  %2762 = vmatmul.mubr.msk.bf16.vlgmr.msra.gmra.mxu1 %vm346_vm3, %v1721_v44 }
 0x111   : > { %v715_v0 = vpop.f32.mrf.mxu0  ;;  %2756 = vmatmul.mubr.msk.bf16.gmra.mxu0 %vm346_vm3, %v1544_v39  ;;  %v563_v8 = vadd.f32 %v562_v3, %v3411_v17  ;;  %2765 = vmatprep.mubr.msk.bf16.mxu1 %vm2893_vm1, %v2892_v1  ;;  %v1730_v17 = vsel %vm1704_vm7, %v1720_v29, %v1729_v10  ;;  %v1741_v29 = vshrl.u32 %v3363_v48, 16  ;;  %v1753_v3 = vshll.u32 %v3383_v58, 16 }
 0x112   : > { %v3491_v2 = vadd.f32 %v715_v0, %v555_v13  ;;  %2799 = vmatprep.mubr.msk.bf16.mxu0 %vm2893_vm1, %v2892_v1  ;;  %v2547_v25 = vpop.f32.mrf.mxu1  ;;  %v1738_v13 = vor.u32 %v1737_v23, %v1734_v20  ;;  %v1960_v16 = vsel %vm1953_vm8, %v1957_v30, %v1959_v43  ;;  %v1961_v20 = vrot.slane %v3363_v48, 3 }
 0x113   : > { %v2581_v53 = vpop.f32.mrf.mxu0  ;;  %v1743_v57 = vrot.slane %v1741_v29, 2  ;;  %v1759_v30 = vshrl.u32 %v3404_v9, 16 }
 0x114   : > { %v565_v45 = vpop.f32.mrf.mxu1  ;;  %v1962_v48 = vsel %vm1953_vm8, %v1959_v43, %v1961_v20  ;;  %v1771_v43 = vshll.u32 %v3427_v5, 16 }
 0x115   : > { %v718_v4 = vpop.f32.mrf.mxu0  ;;  %v566_v46 = vadd.f32 %v565_v45, %v3423_v19  ;;  %v1755_v45 = vrot.slane %v1753_v3, 3 }
 0x116   : > { %v3502_v52 = vadd.f32 %v718_v4, %v558_v38  ;;  %v2548_v24 = vpop.f32.mrf.mxu1  ;;  %v1746_v38 = vrot.slane %v1744_v32, 3 }
 0x117   : > { %v2582_v7 = vpop.f32.mrf.mxu0 }
 0x118   : > { %v570_v31 = vpop.f32.mrf.mxu1  ;;  %2766 = vmatmul.mubr.msk.bf16.gmra.mxu1 %vm346_vm3, %v1730_v17 }
 0x119   : > { %v723_v54 = vpop.f32.mrf.mxu0  ;;  %2800 = vmatmul.mubr.msk.bf16.vlgmr.msra.gmra.mxu0 %vm346_vm3, %v1956_v26  ;;  %v571_v19 = vadd.f32 %v570_v31, %v3432_v6  ;;  %2769 = vmatprep.mubr.msk.bf16.mxu1 %vm2893_vm1, %v2892_v1  ;;  %v1739_v6 = vsel %vm1704_vm7, %v1729_v10, %v1738_v13  ;;  %v1752_v26 = vrot.slane %v1750_v22, 2  ;;  %v1762_v31 = vshll.u32 %v3404_v9, 16 }
 0x11a   : > { %v3508_v28 = vadd.f32 %v723_v54, %v563_v8  ;;  %2803 = vmatprep.mubr.msk.bf16.mxu0 %vm2893_vm1, %v2892_v1  ;;  %v2551_v42 = vpop.f32.mrf.mxu1 }
 0x11b   : > { %v2585_v49 = vpop.f32.mrf.mxu0  ;;  %v1756_v54 = vor.u32 %v1755_v45, %v1752_v26 }
 0x11c   : > { %v573_v39 = vpop.f32.mrf.mxu1 }
 0x11d   : > { %v726_v47 = vpop.f32.mrf.mxu0  ;;  %v574_v56 = vadd.f32 %v573_v39, %v3443_v35  ;;  %v1747_v35 = vor.u32 %v1746_v38, %v1743_v57 }
 0x11e   : > { %v3519_v11 = vadd.f32 %v726_v47, %v566_v46  ;;  %v2552_v44 = vpop.f32.mrf.mxu1  ;;  %v1761_v47 = vrot.slane %v1759_v30, 2 }
 0x11f   : > { %v2586_v37 = vpop.f32.mrf.mxu0  ;;  %v1748_v4 = vsel %vm1704_vm7, %v1738_v13, %v1747_v35 }
 0x120   : > { %v578_v0 = vpop.f32.mrf.mxu1  ;;  %2770 = vmatmul.mubr.msk.bf16.gmra.mxu1 %vm346_vm3, %v1739_v6  ;;  %v1963_v6 = vrot.slane %v3383_v58, 3 }
 0x121   : > { %v731_v60 = vpop.f32.mrf.mxu0  ;;  %2804 = vmatmul.mubr.msk.bf16.gmra.mxu0 %vm346_vm3, %v1958_v34  ;;  %2773 = vmatprep.mubr.msk.bf16.mxu1 %vm2893_vm1, %v2892_v1  ;;  %v579_v25 = vadd.f32 %v578_v0, %v3353_v40  ;;  %v1764_v34 = vrot.slane %v1762_v31, 3 }
 0x122   : > { %v3525_v62 = vadd.f32 %v731_v60, %v571_v19  ;;  %2807 = vmatprep.mubr.msk.bf16.mxu0 %vm2893_vm1, %v2892_v1  ;;  %v2555_v53 = vpop.f32.mrf.mxu1  ;;  %v1768_v60 = vshrl.u32 %v3427_v5, 16  ;;  %v1964_v58 = vsel %vm1953_vm8, %v1961_v20, %v1963_v6 }
 0x123   : > { %v2589_v61 = vpop.f32.mrf.mxu0  ;;  %v1765_v44 = vor.u32 %v1764_v34, %v1761_v47 }
 0x124   : > { %v581_v41 = vpop.f32.mrf.mxu1 }
 0x125   : > { %v734_v8 = vpop.f32.mrf.mxu0  ;;  %v582_v40 = vadd.f32 %v581_v41, %v3365_v50  ;;  %v1757_v50 = vsel %vm1704_vm7, %v1747_v35, %v1756_v54 }
 0x126   : > { %v3535_v10 = vadd.f32 %v734_v8, %v574_v56  ;;  %v2556_v7 = vpop.f32.mrf.mxu1  ;;  %v1770_v8 = vrot.slane %v1768_v60, 2 }
 0x127   : > { %v2590_v36 = vpop.f32.mrf.mxu0  ;;  %v1780_v7 = vshll.u32 %v3447_v33, 16 }
 0x128   : > { %v586_v23 = vpop.f32.mrf.mxu1  ;;  %2774 = vmatmul.mubr.msk.bf16.gmra.mxu1 %vm346_vm3, %v1748_v4  ;;  %v1965_v4 = vrot.slane %v3404_v9, 3 }
 0x129   : > { %v739_v46 = vpop.f32.mrf.mxu0  ;;  %2808 = vmatmul.mubr.msk.bf16.gmra.mxu0 %vm346_vm3, %v1960_v16  ;;  %2777 = vmatprep.mubr.msk.bf16.mxu1 %vm2893_vm1, %v2892_v1  ;;  %v587_v42 = vadd.f32 %v586_v23, %v3373_v55  ;;  %v1773_v16 = vrot.slane %v1771_v43, 3 }
 0x12a   : > { %v3541_v17 = vadd.f32 %v739_v46, %v579_v25  ;;  %2811 = vmatprep.mubr.msk.bf16.mxu0 %vm2893_vm1, %v2892_v1  ;;  %v2559_v49 = vpop.f32.mrf.mxu1  ;;  %v1966_v9 = vsel %vm1953_vm8, %v1963_v6, %v1965_v4 }
 0x12b   : > { %v2593_v24 = vpop.f32.mrf.mxu0  ;;  %v1774_v20 = vor.u32 %v1773_v16, %v1770_v8  ;;  %v1782_v49 = vrot.slane %v1780_v7, 3 }
 0x12c   : > { %v589_v29 = vpop.f32.mrf.mxu1 }
 0x12d   : > { %v742_v19 = vpop.f32.mrf.mxu0  ;;  %v590_v55 = vadd.f32 %v589_v29, %v3385_v59  ;;  %v1766_v59 = vsel %vm1704_vm7, %v1756_v54, %v1765_v44  ;;  %v2883_v29 = vld [vmem:[%s2945_s22 + $0x58] ss:$0 sps:$4 sm:$0x77]   ;;  %s3747_s22 = scalar_lea.vmem %s3842_s4, %s2838_s17 }
 0x12e   : > { %v3552_v13 = vadd.f32 %v742_v19, %v582_v40  ;;  %v2560_v39 = vpop.f32.mrf.mxu1  ;;  %v1786_v6 = vshrl.u32 %v2883_v29, 16 }
 0x12f   : > { %v2594_v32 = vpop.f32.mrf.mxu0 }
 0x130   : > { %v594_v57 = vpop.f32.mrf.mxu1  ;;  %2778 = vmatmul.mubr.msk.bf16.gmra.mxu1 %vm346_vm3, %v1757_v50  ;;  %v1967_v50 = vrot.slane %v3427_v5, 3 }
 0x131   : > { %v747_v37 = vpop.f32.mrf.mxu0  ;;  %2812 = vmatmul.mubr.msk.bf16.gmra.mxu0 %vm346_vm3, %v1962_v48  ;;  %2781 = vmatprep.mubr.msk.bf16.mxu1 %vm2893_vm1, %v2892_v1  ;;  %v595_v53 = vadd.f32 %v594_v57, %v3393_v63  ;;  %v1777_v63 = vshrl.u32 %v3447_v33, 16  ;;  %v1775_v48 = vsel %vm1704_vm7, %v1765_v44, %v1774_v20  ;;  %v1789_v57 = vshll.u32 %v2883_v29, 16 }
 0x132   : > { %v3558_v56 = vadd.f32 %v747_v37, %v587_v42  ;;  %2815 = vmatprep.mubr.msk.bf16.mxu0 %vm2893_vm1, %v2892_v1  ;;  %v2563_v0 = vpop.f32.mrf.mxu1  ;;  %v1968_v5 = vsel %vm1953_vm8, %v1965_v4, %v1967_v50 }
 0x133   : > { %v2597_v38 = vpop.f32.mrf.mxu0  ;;  %v1779_v31 = vrot.slane %v1777_v63, 2 }
 0x134   : > { %v597_v22 = vpop.f32.mrf.mxu1 }
 0x135   : > { %v750_v61 = vpop.f32.mrf.mxu0  ;;  %v598_v46 = vadd.f32 %v597_v22, %v3406_v12  ;;  %v1783_v39 = vor.u32 %v1782_v49, %v1779_v31 }
 0x136   : > { %v3569_v35 = vadd.f32 %v750_v61, %v590_v55  ;;  %v2564_v41 = vpop.f32.mrf.mxu1 }
 0x137   : > { %v2598_v3 = vpop.f32.mrf.mxu0  ;;  %v1784_v61 = vsel %vm1704_vm7, %v1774_v20, %v1783_v39 }
 0x138   : > { %v602_v26 = vpop.f32.mrf.mxu1  ;;  %2782 = vmatmul.mubr.msk.bf16.gmra.mxu1 %vm346_vm3, %v1766_v59 }
 0x139   : > { %v755_v36 = vpop.f32.mrf.mxu0  ;;  %2816 = vmatmul.mubr.msk.bf16.gmra.mxu0 %vm346_vm3, %v1964_v58  ;;  %2785 = vmatprep.mubr.msk.bf16.mxu1 %vm2893_vm1, %v2892_v1  ;;  %v603_v19 = vadd.f32 %v602_v26, %v3417_v18  ;;  %v1791_v58 = vrot.slane %v1789_v57, 3 }
 0x13a   : > { %v3575_v25 = vadd.f32 %v755_v36, %v595_v53  ;;  %2819 = vmatprep.mubr.msk.bf16.mxu0 %vm2893_vm1, %v2892_v1  ;;  %v2567_v23 = vpop.f32.mrf.mxu1  ;;  %v1969_v53 = vrot.slane %v3447_v33, 3 }
 0x13b   : > { %v2601_v45 = vpop.f32.mrf.mxu0  ;;  %v1971_v23 = vrot.slane %v2883_v29, 3 }
 0x13c   : > { %v605_v54 = vpop.f32.mrf.mxu1  ;;  %v1970_v26 = vsel %vm1953_vm8, %v1967_v50, %v1969_v53 }
 0x13d   : > { %v758_v24 = vpop.f32.mrf.mxu0  ;;  %v606_v18 = vadd.f32 %v605_v54, %v3429_v21  ;;  %v1788_v21 = vrot.slane %v1786_v6, 2  ;;  %v1972_v49 = vsel %vm1953_vm8, %v1969_v53, %v1971_v23 }
 0x13e   : > { %v3586_v40 = vadd.f32 %v758_v24, %v598_v46  ;;  %v2568_v12 = vpop.f32.mrf.mxu1 }
 0x13f   : > { %v2602_v30 = vpop.f32.mrf.mxu0  ;;  %v1792_v16 = vor.u32 %v1791_v58, %v1788_v21 }
 0x140   : > { %v940_v47 = vpop.f32.mrf.mxu1  ;;  %2786 = vmatmul.mubr.msk.bf16.gmra.mxu1 %vm346_vm3, %v1775_v48 }
 0x141   : > { %v763_v32 = vpop.f32.mrf.mxu0  ;;  %2820 = vmatmul.mubr.msk.bf16.gmra.mxu0 %vm346_vm3, %v1966_v9  ;;  %v1011_v37 = vadd.f32 %v940_v47, %v3452_v14  ;;  %2789 = vmatprep.mubr.msk.bf16.mxu1 %vm2893_vm1, %v2892_v1  ;;  %v1793_v7 = vsel %vm1704_vm7, %v1783_v39, %v1792_v16 }
 0x142   : > { %v3593_v42 = vadd.f32 %v763_v32, %v603_v19  ;;  %2823 = vmatprep.mubr.msk.bf16.mxu0 %vm2893_vm1, %v2892_v1  ;;  %v2611_v38 = vpop.f32.mrf.mxu1 }
 0x143   : > { %v2605_v34 = vpop.f32.mrf.mxu0 }
 0x144   : > { %v943_v60 = vpop.f32.mrf.mxu1 }
 0x145   : > { %v766_v55 = vpop.f32.mrf.mxu0  ;;  %v1012_v0 = vadd.f32 %v943_v60, %v3466_v15 }
 0x146   : > { %v3603_v44 = vadd.f32 %v766_v55, %v606_v18  ;;  %v2612_v14 = vpop.f32.mrf.mxu1 }
 0x147   : > { %v2606_v43 = vpop.f32.mrf.mxu0 }
 0x148   : > { %v948_v59 = vpop.f32.mrf.mxu1  ;;  %2790 = vmatmul.mubr.msk.bf16.gmra.mxu1 %vm346_vm3, %v1784_v61 }
 0x149   : > { %v1189_v22 = vpop.f32.mrf.mxu0  ;;  %2824 = vmatmul.mubr.msk.bf16.gmra.mxu0 %vm346_vm3, %v1968_v5  ;;  %v1013_v15 = vadd.f32 %v948_v59, %v3473_v27  ;;  %2793 = vmatprep.mubr.msk.bf16.mxu1 %vm2893_vm1, %v2892_v1 }
 0x14a   : > { %v3609_v3 = vadd.f32 %v1189_v22, %v1011_v37  ;;  %2827 = vmatprep.mubr.msk.bf16.mxu0 %vm2893_vm1, %v2892_v1  ;;  %v2615_v41 = vpop.f32.mrf.mxu1 }
 0x14b   : > { %v2649_v8 = vpop.f32.mrf.mxu0 }
 0x14c   : > { %v951_v45 = vpop.f32.mrf.mxu1 }
 0x14d   : > { %v1192_v36 = vpop.f32.mrf.mxu0  ;;  %v1014_v33 = vadd.f32 %v951_v45, %v3484_v51 }
 0x14e   : > { %v3618_v4 = vadd.f32 %v1192_v36, %v1012_v0  ;;  %v2616_v46 = vpop.f32.mrf.mxu1 }
 0x14f   : > { %v2650_v63 = vpop.f32.mrf.mxu0 }
 0x150   : > { %v956_v24 = vpop.f32.mrf.mxu1  ;;  %2794 = vmatmul.mubr.msk.bf16.gmra.mxu1 %vm346_vm3, %v1793_v7 }
 0x151   : > { %v1197_v20 = vpop.f32.mrf.mxu0  ;;  %2828 = vmatmul.mubr.msk.bf16.gmra.mxu0 %vm346_vm3, %v1970_v26  ;;  %v1015_v54 = vadd.f32 %v956_v24, %v3491_v2 }
 0x152   : > { %v3624_v27 = vadd.f32 %v1197_v20, %v1013_v15  ;;  %2831 = vmatprep.mubr.msk.bf16.mxu0 %vm2893_vm1, %v2892_v1  ;;  %v2619_v30 = vpop.f32.mrf.mxu1 }
 0x153   : > { %v2653_v9 = vpop.f32.mrf.mxu0 }
 0x154   : > { %v959_v19 = vpop.f32.mrf.mxu1 }
 0x155   : > { %v1200_v51 = vpop.f32.mrf.mxu0  ;;  %v1016_v12 = vadd.f32 %v959_v19, %v3502_v52 }
 0x156   : > { %v3630_v31 = vadd.f32 %v1200_v51, %v1014_v33  ;;  %v2620_v32 = vpop.f32.mrf.mxu1 }
 0x157   : > { %v2654_v48 = vpop.f32.mrf.mxu0 }
 0x158   : > { %v964_v29 = vpop.f32.mrf.mxu1 }
 0x159   : > { %v1205_v50 = vpop.f32.mrf.mxu0  ;;  %2832 = vmatmul.mubr.msk.bf16.gmra.mxu0 %vm346_vm3, %v1972_v49  ;;  %v1017_v2 = vadd.f32 %v964_v29, %v3508_v28 }
 0x15a   : > { %v3635_v1 = vadd.f32 %v1205_v50, %v1015_v54  ;;  %v2623_v34 = vpop.f32.mrf.mxu1 }
 0x15b   : > { %v2657_v47 = vpop.f32.mrf.mxu0 }
 0x15c   : > { %v967_v37 = vpop.f32.mrf.mxu1 }
 0x15d   : > { %v1208_v39 = vpop.f32.mrf.mxu0  ;;  %v1018_v57 = vadd.f32 %v967_v37, %v3519_v11 }
 0x15e   : > { %v3638_v18 = vadd.f32 %v1208_v39, %v1016_v12  ;;  %v2624_v38 = vpop.f32.mrf.mxu1 }
 0x15f   : > { %v2658_v6 = vpop.f32.mrf.mxu0 }
 0x160   : > { %v972_v5 = vpop.f32.mrf.mxu1 }
 0x161   : > { %v1213_v52 = vpop.f32.mrf.mxu0  ;;  %v1019_v43 = vadd.f32 %v972_v5, %v3525_v62 }
 0x162   : > { %v3641_v55 = vadd.f32 %v1213_v52, %v1017_v2  ;;  %v2627_v0 = vpop.f32.mrf.mxu1 }
 0x163   : > { %v2661_v60 = vpop.f32.mrf.mxu0 }
 0x164   : > { %v975_v28 = vpop.f32.mrf.mxu1 }
 0x165   : > { %v1216_v61 = vpop.f32.mrf.mxu0  ;;  %v1020_v14 = vadd.f32 %v975_v28, %v3535_v10 }
 0x166   : > { %v3644_v21 = vadd.f32 %v1216_v61, %v1018_v57  ;;  %v2628_v22 = vpop.f32.mrf.mxu1 }
 0x167   : > { %v2662_v58 = vpop.f32.mrf.mxu0 }
 0x168   : > { %v980_v11 = vpop.f32.mrf.mxu1 }
 0x169   : > { %v1221_v53 = vpop.f32.mrf.mxu0  ;;  %v1021_v15 = vadd.f32 %v980_v11, %v3541_v17 }
 0x16a   : > { %v3647_v59 = vadd.f32 %v1221_v53, %v1019_v43  ;;  %v2631_v16 = vpop.f32.mrf.mxu1 }
 0x16b   : > { %v2665_v8 = vpop.f32.mrf.mxu0 }
 0x16c   : > { %v983_v62 = vpop.f32.mrf.mxu1 }
 0x16d   : > { %v1224_v41 = vpop.f32.mrf.mxu0  ;;  %v1022_v45 = vadd.f32 %v983_v62, %v3552_v13 }
 0x16e   : > { %v3650_v36 = vadd.f32 %v1224_v41, %v1020_v14  ;;  %v2632_v63 = vpop.f32.mrf.mxu1 }
 0x16f   : > { %v2666_v26 = vpop.f32.mrf.mxu0 }
 0x170   : > { %v988_v10 = vpop.f32.mrf.mxu1 }
 0x171   : > { %v1229_v33 = vpop.f32.mrf.mxu0  ;;  %v1023_v20 = vadd.f32 %v988_v10, %v3558_v56 }
 0x172   : > { %v3653_v7 = vadd.f32 %v1229_v33, %v1021_v15  ;;  %v2635_v23 = vpop.f32.mrf.mxu1 }
 0x173   : > { %v2669_v46 = vpop.f32.mrf.mxu0 }
 0x174   : > { %v991_v17 = vpop.f32.mrf.mxu1 }
 0x175   : > { %v1232_v24 = vpop.f32.mrf.mxu0  ;;  %v1024_v30 = vadd.f32 %v991_v17, %v3569_v35 }
 0x176   : > { %v3656_v9 = vadd.f32 %v1232_v24, %v1022_v45  ;;  %v2636_v51 = vpop.f32.mrf.mxu1 }
 0x177   : > { %v2670_v54 = vpop.f32.mrf.mxu0 }
 0x178   : > { %v996_v13 = vpop.f32.mrf.mxu1 }
 0x179   : > { %v1237_v49 = vpop.f32.mrf.mxu0  ;;  %v1025_v12 = vadd.f32 %v996_v13, %v3575_v25 }
 0x17a   : > { %v3659_v19 = vadd.f32 %v1237_v49, %v1023_v20  ;;  %v2639_v32 = vpop.f32.mrf.mxu1 }
 0x17b   : > { %v2673_v48 = vpop.f32.mrf.mxu0 }
 0x17c   : > { %v999_v56 = vpop.f32.mrf.mxu1 }
 0x17d   : > { %v1240_v50 = vpop.f32.mrf.mxu0  ;;  %v1026_v2 = vadd.f32 %v999_v56, %v3586_v40 }
 0x17e   : > { %v3662_v29 = vadd.f32 %v1240_v50, %v1024_v30  ;;  %v2640_v34 = vpop.f32.mrf.mxu1 }
 0x17f   : > { %v2674_v47 = vpop.f32.mrf.mxu0 }
 0x180   : > { %v1004_v35 = vpop.f32.mrf.mxu1 }
 0x181   : > { %v1245_v39 = vpop.f32.mrf.mxu0  ;;  %v1027_v57 = vadd.f32 %v1004_v35, %v3593_v42 }
 0x182   : > { %v3665_v37 = vadd.f32 %v1245_v39, %v1025_v12  ;;  %v2643_v38 = vpop.f32.mrf.mxu1 }
 0x183   : > { %v2677_v6 = vpop.f32.mrf.mxu0 }
 0x184   : > { %v1007_v25 = vpop.f32.mrf.mxu1 }
 0x185   : > { %v1248_v52 = vpop.f32.mrf.mxu0  ;;  %v1028_v43 = vadd.f32 %v1007_v25, %v3603_v44 }
 0x186   : > { %v3668_v5 = vadd.f32 %v1248_v52, %v1026_v2  ;;  %v2644_v0 = vpop.f32.mrf.mxu1 }
 0x187   : > { %v2678_v60 = vpop.f32.mrf.mxu0 }
 0x188   : > { %v1368_v40 = vpop.f32.mrf.mxu1 }
 0x189   : > { %v1253_v61 = vpop.f32.mrf.mxu0  ;;  %v1439_v14 = vadd.f32 %v1368_v40, %v3609_v3 }
 0x18a   : > { %v3671_v28 = vadd.f32 %v1253_v61, %v1027_v57  ;;  %v2687_v22 = vpop.f32.mrf.mxu1 }
 0x18b   : > { %v2681_v58 = vpop.f32.mrf.mxu0 }
 0x18c   : > { %v1371_v42 = vpop.f32.mrf.mxu1 }
 0x18d   : > { %v1256_v53 = vpop.f32.mrf.mxu0  ;;  %v1440_v15 = vadd.f32 %v1371_v42, %v3618_v4 }
 0x18e   : > { %v3674_v11 = vadd.f32 %v1256_v53, %v1028_v43  ;;  %v2688_v16 = vpop.f32.mrf.mxu1 }
 0x18f   : > { %v2682_v8 = vpop.f32.mrf.mxu0 }
 0x190   : > { %v1376_v44 = vpop.f32.mrf.mxu1 }
 0x191   : > { %v1609_v41 = vpop.f32.mrf.mxu0  ;;  %v1441_v45 = vadd.f32 %v1376_v44, %v3624_v27 }
 0x192   : > { %v3677_v62 = vadd.f32 %v1609_v41, %v1439_v14  ;;  %v2691_v63 = vpop.f32.mrf.mxu1 }
 0x193   : > { %v2725_v26 = vpop.f32.mrf.mxu0 }
 0x194   : > { %v1379_v3 = vpop.f32.mrf.mxu1 }
 0x195   : > { %v1612_v33 = vpop.f32.mrf.mxu0  ;;  %v1442_v20 = vadd.f32 %v1379_v3, %v3630_v31 }
 0x196   : > { %v3680_v10 = vadd.f32 %v1612_v33, %v1440_v15  ;;  %v2692_v23 = vpop.f32.mrf.mxu1 }
 0x197   : > { %v2726_v46 = vpop.f32.mrf.mxu0 }
 0x198   : > { %v1384_v4 = vpop.f32.mrf.mxu1 }
 0x199   : > { %v1617_v24 = vpop.f32.mrf.mxu0  ;;  %v1443_v30 = vadd.f32 %v1384_v4, %v3635_v1 }
 0x19a   : > { %v3683_v17 = vadd.f32 %v1617_v24, %v1441_v45  ;;  %v2695_v51 = vpop.f32.mrf.mxu1 }
 0x19b   : > { %v2729_v54 = vpop.f32.mrf.mxu0 }
 0x19c   : > { %v1387_v27 = vpop.f32.mrf.mxu1 }
 0x19d   : > { %v1620_v49 = vpop.f32.mrf.mxu0  ;;  %v1444_v12 = vadd.f32 %v1387_v27, %v3638_v18 }
 0x19e   : > { %v3686_v13 = vadd.f32 %v1620_v49, %v1442_v20  ;;  %v2696_v32 = vpop.f32.mrf.mxu1 }
 0x19f   : > { %v2730_v48 = vpop.f32.mrf.mxu0 }
 0x1a0   : > { %v1392_v31 = vpop.f32.mrf.mxu1 }
 0x1a1   : > { %v1625_v50 = vpop.f32.mrf.mxu0  ;;  %v1445_v2 = vadd.f32 %v1392_v31, %v3641_v55 }
 0x1a2   : > { %v3689_v56 = vadd.f32 %v1625_v50, %v1443_v30  ;;  %v2699_v34 = vpop.f32.mrf.mxu1 }
 0x1a3   : > { %v2733_v47 = vpop.f32.mrf.mxu0 }
 0x1a4   : > { %v1395_v1 = vpop.f32.mrf.mxu1 }
 0x1a5   : > { %v1628_v39 = vpop.f32.mrf.mxu0  ;;  %v1446_v57 = vadd.f32 %v1395_v1, %v3644_v21 }
 0x1a6   : > { %v3692_v35 = vadd.f32 %v1628_v39, %v1444_v12  ;;  %v2700_v38 = vpop.f32.mrf.mxu1 }
 0x1a7   : > { %v2734_v6 = vpop.f32.mrf.mxu0 }
 0x1a8   : > { %v1400_v18 = vpop.f32.mrf.mxu1 }
 0x1a9   : > { %v1633_v52 = vpop.f32.mrf.mxu0  ;;  %v1447_v43 = vadd.f32 %v1400_v18, %v3647_v59 }
 0x1aa   : > { %v3695_v25 = vadd.f32 %v1633_v52, %v1445_v2  ;;  %v2703_v0 = vpop.f32.mrf.mxu1 }
 0x1ab   : > { %v2737_v60 = vpop.f32.mrf.mxu0 }
 0x1ac   : > { %v1403_v55 = vpop.f32.mrf.mxu1 }
 0x1ad   : > { %v1636_v61 = vpop.f32.mrf.mxu0  ;;  %v1448_v14 = vadd.f32 %v1403_v55, %v3650_v36 }
 0x1ae   : > { %v3698_v40 = vadd.f32 %v1636_v61, %v1446_v57  ;;  %v2704_v22 = vpop.f32.mrf.mxu1 }
 0x1af   : > { %v2738_v58 = vpop.f32.mrf.mxu0 }
 0x1b0   : > { %v1408_v21 = vpop.f32.mrf.mxu1 }
 0x1b1   : > { %v1641_v53 = vpop.f32.mrf.mxu0  ;;  %v1449_v15 = vadd.f32 %v1408_v21, %v3653_v7 }
 0x1b2   : > { %v3701_v42 = vadd.f32 %v1641_v53, %v1447_v43  ;;  %v2707_v16 = vpop.f32.mrf.mxu1 }
 0x1b3   : > { %v2741_v8 = vpop.f32.mrf.mxu0 }
 0x1b4   : > { %v1411_v59 = vpop.f32.mrf.mxu1 }
 0x1b5   : > { %v1644_v41 = vpop.f32.mrf.mxu0  ;;  %v1450_v45 = vadd.f32 %v1411_v59, %v3656_v9 }
 0x1b6   : > { %v3704_v44 = vadd.f32 %v1644_v41, %v1448_v14  ;;  %v2708_v63 = vpop.f32.mrf.mxu1 }
 0x1b7   : > { %v2742_v26 = vpop.f32.mrf.mxu0 }
 0x1b8   : > { %v1416_v36 = vpop.f32.mrf.mxu1  ;;  %v3739_v26 = vld [vmem:[%s3841_s3] ss:$0 sm:$0xff] }
 0x1b9   : > { %v1649_v33 = vpop.f32.mrf.mxu0  ;;  %v1451_v20 = vadd.f32 %v1416_v36, %v3659_v19 }
 0x1ba   : > { %v3707_v3 = vadd.f32 %v1649_v33, %v1449_v15  ;;  %v2711_v23 = vpop.f32.mrf.mxu1 }
 0x1bb   : > { %v2745_v46 = vpop.f32.mrf.mxu0 }
 0x1bc   : > { %v1419_v7 = vpop.f32.mrf.mxu1 }
 0x1bd   : > { %v1652_v24 = vpop.f32.mrf.mxu0  ;;  %v1452_v30 = vadd.f32 %v1419_v7, %v3662_v29 }
 0x1be   : > { %v3710_v4 = vadd.f32 %v1652_v24, %v1450_v45  ;;  %v2712_v51 = vpop.f32.mrf.mxu1 }
 0x1bf   : > { %v2746_v54 = vpop.f32.mrf.mxu0 }
 0x1c0   : > { %v1424_v9 = vpop.f32.mrf.mxu1 }
 0x1c1   : > { %v1657_v49 = vpop.f32.mrf.mxu0  ;;  %v1453_v12 = vadd.f32 %v1424_v9, %v3665_v37 }
 0x1c2   : > { %v3713_v27 = vadd.f32 %v1657_v49, %v1451_v20  ;;  %v2715_v32 = vpop.f32.mrf.mxu1 }
 0x1c3   : > { %v2749_v48 = vpop.f32.mrf.mxu0 }
 0x1c4   : > { %v1427_v19 = vpop.f32.mrf.mxu1 }
 0x1c5   : > { %v1660_v50 = vpop.f32.mrf.mxu0  ;;  %v1454_v2 = vadd.f32 %v1427_v19, %v3668_v5 }
 0x1c6   : > { %v3716_v31 = vadd.f32 %v1660_v50, %v1452_v30  ;;  %v2716_v34 = vpop.f32.mrf.mxu1 }
 0x1c7   : > { %v2750_v47 = vpop.f32.mrf.mxu0 }
 0x1c8   : > { %v1432_v29 = vpop.f32.mrf.mxu1 }
 0x1c9   : > { %v1665_v39 = vpop.f32.mrf.mxu0  ;;  %v1455_v57 = vadd.f32 %v1432_v29, %v3671_v28 }
 0x1ca   : > { %v3719_v1 = vadd.f32 %v1665_v39, %v1453_v12  ;;  %v2719_v38 = vpop.f32.mrf.mxu1 }
 0x1cb   : > { %v2753_v6 = vpop.f32.mrf.mxu0 }
 0x1cc   : > { %v1435_v37 = vpop.f32.mrf.mxu1 }
 0x1cd   : > { %v1668_v52 = vpop.f32.mrf.mxu0  ;;  %v1456_v43 = vadd.f32 %v1435_v37, %v3674_v11  ;;  %v3733_v11 = vld [vmem:[%s3840_s2] ss:$0 sm:$0xff] }
 0x1ce   : > { %v3722_v18 = vadd.f32 %v1668_v52, %v1454_v2  ;;  %v2720_v0 = vpop.f32.mrf.mxu1 }
 0x1cf   : > { %v2754_v60 = vpop.f32.mrf.mxu0 }
 0x1d0   : > { %v1858_v55 = vpop.f32.mrf.mxu1 }
 0x1d1   : > { %v1673_v61 = vpop.f32.mrf.mxu0  ;;  %v1929_v8 = vadd.f32 %v1858_v55, %v3677_v62 }
 0x1d2   : > { %v3725_v5 = vadd.f32 %v1673_v61, %v1455_v57  ;;  %v2763_v14 = vpop.f32.mrf.mxu1 }
 0x1d3   : > { %v2757_v58 = vpop.f32.mrf.mxu0 }
 0x1d4   : > { %v1861_v28 = vpop.f32.mrf.mxu1 }
 0x1d5   : > { %v1676_v22 = vpop.f32.mrf.mxu0  ;;  %v1930_v63 = vadd.f32 %v1861_v28, %v3680_v10 }
 0x1d6   : > { %v3727_v53 = vadd.f32 %v1676_v22, %v1456_v43  ;;  %v2764_v15 = vpop.f32.mrf.mxu1 }
 0x1d7   : > { %v2758_v21 = vpop.f32.mrf.mxu0 }
 0x1d8   : > { %v1866_v59 = vpop.f32.mrf.mxu1 }
 0x1d9   : > { %v2037_v16 = vpop.f32.mrf.mxu0  ;;  %v1931_v7 = vadd.f32 %v1866_v59, %v3683_v17 }
 0x1da   : > { %v2108_v41 = vadd.f32 %v2037_v16, %v1929_v8  ;;  %v2767_v33 = vpop.f32.mrf.mxu1 }
 0x1db   : > { %v2801_v45 = vpop.f32.mrf.mxu0 }
 0x1dc   : > { %v2133_v62 = vmul.f32 %v3733_v11, %v2108_v41  ;;  %v1869_v23 = vpop.f32.mrf.mxu1 }
 0x1dd   : > { %v2040_v36 = vpop.f32.mrf.mxu0  ;;  %v1932_v32 = vadd.f32 %v1869_v23, %v3686_v13 }
 0x1de   : > { %v2158_v46 = vadd.f32 %v3739_v26, %v2133_v62  ;;  %v2109_v20 = vadd.f32 %v2040_v36, %v1930_v63  ;;  %v2768_v30 = vpop.f32.mrf.mxu1 }
 0x1df   : > { %v2802_v24 = vpop.f32.mrf.mxu0 }
 0x1e0   : > { %v2176_v10 = vmax.f32 %v2158_v46, 0.0  ;;  %v2134_v54 = vmul.f32 %v3733_v11, %v2109_v20  ;;  %v1874_v48 = vpop.f32.mrf.mxu1 }
 0x1e1   : > { %v2045_v51 = vpop.f32.mrf.mxu0  ;;  %v1933_v6 = vadd.f32 %v1874_v48, %v3689_v56 }
 0x1e2   : > { %2195 = vst.msk [vmem:[%s3747_s22] sm:$0xff] %vm2194_vm9, %v2176_v10  ;;  %v2159_v49 = vadd.f32 %v3739_v26, %v2134_v54  ;;  %v2110_v9 = vadd.f32 %v2045_v51, %v1931_v7  ;;  %v2771_v47 = vpop.f32.mrf.mxu1 }
 0x1e3   : > { %v2805_v12 = vpop.f32.mrf.mxu0 }
 0x1e4   : > { %v2177_v50 = vmax.f32 %v2159_v49, 0.0  ;;  %v2135_v19 = vmul.f32 %v3733_v11, %v2110_v9  ;;  %v1877_v39 = vpop.f32.mrf.mxu1 }
 0x1e5   : > { %v2048_v17 = vpop.f32.mrf.mxu0  ;;  %v1934_v61 = vadd.f32 %v1877_v39, %v3692_v35 }
 0x1e6   : > { %2196 = vst.msk [vmem:[%s3747_s22 + $0x8] sm:$0xff] %vm2194_vm9, %v2177_v50  ;;  %v2160_v2 = vadd.f32 %v3739_v26, %v2135_v19  ;;  %v2111_v34 = vadd.f32 %v2048_v17, %v1932_v32  ;;  %v2772_v52 = vpop.f32.mrf.mxu1 }
 0x1e7   : > { %v2806_v29 = vpop.f32.mrf.mxu0 }
 0x1e8   : > { %v2178_v57 = vmax.f32 %v2160_v2, 0.0  ;;  %v2136_v38 = vmul.f32 %v3733_v11, %v2111_v34  ;;  %v1882_v43 = vpop.f32.mrf.mxu1 }
 0x1e9   : > { %v2053_v13 = vpop.f32.mrf.mxu0  ;;  %v1935_v15 = vadd.f32 %v1882_v43, %v3695_v25 }
 0x1ea   : > { %2197 = vst.msk [vmem:[%s3747_s22 + $0x10] sm:$0xff] %vm2194_vm9, %v2178_v57  ;;  %v2161_v37 = vadd.f32 %v3739_v26, %v2136_v38  ;;  %v2112_v60 = vadd.f32 %v2053_v13, %v1933_v6  ;;  %v2775_v14 = vpop.f32.mrf.mxu1 }
 0x1eb   : > { %v2809_v0 = vpop.f32.mrf.mxu0 }
 0x1ec   : > { %v2179_v55 = vmax.f32 %v2161_v37, 0.0  ;;  %v2137_v58 = vmul.f32 %v3733_v11, %v2112_v60  ;;  %v1885_v21 = vpop.f32.mrf.mxu1 }
 0x1ed   : > { %v2056_v56 = vpop.f32.mrf.mxu0  ;;  %v1936_v36 = vadd.f32 %v1885_v21, %v3698_v40 }
 0x1ee   : > { %2198 = vst.msk [vmem:[%s3747_s22 + $0x18] sm:$0xff] %vm2194_vm9, %v2179_v55  ;;  %v2162_v22 = vadd.f32 %v3739_v26, %v2137_v58  ;;  %v2113_v28 = vadd.f32 %v2056_v56, %v1934_v61  ;;  %v2776_v59 = vpop.f32.mrf.mxu1 }
 0x1ef   : > { %v2810_v8 = vpop.f32.mrf.mxu0 }
 0x1f0   : > { %v2180_v16 = vmax.f32 %v2162_v22, 0.0  ;;  %v2138_v41 = vmul.f32 %v3733_v11, %v2113_v28  ;;  %v1890_v62 = vpop.f32.mrf.mxu1 }
 0x1f1   : > { %v2061_v35 = vpop.f32.mrf.mxu0  ;;  %v1937_v30 = vadd.f32 %v1890_v62, %v3701_v42 }
 0x1f2   : > { %2199 = vst.msk [vmem:[%s3747_s22 + $0x20] sm:$0xff] %vm2194_vm9, %v2180_v16  ;;  %v2163_v45 = vadd.f32 %v3739_v26, %v2138_v41  ;;  %v2114_v63 = vadd.f32 %v2061_v35, %v1935_v15  ;;  %v2779_v23 = vpop.f32.mrf.mxu1 }
 0x1f3   : > { %v2813_v33 = vpop.f32.mrf.mxu0 }
 0x1f4   : > { %v2181_v46 = vmax.f32 %v2163_v45, 0.0  ;;  %v2139_v20 = vmul.f32 %v3733_v11, %v2114_v63  ;;  %v1893_v10 = vpop.f32.mrf.mxu1 }
 0x1f5   : > { %v2064_v25 = vpop.f32.mrf.mxu0  ;;  %v1938_v19 = vadd.f32 %v1893_v10, %v3704_v44 }
 0x1f6   : > { %2200 = vst.msk [vmem:[%s3747_s22 + $0x28] sm:$0xff] %vm2194_vm9, %v2181_v46  ;;  %v2164_v24 = vadd.f32 %v3739_v26, %v2139_v20  ;;  %v2115_v7 = vadd.f32 %v2064_v25, %v1936_v36  ;;  %v2780_v9 = vpop.f32.mrf.mxu1 }
 0x1f7   : > { %v2814_v54 = vpop.f32.mrf.mxu0 }
 0x1f8   : > { %v2182_v51 = vmax.f32 %v2164_v24, 0.0  ;;  %v2140_v49 = vmul.f32 %v3733_v11, %v2115_v7  ;;  %v1898_v32 = vpop.f32.mrf.mxu1 }
 0x1f9   : > { %v2069_v40 = vpop.f32.mrf.mxu0  ;;  %v1939_v57 = vadd.f32 %v1898_v32, %v3707_v3 }
 0x1fa   : > { %2201 = vst.msk [vmem:[%s3747_s22 + $0x30] sm:$0xff] %vm2194_vm9, %v2182_v51  ;;  %v2165_v48 = vadd.f32 %v3739_v26, %v2140_v49  ;;  %v2116_v12 = vadd.f32 %v2069_v40, %v1937_v30  ;;  %v2783_v2 = vpop.f32.mrf.mxu1 }
 0x1fb   : > { %v2817_v50 = vpop.f32.mrf.mxu0 }
 0x1fc   : > { %v2183_v47 = vmax.f32 %v2165_v48, 0.0  ;;  %v2141_v17 = vmul.f32 %v3733_v11, %v2116_v12  ;;  %v1901_v29 = vpop.f32.mrf.mxu1 }
 0x1fd   : > { %v2072_v42 = vpop.f32.mrf.mxu0  ;;  %v1940_v61 = vadd.f32 %v1901_v29, %v3710_v4 }
 0x1fe   : > { %2202 = vst.msk [vmem:[%s3747_s22 + $0x38] sm:$0xff] %vm2194_vm9, %v2183_v47  ;;  %v2166_v34 = vadd.f32 %v3739_v26, %v2141_v17  ;;  %v2117_v39 = vadd.f32 %v2072_v42, %v1938_v19  ;;  %v2784_v13 = vpop.f32.mrf.mxu1 }
 0x1ff   : > { %v2818_v6 = vpop.f32.mrf.mxu0 }
 0x200   : > { %v2184_v38 = vmax.f32 %v2166_v34, 0.0  ;;  %v2142_v52 = vmul.f32 %v3733_v11, %v2117_v39  ;;  %v1906_v43 = vpop.f32.mrf.mxu1 }
 0x201   : > { %v2077_v44 = vpop.f32.mrf.mxu0  ;;  %v1941_v8 = vadd.f32 %v1906_v43, %v3713_v27 }
 0x202   : > { %2203 = vst.msk [vmem:[%s3747_s22 + $0x40] sm:$0xff] %vm2194_vm9, %v2184_v38  ;;  %v2167_v37 = vadd.f32 %v3739_v26, %v2142_v52  ;;  %v2118_v60 = vadd.f32 %v2077_v44, %v1939_v57  ;;  %v2787_v14 = vpop.f32.mrf.mxu1 }
 0x203   : > { %v2821_v0 = vpop.f32.mrf.mxu0 }
 0x204   : > { %v2185_v55 = vmax.f32 %v2167_v37, 0.0  ;;  %v2143_v58 = vmul.f32 %v3733_v11, %v2118_v60  ;;  %v1909_v28 = vpop.f32.mrf.mxu1 }
 0x205   : > { %v2080_v3 = vpop.f32.mrf.mxu0  ;;  %v1942_v62 = vadd.f32 %v1909_v28, %v3716_v31 }
 0x206   : > { %2204 = vst.msk [vmem:[%s3747_s22 + $0x48] sm:$0xff] %vm2194_vm9, %v2185_v55  ;;  %v2168_v56 = vadd.f32 %v3739_v26, %v2143_v58  ;;  %v2119_v22 = vadd.f32 %v2080_v3, %v1940_v61  ;;  %v2788_v41 = vpop.f32.mrf.mxu1 }
 0x207   : > { %v2822_v21 = vpop.f32.mrf.mxu0 }
 0x208   : > { %v2186_v15 = vmax.f32 %v2168_v56, 0.0  ;;  %v2144_v16 = vmul.f32 %v3733_v11, %v2119_v22  ;;  %v1914_v45 = vpop.f32.mrf.mxu1 }
 0x209   : > { %v2085_v4 = vpop.f32.mrf.mxu0  ;;  %v1943_v7 = vadd.f32 %v1914_v45, %v3719_v1 }
 0x20a   : > { %2205 = vst.msk [vmem:[%s3747_s22 + $0x50] sm:$0xff] %vm2194_vm9, %v2186_v15  ;;  %v2169_v59 = vadd.f32 %v3739_v26, %v2144_v16  ;;  %v2120_v35 = vadd.f32 %v2085_v4, %v1941_v8  ;;  %v2791_v46 = vpop.f32.mrf.mxu1 }
 0x20b   : > { %v2825_v63 = vpop.f32.mrf.mxu0 }
 0x20c   : > { %v2187_v33 = vmax.f32 %v2169_v59, 0.0  ;;  %v2145_v36 = vmul.f32 %v3733_v11, %v2120_v35  ;;  %v1917_v25 = vpop.f32.mrf.mxu1 }
 0x20d   : > { %v2088_v27 = vpop.f32.mrf.mxu0  ;;  %v1944_v48 = vadd.f32 %v1917_v25, %v3722_v18 }
 0x20e   : > { %2206 = vst.msk [vmem:[%s3747_s22 + $0x58] sm:$0xff] %vm2194_vm9, %v2187_v33  ;;  %v2170_v20 = vadd.f32 %v3739_v26, %v2145_v36  ;;  %v2121_v23 = vadd.f32 %v2088_v27, %v1942_v62  ;;  %v2792_v30 = vpop.f32.mrf.mxu1 }
 0x20f   : > { %v2826_v24 = vpop.f32.mrf.mxu0 }
 0x210   : > { %v2188_v10 = vmax.f32 %v2170_v20, 0.0  ;;  %v2146_v54 = vmul.f32 %v3733_v11, %v2121_v23  ;;  %v1922_v9 = vpop.f32.mrf.mxu1 }
 0x211   : > { %v2093_v31 = vpop.f32.mrf.mxu0  ;;  %v1945_v42 = vadd.f32 %v1922_v9, %v3725_v5 }
 0x212   : > { %2207 = vst.msk [vmem:[%s3747_s22 + $0x60] sm:$0xff] %vm2194_vm9, %v2188_v10  ;;  %v2171_v51 = vadd.f32 %v3739_v26, %v2146_v54  ;;  %v2122_v49 = vadd.f32 %v2093_v31, %v1943_v7  ;;  %v2795_v50 = vpop.f32.mrf.mxu1 }
 0x213   : > { %v2829_v40 = vpop.f32.mrf.mxu0 }
 0x214   : > { %v2189_v12 = vmax.f32 %v2171_v51, 0.0  ;;  %v2147_v32 = vmul.f32 %v3733_v11, %v2122_v49  ;;  %v1925_v17 = vpop.f32.mrf.mxu1 }
 0x215   : > { %v2096_v1 = vpop.f32.mrf.mxu0  ;;  %v1946_v52 = vadd.f32 %v1925_v17, %v3727_v53 }
 0x216   : > { %2208 = vst.msk [vmem:[%s3747_s22 + $0x68] sm:$0xff] %vm2194_vm9, %v2189_v12  ;;  %v2172_v19 = vadd.f32 %v3739_v26, %v2147_v32  ;;  %v2123_v47 = vadd.f32 %v2096_v1, %v1944_v48  ;;  %v2796_v29 = vpop.f32.mrf.mxu1 }
 0x217   : > { %v2830_v2 = vpop.f32.mrf.mxu0 }
 0x218   : > { %v2190_v34 = vmax.f32 %v2172_v19, 0.0  ;;  %v2148_v39 = vmul.f32 %v3733_v11, %v2123_v47 }
 0x219   : > { %v2101_v18 = vpop.f32.mrf.mxu0 }
 0x21a   : > { %2209 = vst.msk [vmem:[%s3747_s22 + $0x70] sm:$0xff] %vm2194_vm9, %v2190_v34  ;;  %v2173_v6 = vadd.f32 %v3739_v26, %v2148_v39  ;;  %v2124_v57 = vadd.f32 %v2101_v18, %v1945_v42 }
 0x21b   : > { %v2833_v38 = vpop.f32.mrf.mxu0 }
 0x21c   : > { %v2191_v13 = vmax.f32 %v2173_v6, 0.0  ;;  %v2149_v44 = vmul.f32 %v3733_v11, %v2124_v57 }
 0x21d   : > { %v2104_v37 = vpop.f32.mrf.mxu0 }
 0x21e   : > { %2210 = vst.msk [vmem:[%s3747_s22 + $0x78] sm:$0xff] %vm2194_vm9, %v2191_v13  ;;  %v2174_v5 = vadd.f32 %v3739_v26, %v2149_v44  ;;  %v2125_v60 = vadd.f32 %v2104_v37, %v1946_v52 }
 0x21f   : > { %v2834_v43 = vpop.f32.mrf.mxu0 }
 0x220   : > { %v2192_v0 = vmax.f32 %v2174_v5, 0.0  ;;  %v2150_v61 = vmul.f32 %v3733_v11, %v2125_v60 }
 0x222   : > { %2211 = vst.msk [vmem:[%s3747_s22 + $0x80] sm:$0xff] %vm2194_vm9, %v2192_v0  ;;  %v2175_v55 = vadd.f32 %v3739_v26, %v2150_v61 }
 0x224   : > { %v2193_v58 = vmax.f32 %v2175_v55, 0.0 }
 0x226   : > { %2212 = vst.msk [vmem:[%s3747_s22 + $0x88] sm:$0xff] %vm2194_vm9, %v2193_v58 }
 0x227 PF: > { %s14_s15 = sadd.s32 1, %s2890_s15  }
 0x228   : > { %p11_p4 = scmp.ge.s32.totalorder %s14_s15, 6  }
 0x22a   :  { %13 = sbr.rel (!%p11_p4) target bundleno = 1 (0x1), region = 74 }

// kernel: conv_block_forward.2
= control target key start
LH: loop header
LB: loop body
LE: loop exit
PB: predicated region body
PF: predicated region fallthrough
CT: control target
= control target key end

     0   :  { %s3044_s9 = smov 0   ;;  %s4039_s0 = inlined_call_operand.vmem [shape: bf16[4,188,4], index: 0, kind: input, shape index: {}]   ;;  %s4040_s1 = inlined_call_operand.vmem [shape: bf16[9,4,128], index: 1, kind: input, shape index: {}]   ;;  %s4041_s2 = inlined_call_operand.vmem [shape: f32[4,2,128], index: 2, kind: output, shape index: {}]  }
   0x1 LB: > { %s2388_s10 = sadd.s32 4294967295, %s3025_s9   ;;  %p2392_p0 = scmp.ge.s32.totalorder %s3025_s9, 1  ;;  %s3025_s9 = sphi %s3044_s9, %s12_s9  }
   0x2   : > { %p112_p1 = scmp.lt.s32.totalorder %s3025_s9, 5 }
   0x4   : > { %p113_p2 = pnand %p2392_p0, %p112_p1 }
   0x5   : > { %p133_p3 = scmp.lt.s32.totalorder (!%p113_p2), %s2388_s10, 3 }
   0x6   : > { %116 = sbr.rel (%p113_p2) target bundleno = 563 (0x233), region = 28 }
   0xb   : > { %v2395_v0 = vld [vmem:[%s4040_s1 + $0x2] sm:$0x3]  ;;  %vm318_vm0 = vcmask 1041408   ;;  %v3027_v1 = vmov 0.0   ;;  %s4043_s10 = smov (!%p133_p3, %s2388_s10), 3  ;;  %vm3028_vm1 = vmmov 0  }
   0xc   : > { %2629 = vmatprep.subr.bf16.mxu0 %v3027_v1  ;;  %2971 = vmatprep.subr.bf16.mxu1 %v3027_v1  ;;  %v320_v2 = vsel %vm318_vm0, %v2395_v0, 0  ;;  %s2973_s13 = smul.u32 96, %s4043_s10  ;;  %vm213_vm2 = vsmask.f32 7424  ;;  %v2424_v12 = vld [vmem:[%s4040_s1 + $0x4] sm:$0x3] }
   0xd   : > { %2630 = vmatpush3.bf16.msra.mxu0 %v320_v2  ;;  %2972 = vmatpush3.bf16.msra.mxu1 %v320_v2  ;;  %vm290_vm3 = vcmask 31744   ;;  %v161_v20 = vld [vmem:[%s4040_s1] sm:$0x3]  ;;  %v607_v26 = vsel %vm318_vm0, %v2424_v12, 0  ;;  %vm559_vm4 = vcmask 1046528   ;;  %vm1228_vm5 = vcmask 1045504  }
   0xe   : > { %2631 = vmatprep.mubr.msk.bf16.mxu0 %vm3028_vm1, %v3027_v1  ;;  %2651 = vmatprep.mubr.msk.bf16.mxu1 %vm3028_vm1, %v3027_v1  ;;  %s3070_s16 = scalar_lea.vmem %s4039_s0, %s2973_s13  ;;  %v446_v31 = vsel %vm318_vm0, %v161_v20, 0  ;;  %v2435_v12 = vld [vmem:[%s4040_s1 + $0x6] sm:$0x3]  ;;  %vm979_vm6 = vsmask.f32 6400  ;;  %vm1897_vm8 = vcmask 1044480  }
   0xf   : > { %2705 = vmatprep.subr.bf16.mxu0 %v3027_v1  ;;  %2667 = vmatprep.subr.bf16.mxu1 %v3027_v1  ;;  %v143_v3 = vld [vmem:[%s3070_s16] sm:$0xf]  ;;  %v3074_v4 = vld [vmem:[%s3070_s16 + $0x4] sm:$0xf]  ;;  %v3080_v6 = vld [vmem:[%s3070_s16 + $0x8] sm:$0xff]   ;;  %s2394_s5 = sshll.u32 %s4043_s10, 1 }
  0x10   : > { %v3077_v5 = vcombine.low %v143_v3, %v3074_v4  ;;  %v222_v9 = vshll.u32 %v3080_v6, 16  ;;  %v3086_v10 = vld [vmem:[%s3070_s16 + $0x28] sm:$0xff]   ;;  %v3089_v11 = vld [vmem:[%s3070_s16 + $0x30] sm:$0xff]   ;;  %v3098_v14 = vld [vmem:[%s3070_s16 + $0x38] sm:$0xff]   ;;  %v226_v21 = vshrl.u32 %v3080_v6, 16  ;;  %s141_s8 = scalar_lea.vmem %s4041_s2, %s2394_s5 }
  0x11   : > { %v3095_v13 = vld [vmem:[%s3070_s16 + $0x10] sm:$0xff]   ;;  %v254_v17 = vshll.u32 %v3086_v10, 16  ;;  %v258_v18 = vshrl.u32 %v3086_v10, 16  ;;  %v262_v19 = vshll.u32 %v3089_v11, 16  ;;  %v266_v29 = vshrl.u32 %v3089_v11, 16  ;;  %v3118_v32 = vld [vmem:[%s3070_s16 + $0x18] sm:$0xff]  }
  0x12   : > { %v215_v7 = vshrl.u32 %v3077_v5, 16  ;;  %v217_v8 = vshll.u32 %v3077_v5, 16  ;;  %v224_v16 = vrot.slane %v222_v9, 1  ;;  %v230_v24 = vshll.u32 %v3095_v13, 16  ;;  %v3128_v38 = vld [vmem:[%s3070_s16 + $0x40] sm:$0xff]  }
  0x13   : > { %v3107_v23 = vrot.slane %v254_v17, 1  ;;  %v264_v25 = vrot.slane %v262_v19, 1  ;;  %v270_v30 = vshll.u32 %v3098_v14, 16  ;;  %v238_v39 = vshll.u32 %v3118_v32, 16  ;;  %v3140_v47 = vld [vmem:[%s3070_s16 + $0x20] sm:$0xff]  }
  0x14   : > { %v219_v15 = vrot.slane %v217_v8, 1  ;;  %v228_v34 = vor.u32 %v226_v21, %v224_v16  ;;  %v232_v35 = vrot.slane %v230_v24, 1  ;;  %v234_v41 = vshrl.u32 %v3095_v13, 16  ;;  %v2993_v42 = vld [vmem:[%s3070_s16 + $0x48] ss:$0 sps:$4 sm:$0x11]  }
  0x15   : > { %v260_v28 = vor.u32 %v258_v18, %v3107_v23  ;;  %v268_v36 = vor.u32 %v266_v29, %v264_v25  ;;  %v272_v37 = vrot.slane %v270_v30, 1  ;;  %v274_v44 = vshrl.u32 %v3098_v14, 16  ;;  %v553_v8 = vld [vmem:[%s3070_s16] sm:$0xe]  ;;  %v733_v21 = vld [vmem:[%s3070_s16 + $0xc] sm:$0xf] }
  0x16   : > { %v220_v22 = vor.u32 %v219_v15, %v215_v7  ;;  %v233_v40 = vsel %vm213_vm2, %v228_v34, %v232_v35  ;;  %v278_v45 = vshll.u32 %v3128_v38, 16  ;;  %v240_v46 = vrot.slane %v238_v39, 1  ;;  %v3208_v24 = vld [vmem:[%s3070_s16 + $0x10] sm:$0xff]  }
  0x17   : > { %v265_v33 = vsel %vm213_vm2, %v260_v28, %v264_v25  ;;  %v273_v43 = vsel %vm213_vm2, %v268_v36, %v272_v37  ;;  %v236_v48 = vor.u32 %v234_v41, %v232_v35  ;;  %v575_v49 = vrot.slane %v3128_v38, 1  ;;  %v3216_v28 = vld [vmem:[%s3070_s16 + $0x18] sm:$0xff]   ;;  %v3240_v35 = vld [vmem:[%s3070_s16 + $0x20] sm:$0xff]  }
  0x18   : > { %v225_v27 = vsel %vm213_vm2, %v220_v22, %v224_v16  ;;  %2652 = vmatmul.mubr.msk.bf16.vlgmr.msra.gmra.mxu1 %vm290_vm3, %v265_v33  ;;  %v577_v50 = vrot.slane %v2993_v42, 1  ;;  %v276_v51 = vor.u32 %v274_v44, %v272_v37  ;;  %v280_v52 = vrot.slane %v278_v45, 1  ;;  %v1222_v22 = vld [vmem:[%s3070_s16 + $0x8] sm:$0xc]  ;;  %v3272_v45 = vld [vmem:[%s3070_s16 + $0x30] sm:$0xff]  }
  0x19   : > { %2632 = vmatmul.mubr.msk.bf16.vlgmr.msra.gmra.mxu0 %vm290_vm3, %v225_v27  ;;  %2668 = vmatpush3.bf16.msra.mxu1 %v446_v31  ;;  %v241_v54 = vsel %vm213_vm2, %v236_v48, %v240_v46  ;;  %v242_v55 = vshrl.u32 %v3118_v32, 16  ;;  %v246_v56 = vshll.u32 %v3140_v47, 16  ;;  %v282_v58 = vshrl.u32 %v3128_v38, 16 }
  0x1a   : > { %2706 = vmatpush3.bf16.msra.mxu0 %v607_v26  ;;  %2635 = vmatprep.mubr.msk.bf16.mxu0 %vm3028_vm1, %v3027_v1  ;;  %v3151_v53 = vsel %vm559_vm4, %v575_v49, %v577_v50  ;;  %v281_v57 = vsel %vm213_vm2, %v276_v51, %v280_v52  ;;  %v286_v59 = vshll.u32 %v2993_v42, 16  ;;  %v250_v2 = vshrl.u32 %v3140_v47, 16  ;;  %v732_v50 = vld [vmem:[%s3070_s16 + $0x8] sm:$0xe] }
  0x1b   : > { %2781 = vmatprep.subr.bf16.mxu0 %v3027_v1  ;;  %2655 = vmatprep.mubr.msk.bf16.mxu1 %vm3028_vm1, %v3027_v1  ;;  %v244_v60 = vor.u32 %v242_v55, %v240_v46  ;;  %v248_v61 = vrot.slane %v246_v56, 1  ;;  %v284_v62 = vor.u32 %v282_v58, %v280_v52  ;;  %v2425_v15 = vcombine.low %v553_v8, %v3074_v4  ;;  %v2455_v4 = vld [vmem:[%s4040_s1 + $0x8] sm:$0x3] }
  0x1c   : > { %2743 = vmatprep.subr.bf16.mxu1 %v3027_v1  ;;  %v288_v63 = vrot.slane %v286_v59, 1  ;;  %v848_v16 = vsel %vm318_vm0, %v2435_v12, 0  ;;  %v561_v18 = vrot.slane %v3080_v6, 1  ;;  %v1097_v20 = vsel %vm318_vm0, %v2455_v4, 0 }
  0x1d   : > { %v249_v0 = vsel %vm213_vm2, %v244_v60, %v248_v61  ;;  %v252_v7 = vor.u32 %v250_v2, %v248_v61  ;;  %v560_v17 = vrot.slane %v2425_v15, 1  ;;  %v2467_v25 = vcombine.low %v1222_v22, %v733_v21 }
  0x1e   : > { %v289_v3 = vsel %vm213_vm2, %v284_v62, %v288_v63  ;;  %v1230_v27 = vrot.slane %v3208_v24, 2  ;;  %v1232_v30 = vrot.slane %v3216_v28, 2  ;;  %v567_v34 = vrot.slane %v3140_v47, 1 }
  0x1f   : > { %v257_v9 = vsel %vm213_vm2, %v252_v7, %v3107_v23  ;;  %v562_v19 = vsel %vm559_vm4, %v560_v17, %v561_v18  ;;  %v1229_v26 = vrot.slane %v2467_v25, 2  ;;  %v1234_v36 = vrot.slane %v3240_v35, 2  ;;  %v2477_v7 = vld [vmem:[%s4040_s1 + $0xc] sm:$0x3] }
  0x20   : > { %2656 = vmatmul.mubr.msk.bf16.gmra.mxu1 %vm290_vm3, %v273_v43  ;;  %v3228_v33 = vsel %vm1228_vm5, %v1230_v27, %v1232_v30  ;;  %v569_v37 = vrot.slane %v3086_v10, 1  ;;  %v571_v42 = vrot.slane %v3089_v11, 1  ;;  %v1238_v46 = vrot.slane %v3272_v45, 2 }
  0x21   : > { %2636 = vmatmul.mubr.msk.bf16.gmra.mxu0 %vm290_vm3, %v233_v40  ;;  %2659 = vmatprep.mubr.msk.bf16.mxu1 %vm3028_vm1, %v3027_v1  ;;  %v3219_v29 = vsel %vm1228_vm5, %v1229_v26, %v1230_v27  ;;  %v3248_v39 = vsel %vm1228_vm5, %v1232_v30, %v1234_v36  ;;  %v3256_v40 = vld [vmem:[%s3070_s16 + $0x28] sm:$0xff]   ;;  %v2436_v51 = vcombine.low %v732_v50, %v733_v21  ;;  %v989_v55 = vshrl.u32 %v3208_v24, 16 }
  0x22   : > { %2639 = vmatprep.mubr.msk.bf16.mxu0 %vm3028_vm1, %v3027_v1  ;;  %v1236_v41 = vrot.slane %v3256_v40, 2  ;;  %v572_v44 = vsel %vm559_vm4, %v569_v37, %v571_v42  ;;  %v998_v2 = vshrl.u32 %v3216_v28, 16  ;;  %v1517_v15 = vsel %vm318_vm0, %v2477_v7, 0  ;;  %v3408_v7 = vld [vmem:[%s3070_s16 + $0x50] ss:$0 sps:$4 sm:$0x33]  }
  0x23   : > { %v981_v52 = vshrl.u32 %v2436_v51, 16  ;;  %v801_v56 = vrot.slane %v2436_v51, 1  ;;  %v991_v60 = vrot.slane %v989_v55, 1  ;;  %v1010_v4 = vshll.u32 %v3240_v35, 16 }
  0x24   : > { %v3264_v43 = vsel %vm1228_vm5, %v1234_v36, %v1236_v41  ;;  %v1019_v25 = vshll.u32 %v3256_v40, 16  ;;  %v808_v26 = vrot.slane %v3256_v40, 1  ;;  %vm1648_vm7 = vsmask.f32 5376 }
  0x25   : > { %v983_v58 = vrot.slane %v981_v52, 1  ;;  %v1012_v21 = vrot.slane %v1010_v4, 2 }
  0x28   : > { %2660 = vmatmul.mubr.msk.bf16.gmra.mxu1 %vm290_vm3, %v281_v57  ;;  %v2466_v57 = vld [vmem:[%s4040_s1 + $0xa] sm:$0x3] }
  0x29   : > { %2640 = vmatmul.mubr.msk.bf16.gmra.mxu0 %vm290_vm3, %v241_v54  ;;  %2663 = vmatprep.mubr.msk.bf16.mxu1 %vm3028_vm1, %v3027_v1  ;;  %v984_v54 = vshll.u32 %v2436_v51, 16 }
  0x2a   : > { %2643 = vmatprep.mubr.msk.bf16.mxu0 %vm3028_vm1, %v3027_v1 }
  0x2b   : > { %v986_v59 = vrot.slane %v984_v54, 2  ;;  %v3381_v54 = vld [vmem:[%s3070_s16 + $0x40] sm:$0xff]  }
  0x2d   : > { %v987_v63 = vor.u32 %v986_v59, %v983_v58 }
  0x30   : > { %2664 = vmatmul.mubr.msk.bf16.gmra.mxu1 %vm290_vm3, %v289_v3  ;;  %v1001_v3 = vshll.u32 %v3216_v28, 16 }
  0x31   : > { %2644 = vmatmul.mubr.msk.bf16.gmra.mxu0 %vm290_vm3, %v249_v0  ;;  %2669 = vmatprep.mubr.msk.bf16.mxu1 %vm3028_vm1, %v3027_v1 }
  0x32   : > { %2647 = vmatprep.mubr.msk.bf16.mxu0 %vm3028_vm1, %v3027_v1  ;;  %v1003_v12 = vrot.slane %v1001_v3, 2 }
  0x38   : > { %2670 = vmatmul.mubr.msk.bf16.vlgmr.msra.gmra.mxu1 %vm290_vm3, %v3077_v5  ;;  %v563_v5 = vrot.slane %v3095_v13, 1 }
  0x39   : > { %2648 = vmatmul.mubr.msk.bf16.gmra.mxu0 %vm290_vm3, %v257_v9  ;;  %2744 = vmatpush3.bf16.msra.mxu1 %v848_v16  ;;  %v1000_v9 = vrot.slane %v998_v2, 1 }
  0x3a   : > { %2707 = vmatprep.mubr.msk.bf16.mxu0 %vm3028_vm1, %v3027_v1  ;;  %2673 = vmatprep.mubr.msk.bf16.mxu1 %vm3028_vm1, %v3027_v1  ;;  %v564_v23 = vsel %vm559_vm4, %v561_v18, %v563_v5  ;;  %v1007_v18 = vshrl.u32 %v3240_v35, 16 }
  0x3b   : > { %2819 = vmatprep.subr.bf16.mxu1 %v3027_v1  ;;  %v1004_v17 = vor.u32 %v1003_v12, %v1000_v9  ;;  %v3004_v9 = vld [vmem:[%s3070_s16 + $0x50] ss:$0 sps:$4 sm:$0x11]  }
  0x40   : > { %2674 = vmatmul.mubr.msk.bf16.gmra.mxu1 %vm290_vm3, %v3080_v6  ;;  %v565_v6 = vrot.slane %v3118_v32, 1 }
  0x41   : > { %2708 = vmatmul.mubr.msk.bf16.vlgmr.msra.gmra.mxu0 %vm290_vm3, %v562_v19  ;;  %2677 = vmatprep.mubr.msk.bf16.mxu1 %vm3028_vm1, %v3027_v1  ;;  %v806_v19 = vrot.slane %v3240_v35, 1  ;;  %v810_v35 = vrot.slane %v3272_v45, 1 }
  0x42   : > { %2782 = vmatpush3.bf16.msra.mxu0 %v1097_v20  ;;  %2711 = vmatprep.mubr.msk.bf16.mxu0 %vm3028_vm1, %v3027_v1  ;;  %v566_v31 = vsel %vm559_vm4, %v563_v5, %v565_v6  ;;  %v1009_v5 = vrot.slane %v1007_v18, 1 }
  0x43   : > { %2857 = vmatprep.subr.bf16.mxu0 %v3027_v1  ;;  %v809_v30 = vsel %vm559_vm4, %v806_v19, %v808_v26 }
  0x48   : > { %2678 = vmatmul.mubr.msk.bf16.gmra.mxu1 %vm290_vm3, %v3095_v13  ;;  %v568_v13 = vsel %vm559_vm4, %v565_v6, %v567_v34 }
  0x49   : > { %2712 = vmatmul.mubr.msk.bf16.gmra.mxu0 %vm290_vm3, %v564_v23  ;;  %2681 = vmatprep.mubr.msk.bf16.mxu1 %vm3028_vm1, %v3027_v1  ;;  %v1013_v23 = vor.u32 %v1012_v21, %v1009_v5  ;;  %v1401_v21 = vld [vmem:[%s3070_s16 + $0x10] sm:$0xc] }
  0x4a   : > { %2715 = vmatprep.mubr.msk.bf16.mxu0 %vm3028_vm1, %v3027_v1 }
  0x4b   : > { %v1014_v27 = vsel %vm979_vm6, %v1004_v17, %v1013_v23 }
  0x50   : > { %2682 = vmatmul.mubr.msk.bf16.gmra.mxu1 %vm290_vm3, %v3118_v32  ;;  %v570_v32 = vsel %vm559_vm4, %v567_v34, %v569_v37  ;;  %v1025_v34 = vshrl.u32 %v3272_v45, 16 }
  0x51   : > { %2716 = vmatmul.mubr.msk.bf16.gmra.mxu0 %vm290_vm3, %v566_v31  ;;  %2685 = vmatprep.mubr.msk.bf16.mxu1 %vm3028_vm1, %v3027_v1 }
  0x52   : > { %2719 = vmatprep.mubr.msk.bf16.mxu0 %vm3028_vm1, %v3027_v1  ;;  %v1027_v37 = vrot.slane %v1025_v34, 1  ;;  %v3457_v34 = vld [vmem:[%s3070_s16 + $0x20] sm:$0xff]  }
  0x58   : > { %2686 = vmatmul.mubr.msk.bf16.gmra.mxu1 %vm290_vm3, %v3140_v47  ;;  %v573_v47 = vrot.slane %v3098_v14, 1 }
  0x59   : > { %2720 = vmatmul.mubr.msk.bf16.gmra.mxu0 %vm290_vm3, %v568_v13  ;;  %2689 = vmatprep.mubr.msk.bf16.mxu1 %vm3028_vm1, %v3027_v1  ;;  %v1028_v13 = vshll.u32 %v3272_v45, 16  ;;  %v1242_v45 = vrot.slane %v3381_v54, 2 }
  0x5a   : > { %2723 = vmatprep.mubr.msk.bf16.mxu0 %vm3028_vm1, %v3027_v1  ;;  %v574_v48 = vsel %vm559_vm4, %v571_v42, %v573_v47 }
  0x60   : > { %2690 = vmatmul.mubr.msk.bf16.gmra.mxu1 %vm290_vm3, %v3086_v10  ;;  %v3282_v10 = vsel %vm1228_vm5, %v1236_v41, %v1238_v46  ;;  %v3367_v41 = vld [vmem:[%s3070_s16 + $0x38] sm:$0xff]  }
  0x61   : > { %2724 = vmatmul.mubr.msk.bf16.gmra.mxu0 %vm290_vm3, %v570_v32  ;;  %2693 = vmatprep.mubr.msk.bf16.mxu1 %vm3028_vm1, %v3027_v1  ;;  %v1030_v32 = vrot.slane %v1028_v13, 2 }
  0x62   : > { %2727 = vmatprep.mubr.msk.bf16.mxu0 %vm3028_vm1, %v3027_v1 }
  0x63   : > { %v1031_v42 = vor.u32 %v1030_v32, %v1027_v37 }
  0x68   : > { %2694 = vmatmul.mubr.msk.bf16.gmra.mxu1 %vm290_vm3, %v3089_v11  ;;  %v576_v11 = vsel %vm559_vm4, %v573_v47, %v575_v49  ;;  %v802_v49 = vrot.slane %v3208_v24, 1  ;;  %v1037_v47 = vshll.u32 %v3367_v41, 16 }
  0x69   : > { %2728 = vmatmul.mubr.msk.bf16.gmra.mxu0 %vm290_vm3, %v572_v44  ;;  %2697 = vmatprep.mubr.msk.bf16.mxu1 %vm3028_vm1, %v3027_v1  ;;  %v1034_v44 = vshrl.u32 %v3367_v41, 16 }
  0x6a   : > { %2731 = vmatprep.mubr.msk.bf16.mxu0 %vm3028_vm1, %v3027_v1  ;;  %v803_v62 = vsel %vm559_vm4, %v801_v56, %v802_v49  ;;  %v1039_v51 = vrot.slane %v1037_v47, 2  ;;  %v1046_v56 = vshll.u32 %v3381_v54, 16 }
  0x6c   : > { %v1048_v59 = vrot.slane %v1046_v56, 2 }
  0x70   : > { %2698 = vmatmul.mubr.msk.bf16.gmra.mxu1 %vm290_vm3, %v3098_v14  ;;  %v992_v14 = vshll.u32 %v3208_v24, 16  ;;  %v1016_v24 = vshrl.u32 %v3256_v40, 16  ;;  %v811_v40 = vsel %vm559_vm4, %v808_v26, %v810_v35  ;;  %v3440_v26 = vld [vmem:[%s3070_s16 + $0x18] sm:$0xff]  }
  0x71   : > { %2732 = vmatmul.mubr.msk.bf16.gmra.mxu0 %vm290_vm3, %v574_v48  ;;  %2701 = vmatprep.mubr.msk.bf16.mxu1 %vm3028_vm1, %v3027_v1  ;;  %v812_v48 = vrot.slane %v3367_v41, 1 }
  0x72   : > { %2735 = vmatprep.mubr.msk.bf16.mxu0 %vm3028_vm1, %v3027_v1  ;;  %v994_v61 = vrot.slane %v992_v14, 2  ;;  %v1018_v6 = vrot.slane %v1016_v24, 1  ;;  %v1043_v14 = vshrl.u32 %v3381_v54, 16  ;;  %v2497_v24 = vld [vmem:[%s4040_s1 + $0xe] sm:$0x3] }
  0x73   : > { %v813_v52 = vsel %vm559_vm4, %v810_v35, %v812_v48 }
  0x74   : > { %v995_v0 = vor.u32 %v994_v61, %v991_v60  ;;  %v1045_v58 = vrot.slane %v1043_v14, 1  ;;  %v3395_v61 = vld [vmem:[%s3070_s16 + $0x48] sm:$0xff]  }
  0x76   : > { %v996_v8 = vsel %vm979_vm6, %v987_v63, %v995_v0  ;;  %v1005_v20 = vsel %vm979_vm6, %v995_v0, %v1004_v17  ;;  %v1055_v63 = vshll.u32 %v3395_v61, 16  ;;  %v816_v0 = vrot.slane %v3395_v61, 1 }
  0x77   : > { %v818_v17 = vrot.slane %v3004_v9, 1  ;;  %v3529_v9 = vld [vmem:[%s3070_s16 + $0x40] sm:$0xff]  }
  0x78   : > { %2702 = vmatmul.mubr.msk.bf16.gmra.mxu1 %vm290_vm3, %v3128_v38  ;;  %v1276_v38 = vsel %vm318_vm0, %v2466_v57, 0 }
  0x79   : > { %2736 = vmatmul.mubr.msk.bf16.gmra.mxu0 %vm290_vm3, %v576_v11  ;;  %2745 = vmatprep.mubr.msk.bf16.mxu1 %vm3028_vm1, %v3027_v1  ;;  %v1036_v11 = vrot.slane %v1034_v44, 1 }
  0x7a   : > { %2739 = vmatprep.mubr.msk.bf16.mxu0 %vm3028_vm1, %v3027_v1 }
  0x7b   : > { %v1040_v55 = vor.u32 %v1039_v51, %v1036_v11 }
  0x7d   : > { %v1041_v57 = vsel %vm979_vm6, %v1031_v42, %v1040_v55 }
  0x80   : > { %2746 = vmatmul.mubr.msk.bf16.vlgmr.msra.gmra.mxu1 %vm290_vm3, %v803_v62  ;;  %v1049_v62 = vor.u32 %v1048_v59, %v1045_v58  ;;  %v3508_v58 = vld [vmem:[%s3070_s16 + $0x38] sm:$0xff]  }
  0x81   : > { %2740 = vmatmul.mubr.msk.bf16.gmra.mxu0 %vm290_vm3, %v3151_v53  ;;  %2820 = vmatpush3.bf16.msra.mxu1 %v1276_v38  ;;  %v804_v53 = vrot.slane %v3216_v28, 1  ;;  %v1021_v28 = vrot.slane %v1019_v25, 2  ;;  %v1052_v38 = vshrl.u32 %v3395_v61, 16 }
  0x82   : > { %2783 = vmatprep.mubr.msk.bf16.mxu0 %vm3028_vm1, %v3027_v1  ;;  %2749 = vmatprep.mubr.msk.bf16.mxu1 %vm3028_vm1, %v3027_v1  ;;  %v1050_v2 = vsel %vm979_vm6, %v1040_v55, %v1049_v62 }
  0x83   : > { %2895 = vmatprep.subr.bf16.mxu1 %v3027_v1  ;;  %v805_v16 = vsel %vm559_vm4, %v802_v49, %v804_v53  ;;  %v807_v22 = vsel %vm559_vm4, %v804_v53, %v806_v19  ;;  %v1022_v31 = vor.u32 %v1021_v28, %v1018_v6  ;;  %v814_v49 = vrot.slane %v3381_v54, 1 }
  0x84   : > { %v1054_v3 = vrot.slane %v1052_v38, 1  ;;  %v1057_v53 = vrot.slane %v1055_v63, 2  ;;  %v1471_v28 = vrot.slane %v3440_v26, 2 }
  0x85   : > { %v1023_v36 = vsel %vm979_vm6, %v1013_v23, %v1022_v31  ;;  %v1032_v50 = vsel %vm979_vm6, %v1022_v31, %v1031_v42  ;;  %v815_v60 = vsel %vm559_vm4, %v812_v48, %v814_v49  ;;  %v3488_v48 = vld [vmem:[%s3070_s16 + $0x30] sm:$0xff]  }
  0x86   : > { %v1058_v12 = vor.u32 %v1057_v53, %v1054_v3 }
  0x88   : > { %2750 = vmatmul.mubr.msk.bf16.gmra.mxu1 %vm290_vm3, %v805_v16  ;;  %v1064_v16 = vshll.u32 %v3408_v7, 16  ;;  %v1059_v18 = vsel %vm979_vm6, %v1049_v62, %v1058_v12 }
  0x89   : > { %2784 = vmatmul.mubr.msk.bf16.vlgmr.msra.gmra.mxu0 %vm290_vm3, %v996_v8  ;;  %2753 = vmatprep.mubr.msk.bf16.mxu1 %vm3028_vm1, %v3027_v1  ;;  %v817_v8 = vsel %vm559_vm4, %v814_v49, %v816_v0 }
  0x8a   : > { %2858 = vmatpush3.bf16.msra.mxu0 %v1517_v15  ;;  %2787 = vmatprep.mubr.msk.bf16.mxu0 %vm3028_vm1, %v3027_v1  ;;  %v1061_v15 = vshrl.u32 %v3408_v7, 16  ;;  %v1066_v19 = vrot.slane %v1064_v16, 2 }
  0x8b   : > { %2933 = vmatprep.subr.bf16.mxu0 %v3027_v1 }
  0x8c   : > { %v1063_v4 = vrot.slane %v1061_v15, 1 }
  0x8e   : > { %v1067_v5 = vor.u32 %v1066_v19, %v1063_v4 }
  0x90   : > { %2754 = vmatmul.mubr.msk.bf16.gmra.mxu1 %vm290_vm3, %v807_v22  ;;  %v3428_v22 = vld [vmem:[%s3070_s16 + $0x14] sm:$0xf]  ;;  %v1068_v23 = vsel %vm979_vm6, %v1058_v12, %v1067_v5  ;;  %v3552_v5 = vld [vmem:[%s3070_s16 + $0x48] sm:$0xff]  }
  0x91   : > { %2788 = vmatmul.mubr.msk.bf16.gmra.mxu0 %vm290_vm3, %v1005_v20  ;;  %2757 = vmatprep.mubr.msk.bf16.mxu1 %vm3028_vm1, %v3027_v1  ;;  %v819_v20 = vsel %vm559_vm4, %v816_v0, %v818_v17  ;;  %v3437_v25 = vcombine.low %v1401_v21, %v3428_v22  ;;  %v1483_v54 = vrot.slane %v3552_v5, 2 }
  0x92   : > { %2791 = vmatprep.mubr.msk.bf16.mxu0 %vm3028_vm1, %v3027_v1 }
  0x93   : > { %v1470_v6 = vrot.slane %v3437_v25, 2 }
  0x95   : > { %v1472_v31 = vsel %vm1228_vm5, %v1470_v6, %v1471_v28 }
  0x98   : > { %2758 = vmatmul.mubr.msk.bf16.gmra.mxu1 %vm290_vm3, %v809_v30  ;;  %v2508_v30 = vld [vmem:[%s4040_s1 + $0x10] sm:$0x3] }
  0x99   : > { %2792 = vmatmul.mubr.msk.bf16.gmra.mxu0 %vm290_vm3, %v1014_v27  ;;  %2761 = vmatprep.mubr.msk.bf16.mxu1 %vm3028_vm1, %v3027_v1  ;;  %v1766_v27 = vsel %vm318_vm0, %v2497_v24, 0  ;;  %v1945_v13 = vsel %vm318_vm0, %v2508_v30, 0 }
  0x9a   : > { %2795 = vmatprep.mubr.msk.bf16.mxu0 %vm3028_vm1, %v3027_v1 }
  0xa0   : > { %2762 = vmatmul.mubr.msk.bf16.gmra.mxu1 %vm290_vm3, %v811_v40 }
  0xa1   : > { %2796 = vmatmul.mubr.msk.bf16.gmra.mxu0 %vm290_vm3, %v1023_v36  ;;  %2765 = vmatprep.mubr.msk.bf16.mxu1 %vm3028_vm1, %v3027_v1  ;;  %v3470_v36 = vld [vmem:[%s3070_s16 + $0x28] sm:$0xff]  }
  0xa2   : > { %2799 = vmatprep.mubr.msk.bf16.mxu0 %vm3028_vm1, %v3027_v1  ;;  %v1475_v32 = vrot.slane %v3470_v36, 2 }
  0xa8   : > { %2766 = vmatmul.mubr.msk.bf16.gmra.mxu1 %vm290_vm3, %v813_v52 }
  0xa9   : > { %2800 = vmatmul.mubr.msk.bf16.gmra.mxu0 %vm290_vm3, %v1032_v50  ;;  %2769 = vmatprep.mubr.msk.bf16.mxu1 %vm3028_vm1, %v3027_v1 }
  0xaa   : > { %2803 = vmatprep.mubr.msk.bf16.mxu0 %vm3028_vm1, %v3027_v1 }
  0xb0   : > { %2770 = vmatmul.mubr.msk.bf16.gmra.mxu1 %vm290_vm3, %v815_v60 }
  0xb1   : > { %2804 = vmatmul.mubr.msk.bf16.gmra.mxu0 %vm290_vm3, %v1041_v57  ;;  %2773 = vmatprep.mubr.msk.bf16.mxu1 %vm3028_vm1, %v3027_v1 }
  0xb2   : > { %2807 = vmatprep.mubr.msk.bf16.mxu0 %vm3028_vm1, %v3027_v1 }
  0xb8   : > { %2774 = vmatmul.mubr.msk.bf16.gmra.mxu1 %vm290_vm3, %v817_v8 }
  0xb9   : > { %2808 = vmatmul.mubr.msk.bf16.gmra.mxu0 %vm290_vm3, %v1050_v2  ;;  %2777 = vmatprep.mubr.msk.bf16.mxu1 %vm3028_vm1, %v3027_v1  ;;  %v1240_v2 = vrot.slane %v3367_v41, 2  ;;  %v1481_v41 = vrot.slane %v3529_v9, 2 }
  0xba   : > { %2811 = vmatprep.mubr.msk.bf16.mxu0 %vm3028_vm1, %v3027_v1 }
  0xbb   : > { %v1243_v24 = vsel %vm1228_vm5, %v1240_v2, %v1242_v45 }
  0xc0   : > { %2778 = vmatmul.mubr.msk.bf16.gmra.mxu1 %vm290_vm3, %v819_v20 }
  0xc1   : > { %2812 = vmatmul.mubr.msk.bf16.gmra.mxu0 %vm290_vm3, %v1059_v18  ;;  %2821 = vmatprep.mubr.msk.bf16.mxu1 %vm3028_vm1, %v3027_v1 }
  0xc2   : > { %2815 = vmatprep.mubr.msk.bf16.mxu0 %vm3028_vm1, %v3027_v1 }
  0xc8   : > { %2822 = vmatmul.mubr.msk.bf16.vlgmr.msra.gmra.mxu1 %vm290_vm3, %v3219_v29  ;;  %v1473_v29 = vrot.slane %v3457_v34, 2 }
  0xc9   : > { %2816 = vmatmul.mubr.msk.bf16.gmra.mxu0 %vm290_vm3, %v1068_v23  ;;  %2896 = vmatpush3.bf16.msra.mxu1 %v1766_v27 }
  0xca   : > { %2859 = vmatprep.mubr.msk.bf16.mxu0 %vm3028_vm1, %v3027_v1  ;;  %2825 = vmatprep.mubr.msk.bf16.mxu1 %vm3028_vm1, %v3027_v1  ;;  %v1474_v35 = vsel %vm1228_vm5, %v1471_v28, %v1473_v29  ;;  %v1476_v47 = vsel %vm1228_vm5, %v1473_v29, %v1475_v32 }
  0xd0   : > { %2826 = vmatmul.mubr.msk.bf16.gmra.mxu1 %vm290_vm3, %v3228_v33 }
  0xd1   : > { %2860 = vmatmul.mubr.msk.bf16.vlgmr.msra.gmra.mxu0 %vm290_vm3, %v1472_v31  ;;  %2829 = vmatprep.mubr.msk.bf16.mxu1 %vm3028_vm1, %v3027_v1 }
  0xd2   : > { %2934 = vmatpush3.bf16.msra.mxu0 %v1945_v13  ;;  %2863 = vmatprep.mubr.msk.bf16.mxu0 %vm3028_vm1, %v3027_v1  ;;  %v1244_v13 = vrot.slane %v3395_v61, 2 }
  0xd8   : > { %v3478_v40 = vpop.f32.mrf.mxu1  ;;  %2830 = vmatmul.mubr.msk.bf16.gmra.mxu1 %vm290_vm3, %v3248_v39  ;;  %v1477_v39 = vrot.slane %v3488_v48, 2 }
  0xd9   : > { %v3472_v37 = vpop.f32.mrf.mxu0  ;;  %2864 = vmatmul.mubr.msk.bf16.gmra.mxu0 %vm290_vm3, %v1474_v35  ;;  %2833 = vmatprep.mubr.msk.bf16.mxu1 %vm3028_vm1, %v3027_v1 }
  0xda   : > { %2867 = vmatprep.mubr.msk.bf16.mxu0 %vm3028_vm1, %v3027_v1  ;;  %v2653_v42 = vpop.f32.mrf.mxu1  ;;  %v1478_v57 = vsel %vm1228_vm5, %v1475_v32, %v1477_v39  ;;  %v1484_v32 = vsel %vm1228_vm5, %v1481_v41, %v1483_v54 }
  0xdb   : > { %v2633_v33 = vpop.f32.mrf.mxu0 }
  0xdc   : > { %v3490_v50 = vpop.f32.mrf.mxu1  ;;  %v3572_v33 = vld [vmem:[%s3070_s16 + $0x50] sm:$0xff]  }
  0xdd   : > { %v3484_v44 = vpop.f32.mrf.mxu0  ;;  %v1485_v61 = vrot.slane %v3572_v33, 2 }
  0xde   : > { %v2654_v51 = vpop.f32.mrf.mxu1 }
  0xdf   : > { %v2634_v11 = vpop.f32.mrf.mxu0  ;;  %v1245_v51 = vsel %vm1228_vm5, %v1242_v45, %v1244_v13 }
  0xe0   : > { %v3498_v55 = vpop.f32.mrf.mxu1  ;;  %2834 = vmatmul.mubr.msk.bf16.gmra.mxu1 %vm290_vm3, %v3264_v43  ;;  %v1479_v43 = vrot.slane %v3508_v58, 2 }
  0xe1   : > { %v3492_v52 = vpop.f32.mrf.mxu0  ;;  %2868 = vmatmul.mubr.msk.bf16.gmra.mxu0 %vm290_vm3, %v1476_v47  ;;  %2837 = vmatprep.mubr.msk.bf16.mxu1 %vm3028_vm1, %v3027_v1 }
  0xe2   : > { %2871 = vmatprep.mubr.msk.bf16.mxu0 %vm3028_vm1, %v3027_v1  ;;  %v2657_v56 = vpop.f32.mrf.mxu1  ;;  %v1480_v8 = vsel %vm1228_vm5, %v1477_v39, %v1479_v43  ;;  %v1482_v20 = vsel %vm1228_vm5, %v1479_v43, %v1481_v41  ;;  %v1246_v43 = vrot.slane %v3408_v7, 2 }
  0xe3   : > { %v2637_v14 = vpop.f32.mrf.mxu0 }
  0xe4   : > { %v3510_v59 = vpop.f32.mrf.mxu1  ;;  %v1247_v7 = vsel %vm1228_vm5, %v1244_v13, %v1246_v43 }
  0xe5   : > { %v3504_v49 = vpop.f32.mrf.mxu0 }
  0xe6   : > { %v2658_v62 = vpop.f32.mrf.mxu1 }
  0xe7   : > { %v2638_v60 = vpop.f32.mrf.mxu0 }
  0xe8   : > { %v3518_v63 = vpop.f32.mrf.mxu1  ;;  %2838 = vmatmul.mubr.msk.bf16.gmra.mxu1 %vm290_vm3, %v3282_v10  ;;  %v1241_v10 = vsel %vm1228_vm5, %v1238_v46, %v1240_v2  ;;  %v1653_v60 = vshll.u32 %v3437_v25, 16  ;;  %v1661_v2 = vshll.u32 %v3440_v26, 16 }
  0xe9   : > { %v3512_v38 = vpop.f32.mrf.mxu0  ;;  %2872 = vmatmul.mubr.msk.bf16.gmra.mxu0 %vm290_vm3, %v1478_v57  ;;  %2841 = vmatprep.mubr.msk.bf16.mxu1 %vm3028_vm1, %v3027_v1 }
  0xea   : > { %2875 = vmatprep.mubr.msk.bf16.mxu0 %vm3028_vm1, %v3027_v1  ;;  %v2661_v3 = vpop.f32.mrf.mxu1 }
  0xeb   : > { %v2641_v0 = vpop.f32.mrf.mxu0 }
  0xec   : > { %v3531_v12 = vpop.f32.mrf.mxu1  ;;  %v1658_v0 = vshrl.u32 %v3440_v26, 16 }
  0xed   : > { %v3525_v53 = vpop.f32.mrf.mxu0 }
  0xee   : > { %v2662_v16 = vpop.f32.mrf.mxu1 }
  0xef   : > { %v2642_v15 = vpop.f32.mrf.mxu0  ;;  %v3016_v16 = vld [vmem:[%s3070_s16 + $0x58] ss:$0 sps:$4 sm:$0x33]  }
  0xf0   : > { %v3542_v18 = vpop.f32.mrf.mxu1  ;;  %2842 = vmatmul.mubr.msk.bf16.gmra.mxu1 %vm290_vm3, %v1241_v10  ;;  %v1486_v10 = vsel %vm1228_vm5, %v1483_v54, %v1485_v61  ;;  %v1487_v54 = vrot.slane %v3016_v16, 2  ;;  %v1676_v16 = vshrl.u32 %v3470_v36, 16 }
  0xf1   : > { %v3536_v17 = vpop.f32.mrf.mxu0  ;;  %2876 = vmatmul.mubr.msk.bf16.gmra.mxu0 %vm290_vm3, %v1480_v8  ;;  %2845 = vmatprep.mubr.msk.bf16.mxu1 %vm3028_vm1, %v3027_v1 }
  0xf2   : > { %2879 = vmatprep.mubr.msk.bf16.mxu0 %vm3028_vm1, %v3027_v1  ;;  %v2665_v46 = vpop.f32.mrf.mxu1 }
  0xf3   : > { %v2645_v4 = vpop.f32.mrf.mxu0  ;;  %v1660_v46 = vrot.slane %v1658_v0, 2 }
  0xf4   : > { %v3554_v21 = vpop.f32.mrf.mxu1 }
  0xf5   : > { %v3548_v19 = vpop.f32.mrf.mxu0 }
  0xf6   : > { %v2666_v27 = vpop.f32.mrf.mxu1 }
  0xf7   : > { %v2646_v23 = vpop.f32.mrf.mxu0 }
  0xf8   : > { %v482_v28 = vpop.f32.mrf.mxu1  ;;  %2846 = vmatmul.mubr.msk.bf16.gmra.mxu1 %vm290_vm3, %v1243_v24 }
  0xf9   : > { %v3557_v6 = vpop.f32.mrf.mxu0  ;;  %2880 = vmatmul.mubr.msk.bf16.gmra.mxu0 %vm290_vm3, %v1482_v20  ;;  %v483_v31 = vadd.f32 %v482_v28, %v3472_v37  ;;  %2849 = vmatprep.mubr.msk.bf16.mxu1 %vm3028_vm1, %v3027_v1  ;;  %v1663_v20 = vrot.slane %v1661_v2, 3 }
  0xfa   : > { %2883 = vmatprep.mubr.msk.bf16.mxu0 %vm3028_vm1, %v3027_v1  ;;  %v2671_v29 = vpop.f32.mrf.mxu1 }
  0xfb   : > { %v2649_v30 = vpop.f32.mrf.mxu0  ;;  %v1664_v29 = vor.u32 %v1663_v20, %v1660_v46  ;;  %v1678_v20 = vrot.slane %v1676_v16, 2 }
  0xfc   : > { %v485_v42 = vpop.f32.mrf.mxu1 }
  0xfd   : > { %v3568_v35 = vpop.f32.mrf.mxu0  ;;  %v486_v11 = vadd.f32 %v485_v42, %v3484_v44  ;;  %v1650_v44 = vshrl.u32 %v3437_v25, 16  ;;  %v1670_v42 = vshll.u32 %v3457_v34, 16 }
  0xfe   : > { %v2672_v39 = vpop.f32.mrf.mxu1 }
  0xff   : > { %v2650_v47 = vpop.f32.mrf.mxu0  ;;  %v1652_v4 = vrot.slane %v1650_v44, 2  ;;  %v1488_v39 = vsel %vm1228_vm5, %v1485_v61, %v1487_v54 }
 0x100   : > { %v490_v56 = vpop.f32.mrf.mxu1  ;;  %2850 = vmatmul.mubr.msk.bf16.gmra.mxu1 %vm290_vm3, %v1245_v51 }
 0x101   : > { %v643_v37 = vpop.f32.mrf.mxu0  ;;  %2884 = vmatmul.mubr.msk.bf16.gmra.mxu0 %vm290_vm3, %v1484_v32  ;;  %v491_v62 = vadd.f32 %v490_v56, %v3492_v52  ;;  %2853 = vmatprep.mubr.msk.bf16.mxu1 %vm3028_vm1, %v3027_v1  ;;  %v1655_v52 = vrot.slane %v1653_v60, 3  ;;  %v1667_v32 = vshrl.u32 %v3457_v34, 16 }
 0x102   : > { %v3577_v14 = vadd.f32 %v643_v37, %v483_v31  ;;  %2887 = vmatprep.mubr.msk.bf16.mxu0 %vm3028_vm1, %v3027_v1  ;;  %v2675_v3 = vpop.f32.mrf.mxu1 }
 0x103   : > { %v2709_v57 = vpop.f32.mrf.mxu0  ;;  %v1656_v31 = vor.u32 %v1655_v52, %v1652_v4  ;;  %v1669_v60 = vrot.slane %v1667_v32, 2  ;;  %v1688_v32 = vshll.u32 %v3488_v48, 16 }
 0x104   : > { %v493_v41 = vpop.f32.mrf.mxu1 }
 0x105   : > { %v646_v8 = vpop.f32.mrf.mxu0  ;;  %v494_v45 = vadd.f32 %v493_v41, %v3504_v49  ;;  %v1891_v49 = vld [vmem:[%s3070_s16 + $0x10] sm:$0x8]  ;;  %v1665_v44 = vsel %vm1648_vm7, %v1656_v31, %v1664_v29  ;;  %v1679_v41 = vshll.u32 %v3470_v36, 16 }
 0x106   : > { %v3591_v15 = vadd.f32 %v646_v8, %v486_v11  ;;  %v2676_v23 = vpop.f32.mrf.mxu1  ;;  %v2509_v37 = vcombine.low %v1891_v49, %v3428_v22  ;;  %v1899_v22 = vrot.slane %v3440_v26, 3 }
 0x107   : > { %v2710_v25 = vpop.f32.mrf.mxu0  ;;  %v1681_v23 = vrot.slane %v1679_v41, 3 }
 0x108   : > { %v498_v28 = vpop.f32.mrf.mxu1  ;;  %2854 = vmatmul.mubr.msk.bf16.gmra.mxu1 %vm290_vm3, %v1247_v7  ;;  %v1898_v61 = vrot.slane %v2509_v37, 3 }
 0x109   : > { %v651_v24 = vpop.f32.mrf.mxu0  ;;  %2888 = vmatmul.mubr.msk.bf16.gmra.mxu0 %vm290_vm3, %v1486_v10  ;;  %v499_v13 = vadd.f32 %v498_v28, %v3512_v38  ;;  %2897 = vmatprep.mubr.msk.bf16.mxu1 %vm3028_vm1, %v3027_v1 }
 0x10a   : > { %v3598_v27 = vadd.f32 %v651_v24, %v491_v62  ;;  %2891 = vmatprep.mubr.msk.bf16.mxu0 %vm3028_vm1, %v3027_v1  ;;  %v2679_v47 = vpop.f32.mrf.mxu1  ;;  %v1672_v62 = vrot.slane %v1670_v42, 3  ;;  %v1900_v26 = vsel %vm1897_vm8, %v1898_v61, %v1899_v22 }
 0x10b   : > { %v2713_v30 = vpop.f32.mrf.mxu0 }
 0x10c   : > { %v501_v56 = vpop.f32.mrf.mxu1  ;;  %v1673_v10 = vor.u32 %v1672_v62, %v1669_v60  ;;  %v1901_v30 = vrot.slane %v3457_v34, 3 }
 0x10d   : > { %v654_v11 = vpop.f32.mrf.mxu0  ;;  %v502_v38 = vadd.f32 %v501_v56, %v3525_v53 }
 0x10e   : > { %v3609_v51 = vadd.f32 %v654_v11, %v494_v45  ;;  %v2680_v43 = vpop.f32.mrf.mxu1  ;;  %v1902_v34 = vsel %vm1897_vm8, %v1899_v22, %v1901_v30  ;;  %v1694_v22 = vshrl.u32 %v3508_v58, 16 }
 0x10f   : > { %v2714_v57 = vpop.f32.mrf.mxu0  ;;  %v1903_v43 = vrot.slane %v3470_v36, 3 }
 0x110   : > { %v506_v3 = vpop.f32.mrf.mxu1  ;;  %2898 = vmatmul.mubr.msk.bf16.vlgmr.msra.gmra.mxu1 %vm290_vm3, %v1665_v44 }
 0x111   : > { %v659_v0 = vpop.f32.mrf.mxu0  ;;  %2892 = vmatmul.mubr.msk.bf16.gmra.mxu0 %vm290_vm3, %v1488_v39  ;;  %v507_v8 = vadd.f32 %v506_v3, %v3536_v17  ;;  %2901 = vmatprep.mubr.msk.bf16.mxu1 %vm3028_vm1, %v3027_v1  ;;  %v1674_v17 = vsel %vm1648_vm7, %v1664_v29, %v1673_v10  ;;  %v1685_v29 = vshrl.u32 %v3488_v48, 16  ;;  %v1697_v3 = vshll.u32 %v3508_v58, 16 }
 0x112   : > { %v3616_v2 = vadd.f32 %v659_v0, %v499_v13  ;;  %2935 = vmatprep.mubr.msk.bf16.mxu0 %vm3028_vm1, %v3027_v1  ;;  %v2683_v25 = vpop.f32.mrf.mxu1  ;;  %v1682_v13 = vor.u32 %v1681_v23, %v1678_v20  ;;  %v1904_v16 = vsel %vm1897_vm8, %v1901_v30, %v1903_v43  ;;  %v1905_v20 = vrot.slane %v3488_v48, 3 }
 0x113   : > { %v2717_v53 = vpop.f32.mrf.mxu0  ;;  %v1687_v57 = vrot.slane %v1685_v29, 2  ;;  %v1703_v30 = vshrl.u32 %v3529_v9, 16 }
 0x114   : > { %v509_v45 = vpop.f32.mrf.mxu1  ;;  %v1906_v48 = vsel %vm1897_vm8, %v1903_v43, %v1905_v20  ;;  %v1715_v43 = vshll.u32 %v3552_v5, 16 }
 0x115   : > { %v662_v4 = vpop.f32.mrf.mxu0  ;;  %v510_v46 = vadd.f32 %v509_v45, %v3548_v19  ;;  %v1699_v45 = vrot.slane %v1697_v3, 3 }
 0x116   : > { %v3627_v52 = vadd.f32 %v662_v4, %v502_v38  ;;  %v2684_v24 = vpop.f32.mrf.mxu1  ;;  %v1690_v38 = vrot.slane %v1688_v32, 3 }
 0x117   : > { %v2718_v7 = vpop.f32.mrf.mxu0 }
 0x118   : > { %v514_v31 = vpop.f32.mrf.mxu1  ;;  %2902 = vmatmul.mubr.msk.bf16.gmra.mxu1 %vm290_vm3, %v1674_v17 }
 0x119   : > { %v667_v54 = vpop.f32.mrf.mxu0  ;;  %2936 = vmatmul.mubr.msk.bf16.vlgmr.msra.gmra.mxu0 %vm290_vm3, %v1900_v26  ;;  %v515_v19 = vadd.f32 %v514_v31, %v3557_v6  ;;  %2905 = vmatprep.mubr.msk.bf16.mxu1 %vm3028_vm1, %v3027_v1  ;;  %v1683_v6 = vsel %vm1648_vm7, %v1673_v10, %v1682_v13  ;;  %v1696_v26 = vrot.slane %v1694_v22, 2  ;;  %v1706_v31 = vshll.u32 %v3529_v9, 16 }
 0x11a   : > { %v3633_v28 = vadd.f32 %v667_v54, %v507_v8  ;;  %2939 = vmatprep.mubr.msk.bf16.mxu0 %vm3028_vm1, %v3027_v1  ;;  %v2687_v42 = vpop.f32.mrf.mxu1 }
 0x11b   : > { %v2721_v49 = vpop.f32.mrf.mxu0  ;;  %v1700_v54 = vor.u32 %v1699_v45, %v1696_v26 }
 0x11c   : > { %v517_v39 = vpop.f32.mrf.mxu1 }
 0x11d   : > { %v670_v47 = vpop.f32.mrf.mxu0  ;;  %v518_v56 = vadd.f32 %v517_v39, %v3568_v35  ;;  %v1691_v35 = vor.u32 %v1690_v38, %v1687_v57 }
 0x11e   : > { %v3644_v11 = vadd.f32 %v670_v47, %v510_v46  ;;  %v2688_v44 = vpop.f32.mrf.mxu1  ;;  %v1705_v47 = vrot.slane %v1703_v30, 2 }
 0x11f   : > { %v2722_v37 = vpop.f32.mrf.mxu0  ;;  %v1692_v4 = vsel %vm1648_vm7, %v1682_v13, %v1691_v35 }
 0x120   : > { %v522_v0 = vpop.f32.mrf.mxu1  ;;  %2906 = vmatmul.mubr.msk.bf16.gmra.mxu1 %vm290_vm3, %v1683_v6  ;;  %v1907_v6 = vrot.slane %v3508_v58, 3 }
 0x121   : > { %v675_v60 = vpop.f32.mrf.mxu0  ;;  %2940 = vmatmul.mubr.msk.bf16.gmra.mxu0 %vm290_vm3, %v1902_v34  ;;  %2909 = vmatprep.mubr.msk.bf16.mxu1 %vm3028_vm1, %v3027_v1  ;;  %v523_v25 = vadd.f32 %v522_v0, %v3478_v40  ;;  %v1708_v34 = vrot.slane %v1706_v31, 3 }
 0x122   : > { %v3650_v62 = vadd.f32 %v675_v60, %v515_v19  ;;  %2943 = vmatprep.mubr.msk.bf16.mxu0 %vm3028_vm1, %v3027_v1  ;;  %v2691_v53 = vpop.f32.mrf.mxu1  ;;  %v1712_v60 = vshrl.u32 %v3552_v5, 16  ;;  %v1908_v58 = vsel %vm1897_vm8, %v1905_v20, %v1907_v6 }
 0x123   : > { %v2725_v61 = vpop.f32.mrf.mxu0  ;;  %v1709_v44 = vor.u32 %v1708_v34, %v1705_v47 }
 0x124   : > { %v525_v41 = vpop.f32.mrf.mxu1 }
 0x125   : > { %v678_v8 = vpop.f32.mrf.mxu0  ;;  %v526_v40 = vadd.f32 %v525_v41, %v3490_v50  ;;  %v1701_v50 = vsel %vm1648_vm7, %v1691_v35, %v1700_v54 }
 0x126   : > { %v3660_v10 = vadd.f32 %v678_v8, %v518_v56  ;;  %v2692_v7 = vpop.f32.mrf.mxu1  ;;  %v1714_v8 = vrot.slane %v1712_v60, 2 }
 0x127   : > { %v2726_v36 = vpop.f32.mrf.mxu0  ;;  %v1724_v7 = vshll.u32 %v3572_v33, 16 }
 0x128   : > { %v530_v23 = vpop.f32.mrf.mxu1  ;;  %2910 = vmatmul.mubr.msk.bf16.gmra.mxu1 %vm290_vm3, %v1692_v4  ;;  %v1909_v4 = vrot.slane %v3529_v9, 3 }
 0x129   : > { %v683_v46 = vpop.f32.mrf.mxu0  ;;  %2944 = vmatmul.mubr.msk.bf16.gmra.mxu0 %vm290_vm3, %v1904_v16  ;;  %2913 = vmatprep.mubr.msk.bf16.mxu1 %vm3028_vm1, %v3027_v1  ;;  %v531_v42 = vadd.f32 %v530_v23, %v3498_v55  ;;  %v1717_v16 = vrot.slane %v1715_v43, 3 }
 0x12a   : > { %v3666_v17 = vadd.f32 %v683_v46, %v523_v25  ;;  %2947 = vmatprep.mubr.msk.bf16.mxu0 %vm3028_vm1, %v3027_v1  ;;  %v2695_v49 = vpop.f32.mrf.mxu1  ;;  %v1910_v9 = vsel %vm1897_vm8, %v1907_v6, %v1909_v4 }
 0x12b   : > { %v2729_v24 = vpop.f32.mrf.mxu0  ;;  %v1718_v20 = vor.u32 %v1717_v16, %v1714_v8  ;;  %v1726_v49 = vrot.slane %v1724_v7, 3 }
 0x12c   : > { %v533_v29 = vpop.f32.mrf.mxu1 }
 0x12d   : > { %v686_v19 = vpop.f32.mrf.mxu0  ;;  %v534_v55 = vadd.f32 %v533_v29, %v3510_v59  ;;  %v1710_v59 = vsel %vm1648_vm7, %v1700_v54, %v1709_v44  ;;  %v3018_v29 = vld [vmem:[%s3070_s16 + $0x58] ss:$0 sps:$4 sm:$0x77]  }
 0x12e   : > { %v3677_v13 = vadd.f32 %v686_v19, %v526_v40  ;;  %v2696_v39 = vpop.f32.mrf.mxu1  ;;  %v1730_v6 = vshrl.u32 %v3018_v29, 16 }
 0x12f   : > { %v2730_v32 = vpop.f32.mrf.mxu0 }
 0x130   : > { %v538_v57 = vpop.f32.mrf.mxu1  ;;  %2914 = vmatmul.mubr.msk.bf16.gmra.mxu1 %vm290_vm3, %v1701_v50  ;;  %v1911_v50 = vrot.slane %v3552_v5, 3 }
 0x131   : > { %v691_v37 = vpop.f32.mrf.mxu0  ;;  %2948 = vmatmul.mubr.msk.bf16.gmra.mxu0 %vm290_vm3, %v1906_v48  ;;  %2917 = vmatprep.mubr.msk.bf16.mxu1 %vm3028_vm1, %v3027_v1  ;;  %v539_v53 = vadd.f32 %v538_v57, %v3518_v63  ;;  %v1721_v63 = vshrl.u32 %v3572_v33, 16  ;;  %v1719_v48 = vsel %vm1648_vm7, %v1709_v44, %v1718_v20  ;;  %v1733_v57 = vshll.u32 %v3018_v29, 16 }
 0x132   : > { %v3683_v56 = vadd.f32 %v691_v37, %v531_v42  ;;  %2951 = vmatprep.mubr.msk.bf16.mxu0 %vm3028_vm1, %v3027_v1  ;;  %v2699_v0 = vpop.f32.mrf.mxu1  ;;  %v1912_v5 = vsel %vm1897_vm8, %v1909_v4, %v1911_v50 }
 0x133   : > { %v2733_v38 = vpop.f32.mrf.mxu0  ;;  %v1723_v31 = vrot.slane %v1721_v63, 2 }
 0x134   : > { %v541_v22 = vpop.f32.mrf.mxu1 }
 0x135   : > { %v694_v61 = vpop.f32.mrf.mxu0  ;;  %v542_v46 = vadd.f32 %v541_v22, %v3531_v12  ;;  %v1727_v39 = vor.u32 %v1726_v49, %v1723_v31 }
 0x136   : > { %v3694_v35 = vadd.f32 %v694_v61, %v534_v55  ;;  %v2700_v41 = vpop.f32.mrf.mxu1 }
 0x137   : > { %v2734_v3 = vpop.f32.mrf.mxu0  ;;  %v1728_v61 = vsel %vm1648_vm7, %v1718_v20, %v1727_v39 }
 0x138   : > { %v546_v26 = vpop.f32.mrf.mxu1  ;;  %2918 = vmatmul.mubr.msk.bf16.gmra.mxu1 %vm290_vm3, %v1710_v59 }
 0x139   : > { %v699_v36 = vpop.f32.mrf.mxu0  ;;  %2952 = vmatmul.mubr.msk.bf16.gmra.mxu0 %vm290_vm3, %v1908_v58  ;;  %2921 = vmatprep.mubr.msk.bf16.mxu1 %vm3028_vm1, %v3027_v1  ;;  %v547_v19 = vadd.f32 %v546_v26, %v3542_v18  ;;  %v1735_v58 = vrot.slane %v1733_v57, 3 }
 0x13a   : > { %v3700_v25 = vadd.f32 %v699_v36, %v539_v53  ;;  %2955 = vmatprep.mubr.msk.bf16.mxu0 %vm3028_vm1, %v3027_v1  ;;  %v2703_v23 = vpop.f32.mrf.mxu1  ;;  %v1913_v53 = vrot.slane %v3572_v33, 3 }
 0x13b   : > { %v2737_v45 = vpop.f32.mrf.mxu0  ;;  %v1915_v23 = vrot.slane %v3018_v29, 3 }
 0x13c   : > { %v549_v54 = vpop.f32.mrf.mxu1  ;;  %v1914_v26 = vsel %vm1897_vm8, %v1911_v50, %v1913_v53 }
 0x13d   : > { %v702_v24 = vpop.f32.mrf.mxu0  ;;  %v550_v18 = vadd.f32 %v549_v54, %v3554_v21  ;;  %v1732_v21 = vrot.slane %v1730_v6, 2  ;;  %v1916_v49 = vsel %vm1897_vm8, %v1913_v53, %v1915_v23 }
 0x13e   : > { %v3711_v40 = vadd.f32 %v702_v24, %v542_v46  ;;  %v2704_v12 = vpop.f32.mrf.mxu1 }
 0x13f   : > { %v2738_v30 = vpop.f32.mrf.mxu0  ;;  %v1736_v16 = vor.u32 %v1735_v58, %v1732_v21 }
 0x140   : > { %v884_v47 = vpop.f32.mrf.mxu1  ;;  %2922 = vmatmul.mubr.msk.bf16.gmra.mxu1 %vm290_vm3, %v1719_v48 }
 0x141   : > { %v707_v32 = vpop.f32.mrf.mxu0  ;;  %2956 = vmatmul.mubr.msk.bf16.gmra.mxu0 %vm290_vm3, %v1910_v9  ;;  %v955_v37 = vadd.f32 %v884_v47, %v3577_v14  ;;  %2925 = vmatprep.mubr.msk.bf16.mxu1 %vm3028_vm1, %v3027_v1  ;;  %v1737_v7 = vsel %vm1648_vm7, %v1727_v39, %v1736_v16 }
 0x142   : > { %v3718_v42 = vadd.f32 %v707_v32, %v547_v19  ;;  %2959 = vmatprep.mubr.msk.bf16.mxu0 %vm3028_vm1, %v3027_v1  ;;  %v2747_v38 = vpop.f32.mrf.mxu1 }
 0x143   : > { %v2741_v34 = vpop.f32.mrf.mxu0 }
 0x144   : > { %v887_v60 = vpop.f32.mrf.mxu1 }
 0x145   : > { %v710_v55 = vpop.f32.mrf.mxu0  ;;  %v956_v0 = vadd.f32 %v887_v60, %v3591_v15 }
 0x146   : > { %v3728_v44 = vadd.f32 %v710_v55, %v550_v18  ;;  %v2748_v14 = vpop.f32.mrf.mxu1 }
 0x147   : > { %v2742_v43 = vpop.f32.mrf.mxu0 }
 0x148   : > { %v892_v59 = vpop.f32.mrf.mxu1  ;;  %2926 = vmatmul.mubr.msk.bf16.gmra.mxu1 %vm290_vm3, %v1728_v61 }
 0x149   : > { %v1133_v22 = vpop.f32.mrf.mxu0  ;;  %2960 = vmatmul.mubr.msk.bf16.gmra.mxu0 %vm290_vm3, %v1912_v5  ;;  %v957_v15 = vadd.f32 %v892_v59, %v3598_v27  ;;  %2929 = vmatprep.mubr.msk.bf16.mxu1 %vm3028_vm1, %v3027_v1 }
 0x14a   : > { %v3734_v3 = vadd.f32 %v1133_v22, %v955_v37  ;;  %2963 = vmatprep.mubr.msk.bf16.mxu0 %vm3028_vm1, %v3027_v1  ;;  %v2751_v41 = vpop.f32.mrf.mxu1 }
 0x14b   : > { %v2785_v8 = vpop.f32.mrf.mxu0 }
 0x14c   : > { %v895_v45 = vpop.f32.mrf.mxu1 }
 0x14d   : > { %v1136_v36 = vpop.f32.mrf.mxu0  ;;  %v958_v33 = vadd.f32 %v895_v45, %v3609_v51 }
 0x14e   : > { %v3743_v4 = vadd.f32 %v1136_v36, %v956_v0  ;;  %v2752_v46 = vpop.f32.mrf.mxu1 }
 0x14f   : > { %v2786_v63 = vpop.f32.mrf.mxu0 }
 0x150   : > { %v900_v24 = vpop.f32.mrf.mxu1  ;;  %2930 = vmatmul.mubr.msk.bf16.gmra.mxu1 %vm290_vm3, %v1737_v7 }
 0x151   : > { %v1141_v20 = vpop.f32.mrf.mxu0  ;;  %2964 = vmatmul.mubr.msk.bf16.gmra.mxu0 %vm290_vm3, %v1914_v26  ;;  %v959_v54 = vadd.f32 %v900_v24, %v3616_v2 }
 0x152   : > { %v3749_v27 = vadd.f32 %v1141_v20, %v957_v15  ;;  %2967 = vmatprep.mubr.msk.bf16.mxu0 %vm3028_vm1, %v3027_v1  ;;  %v2755_v30 = vpop.f32.mrf.mxu1 }
 0x153   : > { %v2789_v9 = vpop.f32.mrf.mxu0 }
 0x154   : > { %v903_v19 = vpop.f32.mrf.mxu1 }
 0x155   : > { %v1144_v51 = vpop.f32.mrf.mxu0  ;;  %v960_v12 = vadd.f32 %v903_v19, %v3627_v52 }
 0x156   : > { %v3755_v31 = vadd.f32 %v1144_v51, %v958_v33  ;;  %v2756_v32 = vpop.f32.mrf.mxu1 }
 0x157   : > { %v2790_v48 = vpop.f32.mrf.mxu0 }
 0x158   : > { %v908_v47 = vpop.f32.mrf.mxu1 }
 0x159   : > { %v1149_v50 = vpop.f32.mrf.mxu0  ;;  %2968 = vmatmul.mubr.msk.bf16.gmra.mxu0 %vm290_vm3, %v1916_v49  ;;  %v961_v2 = vadd.f32 %v908_v47, %v3633_v28 }
 0x15a   : > { %v3760_v29 = vadd.f32 %v1149_v50, %v959_v54  ;;  %v2759_v39 = vpop.f32.mrf.mxu1 }
 0x15b   : > { %v2793_v34 = vpop.f32.mrf.mxu0 }
 0x15c   : > { %v911_v6 = vpop.f32.mrf.mxu1 }
 0x15d   : > { %v1152_v18 = vpop.f32.mrf.mxu0  ;;  %v962_v38 = vadd.f32 %v911_v6, %v3644_v11 }
 0x15e   : > { %v3763_v37 = vadd.f32 %v1152_v18, %v960_v12  ;;  %v2760_v55 = vpop.f32.mrf.mxu1 }
 0x15f   : > { %v2794_v57 = vpop.f32.mrf.mxu0 }
 0x160   : > { %v916_v60 = vpop.f32.mrf.mxu1 }
 0x161   : > { %v1157_v52 = vpop.f32.mrf.mxu0  ;;  %v963_v0 = vadd.f32 %v916_v60, %v3650_v62 }
 0x162   : > { %v3766_v5 = vadd.f32 %v1157_v52, %v961_v2  ;;  %v2763_v61 = vpop.f32.mrf.mxu1 }
 0x163   : > { %v2797_v43 = vpop.f32.mrf.mxu0 }
 0x164   : > { %v919_v28 = vpop.f32.mrf.mxu1 }
 0x165   : > { %v1160_v21 = vpop.f32.mrf.mxu0  ;;  %v964_v22 = vadd.f32 %v919_v28, %v3660_v10 }
 0x166   : > { %v3769_v58 = vadd.f32 %v1160_v21, %v962_v38  ;;  %v2764_v53 = vpop.f32.mrf.mxu1 }
 0x167   : > { %v2798_v14 = vpop.f32.mrf.mxu0 }
 0x168   : > { %v924_v11 = vpop.f32.mrf.mxu1 }
 0x169   : > { %v1165_v59 = vpop.f32.mrf.mxu0  ;;  %v965_v16 = vadd.f32 %v924_v11, %v3666_v17 }
 0x16a   : > { %v3772_v8 = vadd.f32 %v1165_v59, %v963_v0  ;;  %v2767_v41 = vpop.f32.mrf.mxu1 }
 0x16b   : > { %v2801_v15 = vpop.f32.mrf.mxu0 }
 0x16c   : > { %v927_v62 = vpop.f32.mrf.mxu1 }
 0x16d   : > { %v1168_v36 = vpop.f32.mrf.mxu0  ;;  %v966_v63 = vadd.f32 %v927_v62, %v3677_v13 }
 0x16e   : > { %v3775_v26 = vadd.f32 %v1168_v36, %v964_v22  ;;  %v2768_v33 = vpop.f32.mrf.mxu1 }
 0x16f   : > { %v2802_v45 = vpop.f32.mrf.mxu0 }
 0x170   : > { %v932_v10 = vpop.f32.mrf.mxu1 }
 0x171   : > { %v1173_v7 = vpop.f32.mrf.mxu0  ;;  %v967_v23 = vadd.f32 %v932_v10, %v3683_v56 }
 0x172   : > { %v3778_v46 = vadd.f32 %v1173_v7, %v965_v16  ;;  %v2771_v24 = vpop.f32.mrf.mxu1 }
 0x173   : > { %v2805_v20 = vpop.f32.mrf.mxu0 }
 0x174   : > { %v935_v17 = vpop.f32.mrf.mxu1 }
 0x175   : > { %v1176_v9 = vpop.f32.mrf.mxu0  ;;  %v968_v51 = vadd.f32 %v935_v17, %v3694_v35 }
 0x176   : > { %v3781_v54 = vadd.f32 %v1176_v9, %v966_v63  ;;  %v2772_v49 = vpop.f32.mrf.mxu1 }
 0x177   : > { %v2806_v30 = vpop.f32.mrf.mxu0 }
 0x178   : > { %v940_v13 = vpop.f32.mrf.mxu1 }
 0x179   : > { %v1181_v19 = vpop.f32.mrf.mxu0  ;;  %v969_v32 = vadd.f32 %v940_v13, %v3700_v25 }
 0x17a   : > { %v3784_v48 = vadd.f32 %v1181_v19, %v967_v23  ;;  %v2775_v50 = vpop.f32.mrf.mxu1 }
 0x17b   : > { %v2809_v12 = vpop.f32.mrf.mxu0 }
 0x17c   : > { %v943_v56 = vpop.f32.mrf.mxu1 }
 0x17d   : > { %v1184_v47 = vpop.f32.mrf.mxu0  ;;  %v970_v39 = vadd.f32 %v943_v56, %v3711_v40 }
 0x17e   : > { %v3787_v34 = vadd.f32 %v1184_v47, %v968_v51  ;;  %v2776_v18 = vpop.f32.mrf.mxu1 }
 0x17f   : > { %v2810_v2 = vpop.f32.mrf.mxu0 }
 0x180   : > { %v948_v35 = vpop.f32.mrf.mxu1 }
 0x181   : > { %v1189_v6 = vpop.f32.mrf.mxu0  ;;  %v971_v55 = vadd.f32 %v948_v35, %v3718_v42 }
 0x182   : > { %v3790_v57 = vadd.f32 %v1189_v6, %v969_v32  ;;  %v2779_v52 = vpop.f32.mrf.mxu1 }
 0x183   : > { %v2813_v38 = vpop.f32.mrf.mxu0 }
 0x184   : > { %v951_v25 = vpop.f32.mrf.mxu1 }
 0x185   : > { %v1192_v60 = vpop.f32.mrf.mxu0  ;;  %v972_v61 = vadd.f32 %v951_v25, %v3728_v44 }
 0x186   : > { %v3793_v43 = vadd.f32 %v1192_v60, %v970_v39  ;;  %v2780_v21 = vpop.f32.mrf.mxu1 }
 0x187   : > { %v2814_v0 = vpop.f32.mrf.mxu0 }
 0x188   : > { %v1312_v40 = vpop.f32.mrf.mxu1 }
 0x189   : > { %v1197_v28 = vpop.f32.mrf.mxu0  ;;  %v1383_v53 = vadd.f32 %v1312_v40, %v3734_v3 }
 0x18a   : > { %v3796_v14 = vadd.f32 %v1197_v28, %v971_v55  ;;  %v2823_v59 = vpop.f32.mrf.mxu1 }
 0x18b   : > { %v2817_v22 = vpop.f32.mrf.mxu0 }
 0x18c   : > { %v1315_v42 = vpop.f32.mrf.mxu1 }
 0x18d   : > { %v1200_v11 = vpop.f32.mrf.mxu0  ;;  %v1384_v41 = vadd.f32 %v1315_v42, %v3743_v4 }
 0x18e   : > { %v3799_v15 = vadd.f32 %v1200_v11, %v972_v61  ;;  %v2824_v36 = vpop.f32.mrf.mxu1 }
 0x18f   : > { %v2818_v16 = vpop.f32.mrf.mxu0 }
 0x190   : > { %v1320_v44 = vpop.f32.mrf.mxu1 }
 0x191   : > { %v1553_v62 = vpop.f32.mrf.mxu0  ;;  %v1385_v33 = vadd.f32 %v1320_v44, %v3749_v27 }
 0x192   : > { %v3802_v45 = vadd.f32 %v1553_v62, %v1383_v53  ;;  %v2827_v7 = vpop.f32.mrf.mxu1 }
 0x193   : > { %v2861_v63 = vpop.f32.mrf.mxu0 }
 0x194   : > { %v1323_v3 = vpop.f32.mrf.mxu1 }
 0x195   : > { %v1556_v10 = vpop.f32.mrf.mxu0  ;;  %v1386_v24 = vadd.f32 %v1323_v3, %v3755_v31 }
 0x196   : > { %v3805_v20 = vadd.f32 %v1556_v10, %v1384_v41  ;;  %v2828_v9 = vpop.f32.mrf.mxu1 }
 0x197   : > { %v2862_v23 = vpop.f32.mrf.mxu0 }
 0x198   : > { %v1328_v4 = vpop.f32.mrf.mxu1 }
 0x199   : > { %v1561_v17 = vpop.f32.mrf.mxu0  ;;  %v1387_v49 = vadd.f32 %v1328_v4, %v3760_v29 }
 0x19a   : > { %v3808_v30 = vadd.f32 %v1561_v17, %v1385_v33  ;;  %v2831_v19 = vpop.f32.mrf.mxu1 }
 0x19b   : > { %v2865_v51 = vpop.f32.mrf.mxu0 }
 0x19c   : > { %v1331_v27 = vpop.f32.mrf.mxu1 }
 0x19d   : > { %v1564_v13 = vpop.f32.mrf.mxu0  ;;  %v1388_v50 = vadd.f32 %v1331_v27, %v3763_v37 }
 0x19e   : > { %v3811_v12 = vadd.f32 %v1564_v13, %v1386_v24  ;;  %v2832_v47 = vpop.f32.mrf.mxu1 }
 0x19f   : > { %v2866_v32 = vpop.f32.mrf.mxu0 }
 0x1a0   : > { %v1336_v31 = vpop.f32.mrf.mxu1 }
 0x1a1   : > { %v1569_v56 = vpop.f32.mrf.mxu0  ;;  %v1389_v18 = vadd.f32 %v1336_v31, %v3766_v5 }
 0x1a2   : > { %v3814_v2 = vadd.f32 %v1569_v56, %v1387_v49  ;;  %v2835_v6 = vpop.f32.mrf.mxu1 }
 0x1a3   : > { %v2869_v39 = vpop.f32.mrf.mxu0 }
 0x1a4   : > { %v1339_v29 = vpop.f32.mrf.mxu1 }
 0x1a5   : > { %v1572_v35 = vpop.f32.mrf.mxu0  ;;  %v1390_v52 = vadd.f32 %v1339_v29, %v3769_v58 }
 0x1a6   : > { %v3817_v38 = vadd.f32 %v1572_v35, %v1388_v50  ;;  %v2836_v60 = vpop.f32.mrf.mxu1 }
 0x1a7   : > { %v2870_v55 = vpop.f32.mrf.mxu0 }
 0x1a8   : > { %v1344_v37 = vpop.f32.mrf.mxu1 }
 0x1a9   : > { %v1577_v25 = vpop.f32.mrf.mxu0  ;;  %v1391_v21 = vadd.f32 %v1344_v37, %v3772_v8  ;;  %v2070_v8 = vlaneseq }
 0x1aa   : > { %v3820_v0 = vadd.f32 %v1577_v25, %v1389_v18  ;;  %v2839_v28 = vpop.f32.mrf.mxu1 }
 0x1ab   : > { %v2873_v61 = vpop.f32.mrf.mxu0  ;;  %v3834_v24 = vshrl.u32 %v2070_v8, 7 }
 0x1ac   : > { %v1347_v5 = vpop.f32.mrf.mxu1 }
 0x1ad   : > { %v1580_v40 = vpop.f32.mrf.mxu0  ;;  %v1392_v59 = vadd.f32 %v1347_v5, %v3775_v26  ;;  %v3846_v47 = vadd.s32 16, %v3834_v24 }
 0x1ae   : > { %v3823_v22 = vadd.f32 %v1580_v40, %v1390_v52  ;;  %v2840_v11 = vpop.f32.mrf.mxu1  ;;  %v3853_v52 = vadd.s32 24, %v3834_v24 }
 0x1af   : > { %v2874_v53 = vpop.f32.mrf.mxu0  ;;  %v2091_v55 = vcvt.s32.f32 %v3846_v47  ;;  %v3860_v11 = vadd.s32 32, %v3834_v24 }
 0x1b0   : > { %v1352_v58 = vpop.f32.mrf.mxu1  ;;  %v2092_v53 = vcvt.s32.f32 %v3853_v52  ;;  %v3913_v52 = vadd.s32 80, %v3834_v24 }
 0x1b1   : > { %v1585_v42 = vpop.f32.mrf.mxu0  ;;  %v1393_v36 = vadd.f32 %v1352_v58, %v3778_v46  ;;  %v3838_v46 = vadd.s32 8, %v3834_v24  ;;  %v2109_v5 = vadd.f32 0.5, %v2091_v55 }
 0x1b2   : > { %v3826_v16 = vadd.f32 %v1585_v42, %v1391_v21  ;;  %v2843_v62 = vpop.f32.mrf.mxu1 }
 0x1b3   : > { %v2877_v41 = vpop.f32.mrf.mxu0  ;;  %v2090_v50 = vcvt.s32.f32 %v3838_v46  ;;  %v2127_v8 = vmul.f32 0.055555556, %v2109_v5 }
 0x1b4   : > { %v1355_v33 = vpop.f32.mrf.mxu1 }
 0x1b5   : > { %v1588_v44 = vpop.f32.mrf.mxu0  ;;  %v1394_v10 = vadd.f32 %v1355_v33, %v3781_v54  ;;  %v2089_v54 = vcvt.s32.f32 %v3834_v24  ;;  %v2108_v29 = vadd.f32 0.5, %v2090_v50 }
 0x1b6   : > { %v3829_v63 = vadd.f32 %v1588_v44, %v1392_v59  ;;  %v2844_v3 = vpop.f32.mrf.mxu1 }
 0x1b7   : > { %v2878_v7 = vpop.f32.mrf.mxu0  ;;  %v2107_v6 = vadd.f32 0.5, %v2089_v54  ;;  %v2126_v40 = vmul.f32 0.055555556, %v2108_v29  ;;  %v3869_v3 = vadd.s32 40, %v3834_v24 }
 0x1b8   : > { %v1360_v9 = vpop.f32.mrf.mxu1 }
 0x1b9   : > { %v1593_v23 = vpop.f32.mrf.mxu0  ;;  %v1395_v4 = vadd.f32 %v1360_v9, %v3784_v48  ;;  %v2125_v21 = vmul.f32 0.055555556, %v2107_v6  ;;  %v2144_v44 = vfloor.f32 %v2126_v40  ;;  %v2094_v47 = vcvt.s32.f32 %v3869_v3 }
 0x1ba   : > { %v3832_v26 = vadd.f32 %v1593_v23, %v1393_v36  ;;  %v2847_v51 = vpop.f32.mrf.mxu1  ;;  %v3936_v3 = vadd.s32 96, %v3834_v24 }
 0x1bb   : > { %v2881_v17 = vpop.f32.mrf.mxu0  ;;  %v2143_v36 = vfloor.f32 %v2125_v21  ;;  %v2145_v51 = vfloor.f32 %v2127_v8 }
 0x1bc   : > { %v1363_v13 = vpop.f32.mrf.mxu1 }
 0x1bd   : > { %v1596_v49 = vpop.f32.mrf.mxu0  ;;  %v1396_v32 = vadd.f32 %v1363_v13, %v3787_v34 }
 0x1be   : > { %v3840_v19 = vadd.f32 %v1596_v49, %v1394_v10  ;;  %v2848_v56 = vpop.f32.mrf.mxu1  ;;  %v2093_v10 = vcvt.s32.f32 %v3860_v11 }
 0x1bf   : > { %v2882_v27 = vpop.f32.mrf.mxu0  ;;  %v3878_v56 = vadd.s32 48, %v3834_v24 }
 0x1c0   : > { %v1368_v39 = vpop.f32.mrf.mxu1 }
 0x1c1   : > { %v1601_v48 = vpop.f32.mrf.mxu0  ;;  %v1397_v35 = vadd.f32 %v1368_v39, %v3790_v57  ;;  %v2095_v21 = vcvt.s32.f32 %v3878_v56 }
 0x1c2   : > { %v3848_v31 = vadd.f32 %v1601_v48, %v1395_v4  ;;  %v2851_v34 = vpop.f32.mrf.mxu1  ;;  %v2161_v4 = vmul.f32 18.0, %v2143_v36 }
 0x1c3   : > { %v2885_v18 = vpop.f32.mrf.mxu0  ;;  %v2113_v8 = vadd.f32 0.5, %v2095_v21 }
 0x1c4   : > { %v1371_v37 = vpop.f32.mrf.mxu1  ;;  %v2179_v6 = vsub.f32 %v2089_v54, %v2161_v4  ;;  %v3891_v54 = vadd.s32 64, %v3834_v24 }
 0x1c5   : > { %v1604_v60 = vpop.f32.mrf.mxu0  ;;  %v1398_v28 = vadd.f32 %v1371_v37, %v3793_v43  ;;  %v2110_v43 = vadd.f32 0.5, %v2092_v53 }
 0x1c6   : > { %v3855_v25 = vadd.f32 %v1604_v60, %v1396_v32  ;;  %v2852_v57 = vpop.f32.mrf.mxu1  ;;  %v2111_v32 = vadd.f32 0.5, %v2093_v10  ;;  %vm2197_vm9 = vcmp.lt.f32.partialorder %v2179_v6, 15.5  ;;  %v2097_v4 = vcvt.s32.f32 %v3891_v54 }
 0x1c7   : > { %v2886_v61 = vpop.f32.mrf.mxu0  ;;  %v2128_v49 = vmul.f32 0.055555556, %v2110_v43  ;;  %v3962_v54 = vadd.s32 112, %v3834_v24 }
 0x1c8   : > { %v1376_v58 = vpop.f32.mrf.mxu1  ;;  %v2129_v37 = vmul.f32 0.055555556, %v2111_v32  ;;  %v2112_v61 = vadd.f32 0.5, %v2094_v47  ;;  %v2131_v32 = vmul.f32 0.055555556, %v2113_v8 }
 0x1c9   : > { %v1609_v59 = vpop.f32.mrf.mxu0  ;;  %v1399_v62 = vadd.f32 %v1376_v58, %v3796_v14  ;;  %v2162_v14 = vmul.f32 18.0, %v2144_v44  ;;  %v2146_v29 = vfloor.f32 %v2128_v49 }
 0x1ca   : > { %v3862_v42 = vadd.f32 %v1609_v59, %v1397_v35  ;;  %v2855_v33 = vpop.f32.mrf.mxu1  ;;  %v2130_v44 = vmul.f32 0.055555556, %v2112_v61 }
 0x1cb   : > { %v2889_v41 = vpop.f32.mrf.mxu0  ;;  %v2180_v35 = vsub.f32 %v2090_v50, %v2162_v14  ;;  %v2164_v58 = vmul.f32 18.0, %v2146_v29 }
 0x1cc   : > { %v1379_v9 = vpop.f32.mrf.mxu1 }
 0x1cd   : > { %v1612_v7 = vpop.f32.mrf.mxu0  ;;  %v1400_v46 = vadd.f32 %v1379_v9, %v3799_v15  ;;  %v2163_v15 = vmul.f32 18.0, %v2145_v51  ;;  %vm2198_vm10 = vcmp.lt.f32.partialorder %v2180_v35, 15.5  ;;  %v2519_v9 = vsel %vm2197_vm9, 1.0, %v3027_v1 }
 0x1ce   : > { %v3871_v23 = vadd.f32 %v1612_v7, %v1398_v28  ;;  %v2856_v13 = vpop.f32.mrf.mxu1  ;;  %v3886_v28 = vadd.s32 56, %v3834_v24  ;;  %v2182_v14 = vsub.f32 %v2092_v53, %v2164_v58 }
 0x1cf   : > { %v2890_v17 = vpop.f32.mrf.mxu0  ;;  %v2181_v59 = vsub.f32 %v2091_v55, %v2163_v15 }
 0x1d0   : > { %v1802_v39 = vpop.f32.mrf.mxu1  ;;  %v2096_v43 = vcvt.s32.f32 %v3886_v28  ;;  %vm2200_vm12 = vcmp.lt.f32.partialorder %v2182_v14, 15.5 }
 0x1d1   : > { %v1617_v27 = vpop.f32.mrf.mxu0  ;;  %v1873_v50 = vadd.f32 %v1802_v39, %v3802_v45  ;;  %v3900_v45 = vadd.s32 72, %v3834_v24  ;;  %vm2199_vm11 = vcmp.lt.f32.partialorder %v2181_v59, 15.5 }
 0x1d2   : > { %v3880_v48 = vadd.f32 %v1617_v27, %v1399_v62  ;;  %v2899_v34 = vpop.f32.mrf.mxu1  ;;  %v2147_v62 = vfloor.f32 %v2129_v37  ;;  %v2148_v27 = vfloor.f32 %v2130_v44  ;;  %v2114_v39 = vadd.f32 0.5, %v2096_v43 }
 0x1d3   : > { %v2893_v18 = vpop.f32.mrf.mxu0  ;;  %v2098_v35 = vcvt.s32.f32 %v3900_v45 }
 0x1d4   : > { %v1805_v5 = vpop.f32.mrf.mxu1  ;;  %v2165_v13 = vmul.f32 18.0, %v2147_v62  ;;  %v2132_v58 = vmul.f32 0.055555556, %v2114_v39 }
 0x1d5   : > { %v1620_v60 = vpop.f32.mrf.mxu0  ;;  %v1874_v55 = vadd.f32 %v1805_v5, %v3805_v20  ;;  %v2115_v20 = vadd.f32 0.5, %v2097_v4  ;;  %v2116_v59 = vadd.f32 0.5, %v2098_v35 }
 0x1d6   : > { %v3888_v40 = vadd.f32 %v1620_v60, %v1400_v46  ;;  %v2900_v41 = vpop.f32.mrf.mxu1  ;;  %v2520_v46 = vsel %vm2198_vm10, 1.0, %v3027_v1  ;;  %v2521_v60 = vsel %vm2199_vm11, 1.0, %v3027_v1  ;;  %v2183_v5 = vsub.f32 %v2093_v10, %v2165_v13 }
 0x1d7   : > { %v2894_v57 = vpop.f32.mrf.mxu0 }
 0x1d8   : > { %v1810_v7 = vpop.f32.mrf.mxu1  ;;  %v2166_v57 = vmul.f32 18.0, %v2148_v27  ;;  %vm2201_vm13 = vcmp.lt.f32.partialorder %v2183_v5, 15.5 }
 0x1d9   : > { %v1981_v36 = vpop.f32.mrf.mxu0  ;;  %v1875_v53 = vadd.f32 %v1810_v7, %v3808_v30  ;;  %v2133_v30 = vmul.f32 0.055555556, %v2115_v20  ;;  %v2099_v7 = vcvt.s32.f32 %v3913_v52 }
 0x1da   : > { %v2052_v33 = vadd.f32 %v1981_v36, %v1873_v50  ;;  %v2903_v51 = vpop.f32.mrf.mxu1  ;;  %v2149_v50 = vfloor.f32 %v2131_v32 }
 0x1db   : > { %v2937_v17 = vpop.f32.mrf.mxu0  ;;  %v2522_v51 = vsel %vm2200_vm12, 1.0, %v3027_v1  ;;  %v2151_v20 = vfloor.f32 %v2133_v30 }
 0x1dc   : > { %v2251_v18 = vmul.f32 %v2519_v9, %v2052_v33  ;;  %v1813_v15 = vpop.f32.mrf.mxu1  ;;  %v3924_v17 = vadd.s32 88, %v3834_v24  ;;  %v2167_v13 = vmul.f32 18.0, %v2149_v50 }
 0x1dd   : > { %v1984_v49 = vpop.f32.mrf.mxu0  ;;  %v1876_v11 = vadd.f32 %v1813_v15, %v3811_v12  ;;  %v2134_v12 = vmul.f32 0.055555556, %v2116_v59  ;;  %v2117_v15 = vadd.f32 0.5, %v2099_v7 }
 0x1de   : > { %v2053_v6 = vadd.f32 %v1984_v49, %v1874_v55  ;;  %v2904_v37 = vpop.f32.mrf.mxu1  ;;  %v2293_v41 = vmul.f32 %v2251_v18, %v2052_v33  ;;  %v2184_v49 = vsub.f32 %v2094_v47, %v2166_v57  ;;  %v2185_v57 = vsub.f32 %v2095_v21, %v2167_v13 }
 0x1df   : > { %v2938_v29 = vpop.f32.mrf.mxu0 }
 0x1e0   : > { %v2252_v34 = vmul.f32 %v2520_v46, %v2053_v6  ;;  %v1818_v8 = vpop.f32.mrf.mxu1  ;;  %vm2202_vm14 = vcmp.lt.f32.partialorder %v2184_v49, 15.5  ;;  %vm2203_vm15 = vcmp.lt.f32.partialorder %v2185_v57, 15.5 }
 0x1e1   : > { %v1989_v61 = vpop.f32.mrf.mxu0  ;;  %v1877_v14 = vadd.f32 %v1818_v8, %v3814_v2  ;;  %v2152_v8 = vfloor.f32 %v2134_v12  ;;  %v2525_v28 = vsel %vm2203_vm15, 1.0, %v3027_v1 }
 0x1e2   : > { %v2269_v36 = vadd.f32 %v2252_v34, %v2251_v18  ;;  %v2294_v62 = vmul.f32 %v2252_v34, %v2053_v6  ;;  %v2054_v44 = vadd.f32 %v1989_v61, %v1875_v53  ;;  %v2907_v46 = vpop.f32.mrf.mxu1  ;;  %v2150_v18 = vfloor.f32 %v2132_v58 }
 0x1e3   : > { %v2941_v9 = vpop.f32.mrf.mxu0  ;;  %v2100_v53 = vcvt.s32.f32 %v3924_v17  ;;  %v2523_v61 = vsel %vm2201_vm13, 1.0, %v3027_v1  ;;  %v3949_v46 = vadd.s32 104, %v3834_v24  ;;  %v3994_v17 = vadd.s32 136, %v3834_v24 }
 0x1e4   : > { %v2311_v10 = vadd.f32 %v2294_v62, %v2293_v41  ;;  %v2253_v55 = vmul.f32 %v2521_v60, %v2054_v44  ;;  %v1821_v6 = vpop.f32.mrf.mxu1  ;;  %v2135_v9 = vmul.f32 0.055555556, %v2117_v15 }
 0x1e5   : > { %v1992_v33 = vpop.f32.mrf.mxu0  ;;  %v2118_v30 = vadd.f32 0.5, %v2100_v53  ;;  %v1878_v59 = vadd.f32 %v1821_v6, %v3817_v38 }
 0x1e6   : > { %v2270_v27 = vadd.f32 %v2269_v36, %v2253_v55  ;;  %v2295_v32 = vmul.f32 %v2253_v55, %v2054_v44  ;;  %v2055_v39 = vadd.f32 %v1992_v33, %v1876_v11  ;;  %v2908_v47 = vpop.f32.mrf.mxu1  ;;  %v2168_v36 = vmul.f32 18.0, %v2150_v18 }
 0x1e7   : > { %v2942_v29 = vpop.f32.mrf.mxu0  ;;  %v2169_v44 = vmul.f32 18.0, %v2151_v20  ;;  %v2524_v55 = vsel %vm2202_vm14, 1.0, %v3027_v1  ;;  %v2170_v18 = vmul.f32 18.0, %v2152_v8  ;;  %v2153_v6 = vfloor.f32 %v2135_v9 }
 0x1e8   : > { %v2312_v34 = vadd.f32 %v2311_v10, %v2295_v32  ;;  %v2254_v60 = vmul.f32 %v2522_v51, %v2055_v39  ;;  %v1826_v62 = vpop.f32.mrf.mxu1  ;;  %v2101_v10 = vcvt.s32.f32 %v3936_v3  ;;  %v2136_v29 = vmul.f32 0.055555556, %v2118_v30 }
 0x1e9   : > { %v1997_v37 = vpop.f32.mrf.mxu0  ;;  %v1879_v49 = vadd.f32 %v1826_v62, %v3820_v0  ;;  %v2103_v30 = vcvt.s32.f32 %v3962_v54 }
 0x1ea   : > { %v2271_v50 = vadd.f32 %v2270_v27, %v2254_v60  ;;  %v2296_v58 = vmul.f32 %v2254_v60, %v2055_v39  ;;  %v2056_v41 = vadd.f32 %v1997_v37, %v1877_v14  ;;  %v2911_v56 = vpop.f32.mrf.mxu1  ;;  %v2186_v27 = vsub.f32 %v2096_v43, %v2168_v36 }
 0x1eb   : > { %v2945_v2 = vpop.f32.mrf.mxu0  ;;  %v2187_v39 = vsub.f32 %v2097_v4, %v2169_v44  ;;  %v2119_v15 = vadd.f32 0.5, %v2101_v10  ;;  %v2102_v43 = vcvt.s32.f32 %v3949_v46 }
 0x1ec   : > { %v2313_v5 = vadd.f32 %v2312_v34, %v2296_v58  ;;  %v2255_v11 = vmul.f32 %v2523_v61, %v2056_v41  ;;  %v1829_v38 = vpop.f32.mrf.mxu1  ;;  %vm2204_vm0 = vcmp.lt.f32.partialorder %v2186_v27, 15.5  ;;  %v2188_v61 = vsub.f32 %v2098_v35, %v2170_v18 }
 0x1ed   : > { %v2000_v21 = vpop.f32.mrf.mxu0  ;;  %vm2205_vm1 = vcmp.lt.f32.partialorder %v2187_v39, 15.5  ;;  %v2154_v58 = vfloor.f32 %v2136_v29  ;;  %v1880_v57 = vadd.f32 %v1829_v38, %v3823_v22  ;;  %v2137_v62 = vmul.f32 0.055555556, %v2119_v15 }
 0x1ee   : > { %v2272_v33 = vadd.f32 %v2271_v50, %v2255_v11  ;;  %v2297_v51 = vmul.f32 %v2255_v11, %v2056_v41  ;;  %v2057_v13 = vadd.f32 %v2000_v21, %v1878_v59  ;;  %v2912_v14 = vpop.f32.mrf.mxu1  ;;  %v2171_v50 = vmul.f32 18.0, %v2153_v6 }
 0x1ef   : > { %v2946_v32 = vpop.f32.mrf.mxu0  ;;  %v2526_v8 = vsel %vm2204_vm0, 1.0, %v3027_v1  ;;  %v2120_v9 = vadd.f32 0.5, %v2102_v43  ;;  %v3972_v59 = vadd.s32 120, %v3834_v24  ;;  %v2527_v56 = vsel %vm2205_vm1, 1.0, %v3027_v1 }
 0x1f0   : > { %v2314_v20 = vadd.f32 %v2313_v5, %v2297_v51  ;;  %v2256_v12 = vmul.f32 %v2524_v55, %v2057_v13  ;;  %v1834_v0 = vpop.f32.mrf.mxu1  ;;  %vm2206_vm2 = vcmp.lt.f32.partialorder %v2188_v61, 15.5  ;;  %v2189_v21 = vsub.f32 %v2099_v7, %v2171_v50 }
 0x1f1   : > { %v2005_v34 = vpop.f32.mrf.mxu0  ;;  %v2172_v55 = vmul.f32 18.0, %v2154_v58  ;;  %v2155_v27 = vfloor.f32 %v2137_v62  ;;  %v2138_v18 = vmul.f32 0.055555556, %v2120_v9  ;;  %v2121_v6 = vadd.f32 0.5, %v2103_v30 }
 0x1f2   : > { %v2273_v4 = vadd.f32 %v2272_v33, %v2256_v12  ;;  %v2298_v60 = vmul.f32 %v2256_v12, %v2057_v13  ;;  %v2058_v47 = vadd.f32 %v2005_v34, %v1879_v49  ;;  %v2915_v2 = vpop.f32.mrf.mxu1  ;;  %v1881_v33 = vadd.f32 %v1834_v0, %v3826_v16 }
 0x1f3   : > { %v2949_v37 = vpop.f32.mrf.mxu0  ;;  %v2104_v29 = vcvt.s32.f32 %v3972_v59  ;;  %v3983_v39 = vadd.s32 128, %v3834_v24  ;;  %v2528_v16 = vsel %vm2206_vm2, 1.0, %v3027_v1  ;;  %vm2207_vm3 = vcmp.lt.f32.partialorder %v2189_v21, 15.5 }
 0x1f4   : > { %v2315_v41 = vadd.f32 %v2314_v20, %v2298_v60  ;;  %v2257_v36 = vmul.f32 %v2525_v28, %v2058_v47  ;;  %v1837_v11 = vpop.f32.mrf.mxu1  ;;  %v2190_v15 = vsub.f32 %v2100_v53, %v2172_v55  ;;  %v2156_v0 = vfloor.f32 %v2138_v18 }
 0x1f5   : > { %v2008_v44 = vpop.f32.mrf.mxu0  ;;  %v1882_v14 = vadd.f32 %v1837_v11, %v3829_v63  ;;  %v2139_v37 = vmul.f32 0.055555556, %v2121_v6  ;;  %v2122_v50 = vadd.f32 0.5, %v2104_v29  ;;  %v2105_v58 = vcvt.s32.f32 %v3983_v39 }
 0x1f6   : > { %v2274_v45 = vadd.f32 %v2273_v4, %v2257_v36  ;;  %v2299_v35 = vmul.f32 %v2257_v36, %v2058_v47  ;;  %v2059_v5 = vadd.f32 %v2008_v44, %v1880_v57  ;;  %v2916_v38 = vpop.f32.mrf.mxu1  ;;  %v2173_v4 = vmul.f32 18.0, %v2155_v27 }
 0x1f7   : > { %v2950_v22 = vpop.f32.mrf.mxu0  ;;  %v2529_v36 = vsel %vm2207_vm3, 1.0, %v3027_v1  ;;  %vm2208_vm4 = vcmp.lt.f32.partialorder %v2190_v15, 15.5  ;;  %v2140_v11 = vmul.f32 0.055555556, %v2122_v50  ;;  %v2123_v24 = vadd.f32 0.5, %v2105_v58 }
 0x1f8   : > { %v2316_v51 = vadd.f32 %v2315_v41, %v2299_v35  ;;  %v2258_v13 = vmul.f32 %v2526_v8, %v2059_v5  ;;  %v1842_v20 = vpop.f32.mrf.mxu1  ;;  %v2191_v8 = vsub.f32 %v2101_v10, %v2173_v4  ;;  %v2174_v35 = vmul.f32 18.0, %v2156_v0 }
 0x1f9   : > { %v2013_v32 = vpop.f32.mrf.mxu0  ;;  %v1883_v62 = vadd.f32 %v1842_v20, %v3832_v26  ;;  %v2106_v55 = vcvt.s32.f32 %v3994_v17  ;;  %v2158_v6 = vfloor.f32 %v2140_v11 }
 0x1fa   : > { %v2275_v49 = vadd.f32 %v2274_v45, %v2258_v13  ;;  %v2300_v52 = vmul.f32 %v2258_v13, %v2059_v5  ;;  %v2060_v7 = vadd.f32 %v2013_v32, %v1881_v33  ;;  %v2919_v60 = vpop.f32.mrf.mxu1  ;;  %v2157_v5 = vfloor.f32 %v2139_v37 }
 0x1fb   : > { %v2953_v12 = vpop.f32.mrf.mxu0  ;;  %vm2209_vm5 = vcmp.lt.f32.partialorder %v2191_v8, 15.5  ;;  %v2192_v32 = vsub.f32 %v2102_v43, %v2174_v35  ;;  %v2176_v60 = vmul.f32 18.0, %v2158_v6 }
 0x1fc   : > { %v2317_v34 = vadd.f32 %v2316_v51, %v2300_v52  ;;  %v2259_v28 = vmul.f32 %v2527_v56, %v2060_v7  ;;  %v1845_v53 = vpop.f32.mrf.mxu1  ;;  %v2530_v51 = vsel %vm2208_vm4, 1.0, %v3027_v1  ;;  %v2175_v18 = vmul.f32 18.0, %v2157_v5 }
 0x1fd   : > { %v2016_v47 = vpop.f32.mrf.mxu0  ;;  %v1884_v3 = vadd.f32 %v1845_v53, %v3840_v19  ;;  %v2124_v12 = vadd.f32 0.5, %v2106_v55  ;;  %vm2210_vm6 = vcmp.lt.f32.partialorder %v2192_v32, 15.5  ;;  %v2194_v54 = vsub.f32 %v2104_v29, %v2176_v60 }
 0x1fe   : > { %v2276_v61 = vadd.f32 %v2275_v49, %v2259_v28  ;;  %v2301_v57 = vmul.f32 %v2259_v28, %v2060_v7  ;;  %v2061_v41 = vadd.f32 %v2016_v47, %v1882_v14  ;;  %v2920_v9 = vpop.f32.mrf.mxu1  ;;  %v2141_v49 = vmul.f32 0.055555556, %v2123_v24 }
 0x1ff   : > { %v2954_v63 = vpop.f32.mrf.mxu0  ;;  %v2531_v28 = vsel %vm2209_vm5, 1.0, %v3027_v1  ;;  %v2193_v4 = vsub.f32 %v2103_v30, %v2175_v18  ;;  %vm2212_vm8 = vcmp.lt.f32.partialorder %v2194_v54, 15.5 }
 0x200   : > { %v2318_v2 = vadd.f32 %v2317_v34, %v2301_v57  ;;  %v2260_v44 = vmul.f32 %v2528_v16, %v2061_v41  ;;  %v1850_v33 = vpop.f32.mrf.mxu1  ;;  %v2159_v47 = vfloor.f32 %v2141_v49  ;;  %v2534_v18 = vsel %vm2212_vm8, 1.0, %v3027_v1 }
 0x201   : > { %v2021_v45 = vpop.f32.mrf.mxu0  ;;  %v1885_v19 = vadd.f32 %v1850_v33, %v3848_v31  ;;  %vm2211_vm7 = vcmp.lt.f32.partialorder %v2193_v4, 15.5 }
 0x202   : > { %v2277_v22 = vadd.f32 %v2276_v61, %v2260_v44  ;;  %v2302_v56 = vmul.f32 %v2260_v44, %v2061_v41  ;;  %v2062_v21 = vadd.f32 %v2021_v45, %v1883_v62  ;;  %v2923_v27 = vpop.f32.mrf.mxu1  ;;  %v2142_v61 = vmul.f32 0.055555556, %v2124_v12 }
 0x203   : > { %v2957_v26 = vpop.f32.mrf.mxu0  ;;  %v2177_v30 = vmul.f32 18.0, %v2159_v47 }
 0x204   : > { %v2319_v10 = vadd.f32 %v2318_v2, %v2302_v56  ;;  %v2261_v13 = vmul.f32 %v2529_v36, %v2062_v21  ;;  %v1853_v16 = vpop.f32.mrf.mxu1  ;;  %v2532_v2 = vsel %vm2210_vm6, 1.0, %v3027_v1  ;;  %v2160_v45 = vfloor.f32 %v2142_v61 }
 0x205   : > { %v2024_v38 = vpop.f32.mrf.mxu0  ;;  %v1886_v31 = vadd.f32 %v1853_v16, %v3855_v25  ;;  %v2195_v59 = vsub.f32 %v2105_v58, %v2177_v30 }
 0x206   : > { %v2278_v52 = vadd.f32 %v2277_v22, %v2261_v13  ;;  %v2303_v7 = vmul.f32 %v2261_v13, %v2062_v21  ;;  %v2063_v20 = vadd.f32 %v2024_v38, %v1884_v3  ;;  %v2924_v46 = vpop.f32.mrf.mxu1  ;;  %v2533_v21 = vsel %vm2211_vm7, 1.0, %v3027_v1 }
 0x207   : > { %v2958_v15 = vpop.f32.mrf.mxu0  ;;  %vm2213_vm9 = vcmp.lt.f32.partialorder %v2195_v59, 15.5 }
 0x208   : > { %v2320_v14 = vadd.f32 %v2319_v10, %v2303_v7  ;;  %v2262_v34 = vmul.f32 %v2530_v51, %v2063_v20  ;;  %v1858_v57 = vpop.f32.mrf.mxu1  ;;  %v2178_v51 = vmul.f32 18.0, %v2160_v45 }
 0x209   : > { %v2029_v43 = vpop.f32.mrf.mxu0  ;;  %v1887_v11 = vadd.f32 %v1858_v57, %v3862_v42 }
 0x20a   : > { %v2279_v0 = vadd.f32 %v2278_v52, %v2262_v34  ;;  %v2304_v37 = vmul.f32 %v2262_v34, %v2063_v20  ;;  %v2064_v50 = vadd.f32 %v2029_v43, %v1885_v19  ;;  %v2927_v36 = vpop.f32.mrf.mxu1  ;;  %v2196_v39 = vsub.f32 %v2106_v55, %v2178_v51 }
 0x20b   : > { %v2961_v41 = vpop.f32.mrf.mxu0  ;;  %v2535_v19 = vsel %vm2213_vm9, 1.0, %v3027_v1 }
 0x20c   : > { %v2321_v53 = vadd.f32 %v2320_v14, %v2304_v37  ;;  %v2263_v63 = vmul.f32 %v2531_v28, %v2064_v50  ;;  %v1861_v35 = vpop.f32.mrf.mxu1  ;;  %vm2214_vm10 = vcmp.lt.f32.partialorder %v2196_v39, 15.5 }
 0x20d   : > { %v2032_v62 = vpop.f32.mrf.mxu0  ;;  %v1888_v13 = vadd.f32 %v1861_v35, %v3871_v23  ;;  %v2536_v60 = vsel %vm2214_vm10, 1.0, %v3027_v1 }
 0x20e   : > { %v2280_v44 = vadd.f32 %v2279_v0, %v2263_v63  ;;  %v2305_v8 = vmul.f32 %v2263_v63, %v2064_v50  ;;  %v2065_v9 = vadd.f32 %v2032_v62, %v1886_v31  ;;  %v2928_v22 = vpop.f32.mrf.mxu1 }
 0x20f   : > { %v2962_v5 = vpop.f32.mrf.mxu0 }
 0x210   : > { %v2322_v25 = vadd.f32 %v2321_v53, %v2305_v8  ;;  %v2264_v24 = vmul.f32 %v2532_v2, %v2065_v9  ;;  %v1866_v3 = vpop.f32.mrf.mxu1 }
 0x211   : > { %v2037_v56 = vpop.f32.mrf.mxu0  ;;  %v1889_v20 = vadd.f32 %v1866_v3, %v3880_v48 }
 0x212   : > { %v2281_v29 = vadd.f32 %v2280_v44, %v2264_v24  ;;  %v2306_v33 = vmul.f32 %v2264_v24, %v2065_v9  ;;  %v2066_v26 = vadd.f32 %v2037_v56, %v1887_v11  ;;  %v2931_v38 = vpop.f32.mrf.mxu1 }
 0x213   : > { %v2965_v10 = vpop.f32.mrf.mxu0 }
 0x214   : > { %v2323_v27 = vadd.f32 %v2322_v25, %v2306_v33  ;;  %v2265_v42 = vmul.f32 %v2533_v21, %v2066_v26  ;;  %v1869_v58 = vpop.f32.mrf.mxu1 }
 0x215   : > { %v2040_v32 = vpop.f32.mrf.mxu0  ;;  %v1890_v43 = vadd.f32 %v1869_v58, %v3888_v40 }
 0x216   : > { %v2282_v6 = vadd.f32 %v2281_v29, %v2265_v42  ;;  %v2307_v49 = vmul.f32 %v2265_v42, %v2066_v26  ;;  %v2067_v52 = vadd.f32 %v2040_v32, %v1888_v13  ;;  %v2932_v23 = vpop.f32.mrf.mxu1 }
 0x217   : > { %v2966_v7 = vpop.f32.mrf.mxu0 }
 0x218   : > { %v2324_v12 = vadd.f32 %v2323_v27, %v2307_v49  ;;  %v2266_v16 = vmul.f32 %v2534_v18, %v2067_v52 }
 0x219   : > { %v2045_v15 = vpop.f32.mrf.mxu0 }
 0x21a   : > { %v2283_v14 = vadd.f32 %v2282_v6, %v2266_v16  ;;  %v2308_v34 = vmul.f32 %v2266_v16, %v2067_v52  ;;  %v2068_v28 = vadd.f32 %v2045_v15, %v1889_v20 }
 0x21b   : > { %v2969_v46 = vpop.f32.mrf.mxu0 }
 0x21c   : > { %v2325_v4 = vadd.f32 %v2324_v12, %v2308_v34  ;;  %v2267_v17 = vmul.f32 %v2535_v19, %v2068_v28 }
 0x21d   : > { %v2048_v55 = vpop.f32.mrf.mxu0 }
 0x21e   : > { %v2284_v48 = vadd.f32 %v2283_v14, %v2267_v17  ;;  %v2309_v47 = vmul.f32 %v2267_v17, %v2068_v28  ;;  %v2069_v0 = vadd.f32 %v2048_v55, %v1890_v43 }
 0x21f   : > { %v2970_v37 = vpop.f32.mrf.mxu0 }
 0x220   : > { %v2326_v50 = vadd.f32 %v2325_v4, %v2309_v47  ;;  %v2268_v61 = vmul.f32 %v2536_v60, %v2069_v0 }
 0x222   : > { %v2285_v57 = vadd.f32 %v2284_v48, %v2268_v61  ;;  %v2310_v41 = vmul.f32 %v2268_v61, %v2069_v0 }
 0x224   : > { %v2286_v31 = vrot.slane %v2285_v57, 4  ;;  %v2327_v53 = vadd.f32 %v2326_v50, %v2310_v41 }
 0x226   : > { %v2287_v63 = vadd.f32 %v2286_v31, %v2285_v57  ;;  %v2328_v36 = vrot.slane %v2327_v53, 4 }
 0x228   : > { %v2288_v62 = vrot.slane %v2287_v63, 2  ;;  %v2329_v40 = vadd.f32 %v2328_v36, %v2327_v53 }
 0x22a   : > { %v2289_v2 = vadd.f32 %v2288_v62, %v2287_v63  ;;  %v2330_v54 = vrot.slane %v2329_v40, 2 }
 0x22c   : > { %v2290_v30 = vrot.slane %v2289_v2, 1  ;;  %v2331_v44 = vadd.f32 %v2330_v54, %v2329_v40 }
 0x22e   : > { %v2291_v1 = vadd.f32 %v2290_v30, %v2289_v2  ;;  %v2332_v8 = vrot.slane %v2331_v44, 1 }
 0x230   : > { %2292 = vst [vmem:[%s141_s8] sm:$0x1] %v2291_v1  ;;  %v2333_v9 = vadd.f32 %v2332_v8, %v2331_v44 }
 0x232   : > { %2334 = vst [vmem:[%s141_s8 + $0x1] sm:$0x1] %v2333_v9 }
 0x233 PF: > { %s12_s9 = sadd.s32 1, %s3025_s9  }
 0x234   : > { %p9_p4 = scmp.ge.s32.totalorder %s12_s9, 6  }
 0x236   :  { %11 = sbr.rel (!%p9_p4) target bundleno = 1 (0x1), region = 66 }

</bundles_post_ra>
